<compile_context>
chip_gen: v7x
topology: tpu7x:2x2x1
jax: 0.10.0
libtpu: 0.0.40
codegen_flags: <defaults>
</compile_context>

<pallas_src>
import functools

import jax
import jax.numpy as jnp
from jax import lax
from jax.experimental import pallas as pl
from jax.experimental.pallas import tpu as pltpu

# ---- tiny synthetic "t5" config (deterministic weights, not a checkpoint) ----
VOCAB = 256
D_MODEL = 128                     # lane-dense activations
N_HEADS = 4
D_KV = 32
D_INNER = N_HEADS * D_KV          # 128 -> lane-aligned Q/K/V splits
D_FF = 256
S_ENC = 8
S_DEC = 8
EPS = 1e-6
NEG = -1e9


# --------------------------- in-kernel helpers --------------------------------

def _rms(x, w):
    # T5 LayerNorm: no mean subtraction, no bias.
    var = jnp.mean(jnp.square(x), axis=-1, keepdims=True)
    return x * lax.rsqrt(var + EPS) * w


def _softmax_rows(s):
    m = jnp.max(s, axis=-1, keepdims=True)
    p = jnp.exp(s - m)
    return p * pl.reciprocal(jnp.sum(p, axis=-1, keepdims=True), approx=True)


def _attention(q, k, v, pos_bias, extra_bias, wo3):
    """Multi-head attention for one sequence.  T5 attention: no 1/sqrt(d) scale.
    q:(Sq,H*Dh) bf16, k/v:(Sk,H*Dh) bf16, pos_bias:(H,Sq,Sk) f32 or None,
    extra_bias:(1,Sk) f32 additive mask or None, wo3:(H,Dh,D) bf16.
    Returns (Sq, D_MODEL) f32 (output projection already applied & summed)."""
    out = None
    for h in range(N_HEADS):                      # static unroll over heads
        sl = slice(h * D_KV, (h + 1) * D_KV)
        s = lax.dot_general(q[:, sl], k[:, sl], (((1,), (1,)), ((), ())),
                            preferred_element_type=jnp.float32)
        if pos_bias is not None:
            s = s + pos_bias[h]
        if extra_bias is not None:
            s = s + extra_bias
        p = _softmax_rows(s)
        ctx = jnp.dot(p.astype(jnp.bfloat16), v[:, sl],
                      preferred_element_type=jnp.float32)
        contrib = jnp.dot(ctx.astype(jnp.bfloat16), wo3[h],
                          preferred_element_type=jnp.float32)
        out = contrib if out is None else out + contrib
    return out


# ------------------------------ fused kernel -----------------------------------

def _t5_fused_kernel(b_blk,
                     enc_h_ref, dec_h_ref, maskb_ref, labels_ref, rewards_ref,
                     e_pos_ref, e_wqkv_ref, e_wo_ref, e_wi_ref, e_wff_ref,
                     e_ln1_ref, e_ln2_ref, e_lnf_ref,
                     d_pos_ref, d_wqkv_ref, d_wos_ref, d_wqc_ref, d_wkvc_ref,
                     d_woc_ref, d_wi_ref, d_wff_ref,
                     d_ln1_ref, d_ln2_ref, d_ln3_ref, d_lnf_ref,
                     emb_ref,
                     logits_ref, partial_ref):
    mask_bias = maskb_ref[...]                            # (b_blk, 1, Se)

    # ---------------- encoder (batch chunk folded into matmul M dim) ----------
    xe = enc_h_ref[...].reshape(b_blk * S_ENC, D_MODEL)   # (Me, D) f32
    xn = _rms(xe, e_ln1_ref[...]).astype(jnp.bfloat16)
    qkv = jnp.dot(xn, e_wqkv_ref[...],
                  preferred_element_type=jnp.float32).astype(jnp.bfloat16)
    q = qkv[:, :D_INNER]                                  # lane-aligned splits
    k = qkv[:, D_INNER:2 * D_INNER]
    v = qkv[:, 2 * D_INNER:]
    e_pos = e_pos_ref[...]
    e_wo3 = e_wo_ref[...]
    rows = []
    for b in range(b_blk):                                # attention per-sequence
        r = slice(b * S_ENC, (b + 1) * S_ENC)
        rows.append(_attention(q[r], k[r], v[r], e_pos, mask_bias[b], e_wo3))
    xe = xe + jnp.concatenate(rows, axis=0)

    xn = _rms(xe, e_ln2_ref[...]).astype(jnp.bfloat16)
    ff = jax.nn.relu(jnp.dot(xn, e_wi_ref[...],
                             preferred_element_type=jnp.float32))
    xe = xe + jnp.dot(ff.astype(jnp.bfloat16), e_wff_ref[...],
                      preferred_element_type=jnp.float32)
    # encoder output never leaves VMEM; kept bf16 (it only feeds bf16 matmuls)
    enc_out = _rms(xe, e_lnf_ref[...]).astype(jnp.bfloat16)

    # ---------------- decoder -------------------------------------------------
    xd = dec_h_ref[...].reshape(b_blk * S_DEC, D_MODEL)   # (Md, D) f32

    # self attention (causal mask pre-folded into d_pos at pack_params time)
    xn = _rms(xd, d_ln1_ref[...]).astype(jnp.bfloat16)
    qkv = jnp.dot(xn, d_wqkv_ref[...],
                  preferred_element_type=jnp.float32).astype(jnp.bfloat16)
    q = qkv[:, :D_INNER]
    k = qkv[:, D_INNER:2 * D_INNER]
    v = qkv[:, 2 * D_INNER:]
    d_pos = d_pos_ref[...]
    d_wo3 = d_wos_ref[...]
    rows = []
    for b in range(b_blk):
        r = slice(b * S_DEC, (b + 1) * S_DEC)
        rows.append(_attention(q[r], k[r], v[r], d_pos, None, d_wo3))
    xd = xd + jnp.concatenate(rows, axis=0)

    # cross attention (keys / values from the in-VMEM encoder output)
    xn = _rms(xd, d_ln2_ref[...]).astype(jnp.bfloat16)
    qc = jnp.dot(xn, d_wqc_ref[...],
                 preferred_element_type=jnp.float32).astype(jnp.bfloat16)
    kvc = jnp.dot(enc_out, d_wkvc_ref[...],
                  preferred_element_type=jnp.float32).astype(jnp.bfloat16)
    kc = kvc[:, :D_INNER]
    vc = kvc[:, D_INNER:]
    c_wo3 = d_woc_ref[...]
    rows = []
    for b in range(b_blk):
        rq = slice(b * S_DEC, (b + 1) * S_DEC)
        rk = slice(b * S_ENC, (b + 1) * S_ENC)
        rows.append(_attention(qc[rq], kc[rk], vc[rk], None, mask_bias[b], c_wo3))
    xd = xd + jnp.concatenate(rows, axis=0)

    # FFN
    xn = _rms(xd, d_ln3_ref[...]).astype(jnp.bfloat16)
    ff = jax.nn.relu(jnp.dot(xn, d_wi_ref[...],
                             preferred_element_type=jnp.float32))
    xd = xd + jnp.dot(ff.astype(jnp.bfloat16), d_wff_ref[...],
                      preferred_element_type=jnp.float32)
    dec_out = _rms(xd, d_lnf_ref[...])                    # (Md, D) f32

    # ---------------- tied LM head + CE / RL partial sums ---------------------
    # T5 rescales by d_model**-0.5 before the tied head; transposed contraction.
    lm_in = (dec_out * (D_MODEL ** -0.5)).astype(jnp.bfloat16)
    logits = lax.dot_general(lm_in, emb_ref[...], (((1,), (1,)), ((), ())),
                             preferred_element_type=jnp.float32)   # (Md, V)
    logits_ref[...] = logits

    m = jnp.max(logits, axis=-1, keepdims=True)
    shifted = logits - m
    lse = jnp.log(jnp.sum(jnp.exp(shifted), axis=-1, keepdims=True))
    colv = lax.broadcasted_iota(jnp.int32, logits.shape, 1)
    # torch.gather(log_softmax, labels) without a materialized f32 one-hot.
    sel = jnp.sum(jnp.where(colv == labels_ref[...], shifted - lse, 0.0),
                  axis=-1, keepdims=True)                           # (Md, 1)
    # TODO(synk): CrossEntropyLoss ignore_index=-100 masking not modeled (all
    # labels in this synthetic setup are valid token ids).
    sel_sum = jnp.sum(sel, keepdims=True)                           # (1, 1)
    selr_sum = jnp.sum(sel * rewards_ref[...], keepdims=True)       # (1, 1)

    # pack the two per-block partial sums into one lane-padded (8,128) store
    rows_i = lax.broadcasted_iota(jnp.int32, (8, 128), 0)
    lanes_i = lax.broadcasted_iota(jnp.int32, (8, 128), 1)
    partial_ref[...] = (jnp.where((rows_i == 0) & (lanes_i == 0), sel_sum, 0.0)
                        + jnp.where((rows_i == 0) & (lanes_i == 1), selr_sum, 0.0))


# ------------------------------ kernel wrapper ----------------------------------

def fused_t5_forward(packed, enc_h, dec_h, enc_mask_bias, labels2d, rewards2d):
    B, Se, D = enc_h.shape
    Sd = dec_h.shape[1]
    assert Se == S_ENC and Sd == S_DEC and D == D_MODEL
    # >= 2 grid steps when the batch allows it (both v7x TensorCores get work);
    # within a step the batch chunk is folded into the matmul M dimension.
    b_blk = B // 2 if (B % 2 == 0 and B >= 2) else B
    grid_n = B // b_blk

    e, d = packed["enc"], packed["dec"]
    args = (enc_h, dec_h, enc_mask_bias, labels2d, rewards2d,
            e["pos_bias"], e["wqkv"], e["wo3"], e["wi"], e["wff"],
            e["ln1"], e["ln2"], e["ln_f"],
            d["pos_bias"], d["wqkv"], d["wos3"], d["wqc"], d["wkvc"], d["woc3"],
            d["wi"], d["wff"], d["ln1"], d["ln2"], d["ln3"], d["ln_f"],
            packed["shared_bf16"])

    def w(shape):
        # Constant-index weight spec.  TODO(synk): at real T5 scale add
        # pipeline_mode=pl.Buffered(1) to single-buffer these and halve weight
        # VMEM (irrelevant at this toy size).
        if len(shape) == 2:
            return pl.BlockSpec(shape, lambda g: (0, 0))
        return pl.BlockSpec(shape, lambda g: (0, 0, 0))

    in_specs = [
        pl.BlockSpec((b_blk, Se, D), lambda g: (g, 0, 0)),       # enc_h
        pl.BlockSpec((b_blk, Sd, D), lambda g: (g, 0, 0)),       # dec_h
        pl.BlockSpec((b_blk, 1, Se), lambda g: (g, 0, 0)),       # enc mask bias
        pl.BlockSpec((b_blk * Sd, 1), lambda g: (g, 0)),         # labels
        pl.BlockSpec((b_blk * Sd, 1), lambda g: (g, 0)),         # rewards
        # encoder weights
        w((N_HEADS, Se, Se)), w((D_MODEL, 3 * D_INNER)), w((N_HEADS, D_KV, D_MODEL)),
        w((D_MODEL, D_FF)), w((D_FF, D_MODEL)),
        w((1, D_MODEL)), w((1, D_MODEL)), w((1, D_MODEL)),
        # decoder weights
        w((N_HEADS, Sd, Sd)), w((D_MODEL, 3 * D_INNER)), w((N_HEADS, D_KV, D_MODEL)),
        w((D_MODEL, D_INNER)), w((D_MODEL, 2 * D_INNER)), w((N_HEADS, D_KV, D_MODEL)),
        w((D_MODEL, D_FF)), w((D_FF, D_MODEL)),
        w((1, D_MODEL)), w((1, D_MODEL)), w((1, D_MODEL)), w((1, D_MODEL)),
        # tied embedding (LM head)
        w((VOCAB, D_MODEL)),
    ]

    # advisory cost estimate so XLA schedules the gathers around this call tightly
    att_cells = N_HEADS * (Se * Se + Sd * Sd + Sd * Se)
    flops = 2 * B * (
        Se * (D_MODEL * 3 * D_INNER + D_INNER * D_MODEL + 2 * D_MODEL * D_FF)
        + Sd * (D_MODEL * 3 * D_INNER + D_INNER * D_MODEL
                + D_MODEL * D_INNER + D_INNER * D_MODEL
                + 2 * D_MODEL * D_FF + D_MODEL * VOCAB)
        + Se * D_MODEL * 2 * D_INNER
        + att_cells * 2 * D_KV)
    transcendentals = B * (att_cells + Sd * VOCAB)
    bytes_accessed = int(sum(int(a.size) * a.dtype.itemsize for a in args)
                         + B * Sd * VOCAB * 4 + grid_n * 8 * 128 * 4)
    cost = pl.CostEstimate(flops=int(flops),
                           transcendentals=int(transcendentals),
                           bytes_accessed=bytes_accessed)

    logits, partials = pl.pallas_call(
        functools.partial(_t5_fused_kernel, b_blk),
        out_shape=(jax.ShapeDtypeStruct((B * Sd, VOCAB), jnp.float32),
                   jax.ShapeDtypeStruct((grid_n, 8, 128), jnp.float32)),
        grid=(grid_n,),
        in_specs=in_specs,
        out_specs=(pl.BlockSpec((b_blk * Sd, VOCAB), lambda g: (g, 0)),
                   pl.BlockSpec((None, 8, 128), lambda g: (g, 0, 0))),
        compiler_params=pltpu.CompilerParams(dimension_semantics=("parallel",)),
        cost_estimate=cost,
    )(*args)
    return logits, partials


# ------------------------------- JAX glue ---------------------------------------

def t5_generator_forward(packed, input_ids, attention_mask, labels, rewards,
                         current_epoch=0, total_epochs=10):
    """Mirrors T5Generator.forward(input_ids, attention_mask, labels, rewards)."""
    labels = labels.astype(jnp.int32)                       # labels.long()
    B, Td = labels.shape
    # T5 _shift_right: decoder_start_token_id = 0
    dec_input_ids = jnp.concatenate(
        [jnp.zeros((B, 1), jnp.int32), labels[:, :-1]], axis=1)

    # embedding lookups (gather) stay in JAX
    enc_h = packed["shared_f32"][input_ids]                 # (B, Se, D) f32
    dec_h = packed["shared_f32"][dec_input_ids]             # (B, Sd, D) f32

    # per-batch additive encoder padding mask (no (B,H,S,S) broadcast in HBM)
    enc_mask_bias = ((1.0 - attention_mask.astype(jnp.float32)) * NEG)[:, None, :]

    logits2d, partials = fused_t5_forward(
        packed, enc_h, dec_h, enc_mask_bias,
        labels.reshape(B * Td, 1),
        rewards.astype(jnp.float32).reshape(B * Td, 1))

    # tiny final reduction + alpha blend in JAX (keeps the grid axis "parallel")
    n = B * Td
    sel_sum = jnp.sum(partials[:, 0, 0])
    selr_sum = jnp.sum(partials[:, 0, 1])
    ce = -sel_sum / n                                        # CrossEntropyLoss mean
    rl = -selr_sum / n                                       # -(sel_logp * rewards).mean()
    alpha = jnp.maximum(0.2, 1.0 - current_epoch / total_epochs)
    combined = alpha * ce + (1.0 - alpha) * rl
    logits = logits2d.reshape(B, Td, VOCAB)
    # CombinedOutput(combined_loss, logits), plus components for inspection.
    # (F.softmax probs are computed but unused in the torch module -> skipped.)
    return combined, ce, rl, logits


# TODO(synk): tokenizer / pretrained-checkpoint load and the autoregressive
# `generate()` sampling loop (top-p / top-k / repetition penalty / n-gram block)
# have no clean single-kernel Pallas equivalent and are intentionally omitted.


def init_params(key):
    keys = iter(jax.random.split(key, 64))

    def nrm(shape, scale=0.02):
        return jax.random.normal(next(keys), shape, jnp.float32) * scale

    def attn_params():
        return {"q": nrm((D_MODEL, D_INNER)),
                "k": nrm((D_MODEL, D_INNER)),
                "v": nrm((D_MODEL, D_INNER)),
                "o": nrm((D_INNER, D_MODEL))}

    def ffn_params():
        return {"wi": nrm((D_MODEL, D_FF)), "wo": nrm((D_FF, D_MODEL))}

    ones = jnp.ones((D_MODEL,), jnp.float32)
    return {
        "shared": nrm((VOCAB, D_MODEL), 1.0),
        "enc": {"self_attn": attn_params(), "ffn": ffn_params(),
                "pos_bias": nrm((N_HEADS, S_ENC, S_ENC)),
                "ln1": ones, "ln2": ones, "ln_f": ones},
        "dec": {"self_attn": attn_params(), "cross_attn": attn_params(),
                "ffn": ffn_params(),
                "pos_bias": nrm((N_HEADS, S_DEC, S_DEC)),
                "ln1": ones, "ln2": ones, "ln3": ones, "ln_f": ones},
    }


def pack_params(params):
    """Concat Q/K/V (and cross K/V), pre-split the O projections per head,
    fold the causal mask into the decoder position bias, cast matmul weights to
    bf16, reshape RMSNorm weights to (1, D).  Done once, outside jit."""
    bf = lambda x: x.astype(jnp.bfloat16)
    row = lambda x: x.reshape(1, -1)
    enc, dec = params["enc"], params["dec"]

    def qkv(p):
        return bf(jnp.concatenate([p["q"], p["k"], p["v"]], axis=1))

    def o3(p):
        return bf(p["o"].reshape(N_HEADS, D_KV, D_MODEL))

    causal = jnp.where(jnp.arange(S_DEC)[None, :] > jnp.arange(S_DEC)[:, None],
                       jnp.float32(NEG), jnp.float32(0.0))
    dec_pos = dec["pos_bias"] + causal[None, :, :]          # causal folded in

    return {
        "shared_f32": params["shared"],
        "shared_bf16": bf(params["shared"]),
        "enc": {
            "wqkv": qkv(enc["self_attn"]),
            "wo3": o3(enc["self_attn"]),
            "wi": bf(enc["ffn"]["wi"]),
            "wff": bf(enc["ffn"]["wo"]),
            "pos_bias": enc["pos_bias"],
            "ln1": row(enc["ln1"]), "ln2": row(enc["ln2"]),
            "ln_f": row(enc["ln_f"]),
        },
        "dec": {
            "wqkv": qkv(dec["self_attn"]),
            "wos3": o3(dec["self_attn"]),
            "wqc": bf(dec["cross_attn"]["q"]),
            "wkvc": bf(jnp.concatenate([dec["cross_attn"]["k"],
                                        dec["cross_attn"]["v"]], axis=1)),
            "woc3": o3(dec["cross_attn"]),
            "wi": bf(dec["ffn"]["wi"]),
            "wff": bf(dec["ffn"]["wo"]),
            "pos_bias": dec_pos,
            "ln1": row(dec["ln1"]), "ln2": row(dec["ln2"]),
            "ln3": row(dec["ln3"]), "ln_f": row(dec["ln_f"]),
        },
    }


if __name__ == "__main__":
    key = jax.random.PRNGKey(0)
    kp, ki, kl, kr = jax.random.split(key, 4)
    packed = pack_params(init_params(kp))

    B = 4
    input_ids = jax.random.randint(ki, (B, S_ENC), 0, VOCAB, jnp.int32)
    attention_mask = jnp.ones((B, S_ENC), jnp.int32)
    labels = jax.random.randint(kl, (B, S_DEC), 0, VOCAB, jnp.int32)
    rewards = jax.random.normal(kr, (B, S_DEC), jnp.float32)

    fwd = jax.jit(functools.partial(t5_generator_forward,
                                    current_epoch=0, total_epochs=10))
    combined, ce, rl, logits = fwd(packed, input_ids, attention_mask,
                                   labels, rewards)
    jax.block_until_ready((combined, ce, rl, logits))

    assert logits.shape == (B, S_DEC, VOCAB)
    assert bool(jnp.isfinite(combined)) and bool(jnp.isfinite(ce)) and bool(jnp.isfinite(rl))
    # alpha = max(0.2, 1 - 0/10) = 1.0  =>  combined == ce loss
    assert abs(float(combined) - float(ce)) < 1e-5
    print("KERNEL_OK")
</pallas_src>

<mosaic_0001>
module attributes {stable_mosaic.version = 11 : i64} {
  func.func @_t5_fused_kernel(%arg0: i32, %arg1: memref<2x8x128xf32, #tpu.memory_space<vmem>>, %arg2: memref<2x8x128xf32, #tpu.memory_space<vmem>>, %arg3: memref<2x1x8xf32, #tpu.memory_space<vmem>>, %arg4: memref<16x1xi32, #tpu.memory_space<vmem>>, %arg5: memref<16x1xf32, #tpu.memory_space<vmem>>, %arg6: memref<4x8x8xf32, #tpu.memory_space<vmem>>, %arg7: memref<128x384xbf16, #tpu.memory_space<vmem>>, %arg8: memref<4x32x128xbf16, #tpu.memory_space<vmem>>, %arg9: memref<128x256xbf16, #tpu.memory_space<vmem>>, %arg10: memref<256x128xbf16, #tpu.memory_space<vmem>>, %arg11: memref<1x128xf32, #tpu.memory_space<vmem>>, %arg12: memref<1x128xf32, #tpu.memory_space<vmem>>, %arg13: memref<1x128xf32, #tpu.memory_space<vmem>>, %arg14: memref<4x8x8xf32, #tpu.memory_space<vmem>>, %arg15: memref<128x384xbf16, #tpu.memory_space<vmem>>, %arg16: memref<4x32x128xbf16, #tpu.memory_space<vmem>>, %arg17: memref<128x128xbf16, #tpu.memory_space<vmem>>, %arg18: memref<128x256xbf16, #tpu.memory_space<vmem>>, %arg19: memref<4x32x128xbf16, #tpu.memory_space<vmem>>, %arg20: memref<128x256xbf16, #tpu.memory_space<vmem>>, %arg21: memref<256x128xbf16, #tpu.memory_space<vmem>>, %arg22: memref<1x128xf32, #tpu.memory_space<vmem>>, %arg23: memref<1x128xf32, #tpu.memory_space<vmem>>, %arg24: memref<1x128xf32, #tpu.memory_space<vmem>>, %arg25: memref<1x128xf32, #tpu.memory_space<vmem>>, %arg26: memref<256x128xbf16, #tpu.memory_space<vmem>>, %arg27: memref<16x256xf32, #tpu.memory_space<vmem>>, %arg28: memref<1x8x128xf32, #tpu.memory_space<vmem>>) attributes {dimension_semantics = [#tpu.dimension_semantics<parallel>], iteration_bounds = array<i64: 2>, scalar_prefetch = 0 : i64, scratch_operands = 0 : i64, tpu.core_type = #tpu.core_type<tc>, window_params = [{transform_indices = @transform_0, window_bounds = array<i64: 2, 8, 128>}, {transform_indices = @transform_1, window_bounds = array<i64: 2, 8, 128>}, {transform_indices = @transform_2, window_bounds = array<i64: 2, 1, 8>}, {transform_indices = @transform_3, window_bounds = array<i64: 16, 1>}, {transform_indices = @transform_4, window_bounds = array<i64: 16, 1>}, {pipeline_mode = #tpu.pipeline_mode<synchronous>, transform_indices = @transform_5, window_bounds = array<i64: 4, 8, 8>}, {pipeline_mode = #tpu.pipeline_mode<synchronous>, transform_indices = @transform_6, window_bounds = array<i64: 128, 384>}, {pipeline_mode = #tpu.pipeline_mode<synchronous>, transform_indices = @transform_7, window_bounds = array<i64: 4, 32, 128>}, {pipeline_mode = #tpu.pipeline_mode<synchronous>, transform_indices = @transform_8, window_bounds = array<i64: 128, 256>}, {pipeline_mode = #tpu.pipeline_mode<synchronous>, transform_indices = @transform_9, window_bounds = array<i64: 256, 128>}, {pipeline_mode = #tpu.pipeline_mode<synchronous>, transform_indices = @transform_10, window_bounds = array<i64: 1, 128>}, {pipeline_mode = #tpu.pipeline_mode<synchronous>, transform_indices = @transform_11, window_bounds = array<i64: 1, 128>}, {pipeline_mode = #tpu.pipeline_mode<synchronous>, transform_indices = @transform_12, window_bounds = array<i64: 1, 128>}, {pipeline_mode = #tpu.pipeline_mode<synchronous>, transform_indices = @transform_13, window_bounds = array<i64: 4, 8, 8>}, {pipeline_mode = #tpu.pipeline_mode<synchronous>, transform_indices = @transform_14, window_bounds = array<i64: 128, 384>}, {pipeline_mode = #tpu.pipeline_mode<synchronous>, transform_indices = @transform_15, window_bounds = array<i64: 4, 32, 128>}, {pipeline_mode = #tpu.pipeline_mode<synchronous>, transform_indices = @transform_16, window_bounds = array<i64: 128, 128>}, {pipeline_mode = #tpu.pipeline_mode<synchronous>, transform_indices = @transform_17, window_bounds = array<i64: 128, 256>}, {pipeline_mode = #tpu.pipeline_mode<synchronous>, transform_indices = @transform_18, window_bounds = array<i64: 4, 32, 128>}, {pipeline_mode = #tpu.pipeline_mode<synchronous>, transform_indices = @transform_19, window_bounds = array<i64: 128, 256>}, {pipeline_mode = #tpu.pipeline_mode<synchronous>, transform_indices = @transform_20, window_bounds = array<i64: 256, 128>}, {pipeline_mode = #tpu.pipeline_mode<synchronous>, transform_indices = @transform_21, window_bounds = array<i64: 1, 128>}, {pipeline_mode = #tpu.pipeline_mode<synchronous>, transform_indices = @transform_22, window_bounds = array<i64: 1, 128>}, {pipeline_mode = #tpu.pipeline_mode<synchronous>, transform_indices = @transform_23, window_bounds = array<i64: 1, 128>}, {pipeline_mode = #tpu.pipeline_mode<synchronous>, transform_indices = @transform_24, window_bounds = array<i64: 1, 128>}, {pipeline_mode = #tpu.pipeline_mode<synchronous>, transform_indices = @transform_25, window_bounds = array<i64: 256, 128>}, {transform_indices = @transform_26, window_bounds = array<i64: 16, 256>}, {transform_indices = @transform_27, window_bounds = array<i64: 1, 8, 128>}]} {
    %c0 = arith.constant 0 : index
    %c0_0 = arith.constant 0 : index
    %c0_1 = arith.constant 0 : index
    %0 = vector.load %arg3[%c0, %c0_0, %c0_1] : memref<2x1x8xf32, #tpu.memory_space<vmem>>, vector<2x1x8xf32>
    %c0_2 = arith.constant 0 : index
    %c0_3 = arith.constant 0 : index
    %c0_4 = arith.constant 0 : index
    %1 = vector.load %arg1[%c0_2, %c0_3, %c0_4] : memref<2x8x128xf32, #tpu.memory_space<vmem>>, vector<2x8x128xf32>
    %2 = vector.shape_cast %1 : vector<2x8x128xf32> to vector<16x128xf32>
    %c0_5 = arith.constant 0 : index
    %c0_6 = arith.constant 0 : index
    %3 = vector.load %arg11[%c0_5, %c0_6] : memref<1x128xf32, #tpu.memory_space<vmem>>, vector<1x128xf32>
    %4 = arith.mulf %2, %2 : vector<16x128xf32>
    %cst = arith.constant dense<0.000000e+00> : vector<16xf32>
    %5 = vector.multi_reduction <add>, %4, %cst [1] : vector<16x128xf32> to vector<16xf32>
    %6 = vector.shape_cast %5 : vector<16xf32> to vector<16x1xf32>
    %cst_7 = arith.constant 1.280000e+02 : f32
    %7 = vector.broadcast %cst_7 : f32 to vector<16x1xf32>
    %8 = arith.divf %6, %7 : vector<16x1xf32>
    %cst_8 = arith.constant 9.99999997E-7 : f32
    %9 = vector.broadcast %cst_8 : f32 to vector<16x1xf32>
    %10 = arith.addf %8, %9 : vector<16x1xf32>
    %11 = math.rsqrt %10 : vector<16x1xf32>
    %12 = vector.broadcast %11 : vector<16x1xf32> to vector<16x128xf32>
    %13 = arith.mulf %2, %12 : vector<16x128xf32>
    %14 = vector.broadcast %3 : vector<1x128xf32> to vector<16x128xf32>
    %15 = arith.mulf %13, %14 : vector<16x128xf32>
    %16 = arith.truncf %15 : vector<16x128xf32> to vector<16x128xbf16>
    %c0_9 = arith.constant 0 : index
    %c0_10 = arith.constant 0 : index
    %17 = vector.load %arg7[%c0_9, %c0_10] : memref<128x384xbf16, #tpu.memory_space<vmem>>, vector<128x384xbf16>
    %cst_11 = arith.constant dense<0.000000e+00> : vector<16x384xf32>
    %18 = tpu.matmul %16, %17, %cst_11 {dimension_numbers = #tpu.dot_dimension_numbers<[1], [0], [0], [1], [0, 0, 1, 1], [], []>} : vector<16x128xbf16>, vector<128x384xbf16>, vector<16x384xf32> -> vector<16x384xf32>
    %19 = arith.truncf %18 : vector<16x384xf32> to vector<16x384xbf16>
    %20 = vector.extract_strided_slice %19 {offsets = [0, 0], sizes = [16, 128], strides = [1, 1]} : vector<16x384xbf16> to vector<16x128xbf16>
    %21 = vector.extract_strided_slice %19 {offsets = [0, 128], sizes = [16, 128], strides = [1, 1]} : vector<16x384xbf16> to vector<16x128xbf16>
    %22 = vector.extract_strided_slice %19 {offsets = [0, 256], sizes = [16, 128], strides = [1, 1]} : vector<16x384xbf16> to vector<16x128xbf16>
    %c0_12 = arith.constant 0 : index
    %c0_13 = arith.constant 0 : index
    %c0_14 = arith.constant 0 : index
    %23 = vector.load %arg6[%c0_12, %c0_13, %c0_14] : memref<4x8x8xf32, #tpu.memory_space<vmem>>, vector<4x8x8xf32>
    %c0_15 = arith.constant 0 : index
    %c0_16 = arith.constant 0 : index
    %c0_17 = arith.constant 0 : index
    %24 = vector.load %arg8[%c0_15, %c0_16, %c0_17] : memref<4x32x128xbf16, #tpu.memory_space<vmem>>, vector<4x32x128xbf16>
    %25 = vector.extract_strided_slice %20 {offsets = [0, 0], sizes = [8, 128], strides = [1, 1]} : vector<16x128xbf16> to vector<8x128xbf16>
    %26 = vector.extract_strided_slice %21 {offsets = [0, 0], sizes = [8, 128], strides = [1, 1]} : vector<16x128xbf16> to vector<8x128xbf16>
    %27 = vector.extract_strided_slice %22 {offsets = [0, 0], sizes = [8, 128], strides = [1, 1]} : vector<16x128xbf16> to vector<8x128xbf16>
    %28 = vector.extract_strided_slice %0 {offsets = [0, 0, 0], sizes = [1, 1, 8], strides = [1, 1, 1]} : vector<2x1x8xf32> to vector<1x1x8xf32>
    %29 = vector.shape_cast %28 : vector<1x1x8xf32> to vector<1x8xf32>
    %30 = vector.extract_strided_slice %25 {offsets = [0, 0], sizes = [8, 32], strides = [1, 1]} : vector<8x128xbf16> to vector<8x32xbf16>
    %31 = vector.extract_strided_slice %26 {offsets = [0, 0], sizes = [8, 32], strides = [1, 1]} : vector<8x128xbf16> to vector<8x32xbf16>
    %cst_18 = arith.constant dense<0.000000e+00> : vector<8x8xf32>
    %32 = tpu.matmul %30, %31, %cst_18 {dimension_numbers = #tpu.dot_dimension_numbers<[1], [1], [0], [0], [0, 0, 1, 0], [], []>} : vector<8x32xbf16>, vector<8x32xbf16>, vector<8x8xf32> -> vector<8x8xf32>
    %33 = vector.extract_strided_slice %23 {offsets = [0, 0, 0], sizes = [1, 8, 8], strides = [1, 1, 1]} : vector<4x8x8xf32> to vector<1x8x8xf32>
    %34 = vector.shape_cast %33 : vector<1x8x8xf32> to vector<8x8xf32>
    %35 = arith.addf %32, %34 : vector<8x8xf32>
    %36 = vector.broadcast %29 : vector<1x8xf32> to vector<8x8xf32>
    %37 = arith.addf %35, %36 : vector<8x8xf32>
    %cst_19 = arith.constant dense<0xFF800000> : vector<8xf32>
    %38 = vector.multi_reduction <maximumf>, %37, %cst_19 [1] : vector<8x8xf32> to vector<8xf32>
    %39 = vector.shape_cast %38 : vector<8xf32> to vector<8x1xf32>
    %40 = vector.broadcast %39 : vector<8x1xf32> to vector<8x8xf32>
    %41 = arith.subf %37, %40 : vector<8x8xf32>
    %42 = math.exp %41 : vector<8x8xf32>
    %cst_20 = arith.constant dense<0.000000e+00> : vector<8xf32>
    %43 = vector.multi_reduction <add>, %42, %cst_20 [1] : vector<8x8xf32> to vector<8xf32>
    %44 = vector.shape_cast %43 : vector<8xf32> to vector<8x1xf32>
    %45 = tpu.reciprocal %44 {approx = true} : vector<8x1xf32> -> vector<8x1xf32>
    %46 = vector.broadcast %45 : vector<8x1xf32> to vector<8x8xf32>
    %47 = arith.mulf %42, %46 : vector<8x8xf32>
    %48 = arith.truncf %47 : vector<8x8xf32> to vector<8x8xbf16>
    %49 = vector.extract_strided_slice %27 {offsets = [0, 0], sizes = [8, 32], strides = [1, 1]} : vector<8x128xbf16> to vector<8x32xbf16>
    %cst_21 = arith.constant dense<0.000000e+00> : vector<8x32xf32>
    %50 = tpu.matmul %48, %49, %cst_21 {dimension_numbers = #tpu.dot_dimension_numbers<[1], [0], [0], [1], [0, 0, 1, 1], [], []>} : vector<8x8xbf16>, vector<8x32xbf16>, vector<8x32xf32> -> vector<8x32xf32>
    %51 = arith.truncf %50 : vector<8x32xf32> to vector<8x32xbf16>
    %52 = vector.extract_strided_slice %24 {offsets = [0, 0, 0], sizes = [1, 32, 128], strides = [1, 1, 1]} : vector<4x32x128xbf16> to vector<1x32x128xbf16>
    %53 = vector.shape_cast %52 : vector<1x32x128xbf16> to vector<32x128xbf16>
    %cst_22 = arith.constant dense<0.000000e+00> : vector<8x128xf32>
    %54 = tpu.matmul %51, %53, %cst_22 {dimension_numbers = #tpu.dot_dimension_numbers<[1], [0], [0], [1], [0, 0, 1, 1], [], []>} : vector<8x32xbf16>, vector<32x128xbf16>, vector<8x128xf32> -> vector<8x128xf32>
    %55 = vector.extract_strided_slice %25 {offsets = [0, 32], sizes = [8, 32], strides = [1, 1]} : vector<8x128xbf16> to vector<8x32xbf16>
    %56 = vector.extract_strided_slice %26 {offsets = [0, 32], sizes = [8, 32], strides = [1, 1]} : vector<8x128xbf16> to vector<8x32xbf16>
    %cst_23 = arith.constant dense<0.000000e+00> : vector<8x8xf32>
    %57 = tpu.matmul %55, %56, %cst_23 {dimension_numbers = #tpu.dot_dimension_numbers<[1], [1], [0], [0], [0, 0, 1, 0], [], []>} : vector<8x32xbf16>, vector<8x32xbf16>, vector<8x8xf32> -> vector<8x8xf32>
    %58 = vector.extract_strided_slice %23 {offsets = [1, 0, 0], sizes = [1, 8, 8], strides = [1, 1, 1]} : vector<4x8x8xf32> to vector<1x8x8xf32>
    %59 = vector.shape_cast %58 : vector<1x8x8xf32> to vector<8x8xf32>
    %60 = arith.addf %57, %59 : vector<8x8xf32>
    %61 = vector.broadcast %29 : vector<1x8xf32> to vector<8x8xf32>
    %62 = arith.addf %60, %61 : vector<8x8xf32>
    %cst_24 = arith.constant dense<0xFF800000> : vector<8xf32>
    %63 = vector.multi_reduction <maximumf>, %62, %cst_24 [1] : vector<8x8xf32> to vector<8xf32>
    %64 = vector.shape_cast %63 : vector<8xf32> to vector<8x1xf32>
    %65 = vector.broadcast %64 : vector<8x1xf32> to vector<8x8xf32>
    %66 = arith.subf %62, %65 : vector<8x8xf32>
    %67 = math.exp %66 : vector<8x8xf32>
    %cst_25 = arith.constant dense<0.000000e+00> : vector<8xf32>
    %68 = vector.multi_reduction <add>, %67, %cst_25 [1] : vector<8x8xf32> to vector<8xf32>
    %69 = vector.shape_cast %68 : vector<8xf32> to vector<8x1xf32>
    %70 = tpu.reciprocal %69 {approx = true} : vector<8x1xf32> -> vector<8x1xf32>
    %71 = vector.broadcast %70 : vector<8x1xf32> to vector<8x8xf32>
    %72 = arith.mulf %67, %71 : vector<8x8xf32>
    %73 = arith.truncf %72 : vector<8x8xf32> to vector<8x8xbf16>
    %74 = vector.extract_strided_slice %27 {offsets = [0, 32], sizes = [8, 32], strides = [1, 1]} : vector<8x128xbf16> to vector<8x32xbf16>
    %cst_26 = arith.constant dense<0.000000e+00> : vector<8x32xf32>
    %75 = tpu.matmul %73, %74, %cst_26 {dimension_numbers = #tpu.dot_dimension_numbers<[1], [0], [0], [1], [0, 0, 1, 1], [], []>} : vector<8x8xbf16>, vector<8x32xbf16>, vector<8x32xf32> -> vector<8x32xf32>
    %76 = arith.truncf %75 : vector<8x32xf32> to vector<8x32xbf16>
    %77 = vector.extract_strided_slice %24 {offsets = [1, 0, 0], sizes = [1, 32, 128], strides = [1, 1, 1]} : vector<4x32x128xbf16> to vector<1x32x128xbf16>
    %78 = vector.shape_cast %77 : vector<1x32x128xbf16> to vector<32x128xbf16>
    %cst_27 = arith.constant dense<0.000000e+00> : vector<8x128xf32>
    %79 = tpu.matmul %76, %78, %cst_27 {dimension_numbers = #tpu.dot_dimension_numbers<[1], [0], [0], [1], [0, 0, 1, 1], [], []>} : vector<8x32xbf16>, vector<32x128xbf16>, vector<8x128xf32> -> vector<8x128xf32>
    %80 = arith.addf %54, %79 : vector<8x128xf32>
    %81 = vector.extract_strided_slice %25 {offsets = [0, 64], sizes = [8, 32], strides = [1, 1]} : vector<8x128xbf16> to vector<8x32xbf16>
    %82 = vector.extract_strided_slice %26 {offsets = [0, 64], sizes = [8, 32], strides = [1, 1]} : vector<8x128xbf16> to vector<8x32xbf16>
    %cst_28 = arith.constant dense<0.000000e+00> : vector<8x8xf32>
    %83 = tpu.matmul %81, %82, %cst_28 {dimension_numbers = #tpu.dot_dimension_numbers<[1], [1], [0], [0], [0, 0, 1, 0], [], []>} : vector<8x32xbf16>, vector<8x32xbf16>, vector<8x8xf32> -> vector<8x8xf32>
    %84 = vector.extract_strided_slice %23 {offsets = [2, 0, 0], sizes = [1, 8, 8], strides = [1, 1, 1]} : vector<4x8x8xf32> to vector<1x8x8xf32>
    %85 = vector.shape_cast %84 : vector<1x8x8xf32> to vector<8x8xf32>
    %86 = arith.addf %83, %85 : vector<8x8xf32>
    %87 = vector.broadcast %29 : vector<1x8xf32> to vector<8x8xf32>
    %88 = arith.addf %86, %87 : vector<8x8xf32>
    %cst_29 = arith.constant dense<0xFF800000> : vector<8xf32>
    %89 = vector.multi_reduction <maximumf>, %88, %cst_29 [1] : vector<8x8xf32> to vector<8xf32>
    %90 = vector.shape_cast %89 : vector<8xf32> to vector<8x1xf32>
    %91 = vector.broadcast %90 : vector<8x1xf32> to vector<8x8xf32>
    %92 = arith.subf %88, %91 : vector<8x8xf32>
    %93 = math.exp %92 : vector<8x8xf32>
    %cst_30 = arith.constant dense<0.000000e+00> : vector<8xf32>
    %94 = vector.multi_reduction <add>, %93, %cst_30 [1] : vector<8x8xf32> to vector<8xf32>
    %95 = vector.shape_cast %94 : vector<8xf32> to vector<8x1xf32>
    %96 = tpu.reciprocal %95 {approx = true} : vector<8x1xf32> -> vector<8x1xf32>
    %97 = vector.broadcast %96 : vector<8x1xf32> to vector<8x8xf32>
    %98 = arith.mulf %93, %97 : vector<8x8xf32>
    %99 = arith.truncf %98 : vector<8x8xf32> to vector<8x8xbf16>
    %100 = vector.extract_strided_slice %27 {offsets = [0, 64], sizes = [8, 32], strides = [1, 1]} : vector<8x128xbf16> to vector<8x32xbf16>
    %cst_31 = arith.constant dense<0.000000e+00> : vector<8x32xf32>
    %101 = tpu.matmul %99, %100, %cst_31 {dimension_numbers = #tpu.dot_dimension_numbers<[1], [0], [0], [1], [0, 0, 1, 1], [], []>} : vector<8x8xbf16>, vector<8x32xbf16>, vector<8x32xf32> -> vector<8x32xf32>
    %102 = arith.truncf %101 : vector<8x32xf32> to vector<8x32xbf16>
    %103 = vector.extract_strided_slice %24 {offsets = [2, 0, 0], sizes = [1, 32, 128], strides = [1, 1, 1]} : vector<4x32x128xbf16> to vector<1x32x128xbf16>
    %104 = vector.shape_cast %103 : vector<1x32x128xbf16> to vector<32x128xbf16>
    %cst_32 = arith.constant dense<0.000000e+00> : vector<8x128xf32>
    %105 = tpu.matmul %102, %104, %cst_32 {dimension_numbers = #tpu.dot_dimension_numbers<[1], [0], [0], [1], [0, 0, 1, 1], [], []>} : vector<8x32xbf16>, vector<32x128xbf16>, vector<8x128xf32> -> vector<8x128xf32>
    %106 = arith.addf %80, %105 : vector<8x128xf32>
    %107 = vector.extract_strided_slice %25 {offsets = [0, 96], sizes = [8, 32], strides = [1, 1]} : vector<8x128xbf16> to vector<8x32xbf16>
    %108 = vector.extract_strided_slice %26 {offsets = [0, 96], sizes = [8, 32], strides = [1, 1]} : vector<8x128xbf16> to vector<8x32xbf16>
    %cst_33 = arith.constant dense<0.000000e+00> : vector<8x8xf32>
    %109 = tpu.matmul %107, %108, %cst_33 {dimension_numbers = #tpu.dot_dimension_numbers<[1], [1], [0], [0], [0, 0, 1, 0], [], []>} : vector<8x32xbf16>, vector<8x32xbf16>, vector<8x8xf32> -> vector<8x8xf32>
    %110 = vector.extract_strided_slice %23 {offsets = [3, 0, 0], sizes = [1, 8, 8], strides = [1, 1, 1]} : vector<4x8x8xf32> to vector<1x8x8xf32>
    %111 = vector.shape_cast %110 : vector<1x8x8xf32> to vector<8x8xf32>
    %112 = arith.addf %109, %111 : vector<8x8xf32>
    %113 = vector.broadcast %29 : vector<1x8xf32> to vector<8x8xf32>
    %114 = arith.addf %112, %113 : vector<8x8xf32>
    %cst_34 = arith.constant dense<0xFF800000> : vector<8xf32>
    %115 = vector.multi_reduction <maximumf>, %114, %cst_34 [1] : vector<8x8xf32> to vector<8xf32>
    %116 = vector.shape_cast %115 : vector<8xf32> to vector<8x1xf32>
    %117 = vector.broadcast %116 : vector<8x1xf32> to vector<8x8xf32>
    %118 = arith.subf %114, %117 : vector<8x8xf32>
    %119 = math.exp %118 : vector<8x8xf32>
    %cst_35 = arith.constant dense<0.000000e+00> : vector<8xf32>
    %120 = vector.multi_reduction <add>, %119, %cst_35 [1] : vector<8x8xf32> to vector<8xf32>
    %121 = vector.shape_cast %120 : vector<8xf32> to vector<8x1xf32>
    %122 = tpu.reciprocal %121 {approx = true} : vector<8x1xf32> -> vector<8x1xf32>
    %123 = vector.broadcast %122 : vector<8x1xf32> to vector<8x8xf32>
    %124 = arith.mulf %119, %123 : vector<8x8xf32>
    %125 = arith.truncf %124 : vector<8x8xf32> to vector<8x8xbf16>
    %126 = vector.extract_strided_slice %27 {offsets = [0, 96], sizes = [8, 32], strides = [1, 1]} : vector<8x128xbf16> to vector<8x32xbf16>
    %cst_36 = arith.constant dense<0.000000e+00> : vector<8x32xf32>
    %127 = tpu.matmul %125, %126, %cst_36 {dimension_numbers = #tpu.dot_dimension_numbers<[1], [0], [0], [1], [0, 0, 1, 1], [], []>} : vector<8x8xbf16>, vector<8x32xbf16>, vector<8x32xf32> -> vector<8x32xf32>
    %128 = arith.truncf %127 : vector<8x32xf32> to vector<8x32xbf16>
    %129 = vector.extract_strided_slice %24 {offsets = [3, 0, 0], sizes = [1, 32, 128], strides = [1, 1, 1]} : vector<4x32x128xbf16> to vector<1x32x128xbf16>
    %130 = vector.shape_cast %129 : vector<1x32x128xbf16> to vector<32x128xbf16>
    %cst_37 = arith.constant dense<0.000000e+00> : vector<8x128xf32>
    %131 = tpu.matmul %128, %130, %cst_37 {dimension_numbers = #tpu.dot_dimension_numbers<[1], [0], [0], [1], [0, 0, 1, 1], [], []>} : vector<8x32xbf16>, vector<32x128xbf16>, vector<8x128xf32> -> vector<8x128xf32>
    %132 = arith.addf %106, %131 : vector<8x128xf32>
    %133 = vector.extract_strided_slice %20 {offsets = [8, 0], sizes = [8, 128], strides = [1, 1]} : vector<16x128xbf16> to vector<8x128xbf16>
    %134 = vector.extract_strided_slice %21 {offsets = [8, 0], sizes = [8, 128], strides = [1, 1]} : vector<16x128xbf16> to vector<8x128xbf16>
    %135 = vector.extract_strided_slice %22 {offsets = [8, 0], sizes = [8, 128], strides = [1, 1]} : vector<16x128xbf16> to vector<8x128xbf16>
    %136 = vector.extract_strided_slice %0 {offsets = [1, 0, 0], sizes = [1, 1, 8], strides = [1, 1, 1]} : vector<2x1x8xf32> to vector<1x1x8xf32>
    %137 = vector.shape_cast %136 : vector<1x1x8xf32> to vector<1x8xf32>
    %138 = vector.extract_strided_slice %133 {offsets = [0, 0], sizes = [8, 32], strides = [1, 1]} : vector<8x128xbf16> to vector<8x32xbf16>
    %139 = vector.extract_strided_slice %134 {offsets = [0, 0], sizes = [8, 32], strides = [1, 1]} : vector<8x128xbf16> to vector<8x32xbf16>
    %cst_38 = arith.constant dense<0.000000e+00> : vector<8x8xf32>
    %140 = tpu.matmul %138, %139, %cst_38 {dimension_numbers = #tpu.dot_dimension_numbers<[1], [1], [0], [0], [0, 0, 1, 0], [], []>} : vector<8x32xbf16>, vector<8x32xbf16>, vector<8x8xf32> -> vector<8x8xf32>
    %141 = vector.extract_strided_slice %23 {offsets = [0, 0, 0], sizes = [1, 8, 8], strides = [1, 1, 1]} : vector<4x8x8xf32> to vector<1x8x8xf32>
    %142 = vector.shape_cast %141 : vector<1x8x8xf32> to vector<8x8xf32>
    %143 = arith.addf %140, %142 : vector<8x8xf32>
    %144 = vector.broadcast %137 : vector<1x8xf32> to vector<8x8xf32>
    %145 = arith.addf %143, %144 : vector<8x8xf32>
    %cst_39 = arith.constant dense<0xFF800000> : vector<8xf32>
    %146 = vector.multi_reduction <maximumf>, %145, %cst_39 [1] : vector<8x8xf32> to vector<8xf32>
    %147 = vector.shape_cast %146 : vector<8xf32> to vector<8x1xf32>
    %148 = vector.broadcast %147 : vector<8x1xf32> to vector<8x8xf32>
    %149 = arith.subf %145, %148 : vector<8x8xf32>
    %150 = math.exp %149 : vector<8x8xf32>
    %cst_40 = arith.constant dense<0.000000e+00> : vector<8xf32>
    %151 = vector.multi_reduction <add>, %150, %cst_40 [1] : vector<8x8xf32> to vector<8xf32>
    %152 = vector.shape_cast %151 : vector<8xf32> to vector<8x1xf32>
    %153 = tpu.reciprocal %152 {approx = true} : vector<8x1xf32> -> vector<8x1xf32>
    %154 = vector.broadcast %153 : vector<8x1xf32> to vector<8x8xf32>
    %155 = arith.mulf %150, %154 : vector<8x8xf32>
    %156 = arith.truncf %155 : vector<8x8xf32> to vector<8x8xbf16>
    %157 = vector.extract_strided_slice %135 {offsets = [0, 0], sizes = [8, 32], strides = [1, 1]} : vector<8x128xbf16> to vector<8x32xbf16>
    %cst_41 = arith.constant dense<0.000000e+00> : vector<8x32xf32>
    %158 = tpu.matmul %156, %157, %cst_41 {dimension_numbers = #tpu.dot_dimension_numbers<[1], [0], [0], [1], [0, 0, 1, 1], [], []>} : vector<8x8xbf16>, vector<8x32xbf16>, vector<8x32xf32> -> vector<8x32xf32>
    %159 = arith.truncf %158 : vector<8x32xf32> to vector<8x32xbf16>
    %160 = vector.extract_strided_slice %24 {offsets = [0, 0, 0], sizes = [1, 32, 128], strides = [1, 1, 1]} : vector<4x32x128xbf16> to vector<1x32x128xbf16>
    %161 = vector.shape_cast %160 : vector<1x32x128xbf16> to vector<32x128xbf16>
    %cst_42 = arith.constant dense<0.000000e+00> : vector<8x128xf32>
    %162 = tpu.matmul %159, %161, %cst_42 {dimension_numbers = #tpu.dot_dimension_numbers<[1], [0], [0], [1], [0, 0, 1, 1], [], []>} : vector<8x32xbf16>, vector<32x128xbf16>, vector<8x128xf32> -> vector<8x128xf32>
    %163 = vector.extract_strided_slice %133 {offsets = [0, 32], sizes = [8, 32], strides = [1, 1]} : vector<8x128xbf16> to vector<8x32xbf16>
    %164 = vector.extract_strided_slice %134 {offsets = [0, 32], sizes = [8, 32], strides = [1, 1]} : vector<8x128xbf16> to vector<8x32xbf16>
    %cst_43 = arith.constant dense<0.000000e+00> : vector<8x8xf32>
    %165 = tpu.matmul %163, %164, %cst_43 {dimension_numbers = #tpu.dot_dimension_numbers<[1], [1], [0], [0], [0, 0, 1, 0], [], []>} : vector<8x32xbf16>, vector<8x32xbf16>, vector<8x8xf32> -> vector<8x8xf32>
    %166 = vector.extract_strided_slice %23 {offsets = [1, 0, 0], sizes = [1, 8, 8], strides = [1, 1, 1]} : vector<4x8x8xf32> to vector<1x8x8xf32>
    %167 = vector.shape_cast %166 : vector<1x8x8xf32> to vector<8x8xf32>
    %168 = arith.addf %165, %167 : vector<8x8xf32>
    %169 = vector.broadcast %137 : vector<1x8xf32> to vector<8x8xf32>
    %170 = arith.addf %168, %169 : vector<8x8xf32>
    %cst_44 = arith.constant dense<0xFF800000> : vector<8xf32>
    %171 = vector.multi_reduction <maximumf>, %170, %cst_44 [1] : vector<8x8xf32> to vector<8xf32>
    %172 = vector.shape_cast %171 : vector<8xf32> to vector<8x1xf32>
    %173 = vector.broadcast %172 : vector<8x1xf32> to vector<8x8xf32>
    %174 = arith.subf %170, %173 : vector<8x8xf32>
    %175 = math.exp %174 : vector<8x8xf32>
    %cst_45 = arith.constant dense<0.000000e+00> : vector<8xf32>
    %176 = vector.multi_reduction <add>, %175, %cst_45 [1] : vector<8x8xf32> to vector<8xf32>
    %177 = vector.shape_cast %176 : vector<8xf32> to vector<8x1xf32>
    %178 = tpu.reciprocal %177 {approx = true} : vector<8x1xf32> -> vector<8x1xf32>
    %179 = vector.broadcast %178 : vector<8x1xf32> to vector<8x8xf32>
    %180 = arith.mulf %175, %179 : vector<8x8xf32>
    %181 = arith.truncf %180 : vector<8x8xf32> to vector<8x8xbf16>
    %182 = vector.extract_strided_slice %135 {offsets = [0, 32], sizes = [8, 32], strides = [1, 1]} : vector<8x128xbf16> to vector<8x32xbf16>
    %cst_46 = arith.constant dense<0.000000e+00> : vector<8x32xf32>
    %183 = tpu.matmul %181, %182, %cst_46 {dimension_numbers = #tpu.dot_dimension_numbers<[1], [0], [0], [1], [0, 0, 1, 1], [], []>} : vector<8x8xbf16>, vector<8x32xbf16>, vector<8x32xf32> -> vector<8x32xf32>
    %184 = arith.truncf %183 : vector<8x32xf32> to vector<8x32xbf16>
    %185 = vector.extract_strided_slice %24 {offsets = [1, 0, 0], sizes = [1, 32, 128], strides = [1, 1, 1]} : vector<4x32x128xbf16> to vector<1x32x128xbf16>
    %186 = vector.shape_cast %185 : vector<1x32x128xbf16> to vector<32x128xbf16>
    %cst_47 = arith.constant dense<0.000000e+00> : vector<8x128xf32>
    %187 = tpu.matmul %184, %186, %cst_47 {dimension_numbers = #tpu.dot_dimension_numbers<[1], [0], [0], [1], [0, 0, 1, 1], [], []>} : vector<8x32xbf16>, vector<32x128xbf16>, vector<8x128xf32> -> vector<8x128xf32>
    %188 = arith.addf %162, %187 : vector<8x128xf32>
    %189 = vector.extract_strided_slice %133 {offsets = [0, 64], sizes = [8, 32], strides = [1, 1]} : vector<8x128xbf16> to vector<8x32xbf16>
    %190 = vector.extract_strided_slice %134 {offsets = [0, 64], sizes = [8, 32], strides = [1, 1]} : vector<8x128xbf16> to vector<8x32xbf16>
    %cst_48 = arith.constant dense<0.000000e+00> : vector<8x8xf32>
    %191 = tpu.matmul %189, %190, %cst_48 {dimension_numbers = #tpu.dot_dimension_numbers<[1], [1], [0], [0], [0, 0, 1, 0], [], []>} : vector<8x32xbf16>, vector<8x32xbf16>, vector<8x8xf32> -> vector<8x8xf32>
    %192 = vector.extract_strided_slice %23 {offsets = [2, 0, 0], sizes = [1, 8, 8], strides = [1, 1, 1]} : vector<4x8x8xf32> to vector<1x8x8xf32>
    %193 = vector.shape_cast %192 : vector<1x8x8xf32> to vector<8x8xf32>
    %194 = arith.addf %191, %193 : vector<8x8xf32>
    %195 = vector.broadcast %137 : vector<1x8xf32> to vector<8x8xf32>
    %196 = arith.addf %194, %195 : vector<8x8xf32>
    %cst_49 = arith.constant dense<0xFF800000> : vector<8xf32>
    %197 = vector.multi_reduction <maximumf>, %196, %cst_49 [1] : vector<8x8xf32> to vector<8xf32>
    %198 = vector.shape_cast %197 : vector<8xf32> to vector<8x1xf32>
    %199 = vector.broadcast %198 : vector<8x1xf32> to vector<8x8xf32>
    %200 = arith.subf %196, %199 : vector<8x8xf32>
    %201 = math.exp %200 : vector<8x8xf32>
    %cst_50 = arith.constant dense<0.000000e+00> : vector<8xf32>
    %202 = vector.multi_reduction <add>, %201, %cst_50 [1] : vector<8x8xf32> to vector<8xf32>
    %203 = vector.shape_cast %202 : vector<8xf32> to vector<8x1xf32>
    %204 = tpu.reciprocal %203 {approx = true} : vector<8x1xf32> -> vector<8x1xf32>
    %205 = vector.broadcast %204 : vector<8x1xf32> to vector<8x8xf32>
    %206 = arith.mulf %201, %205 : vector<8x8xf32>
    %207 = arith.truncf %206 : vector<8x8xf32> to vector<8x8xbf16>
    %208 = vector.extract_strided_slice %135 {offsets = [0, 64], sizes = [8, 32], strides = [1, 1]} : vector<8x128xbf16> to vector<8x32xbf16>
    %cst_51 = arith.constant dense<0.000000e+00> : vector<8x32xf32>
    %209 = tpu.matmul %207, %208, %cst_51 {dimension_numbers = #tpu.dot_dimension_numbers<[1], [0], [0], [1], [0, 0, 1, 1], [], []>} : vector<8x8xbf16>, vector<8x32xbf16>, vector<8x32xf32> -> vector<8x32xf32>
    %210 = arith.truncf %209 : vector<8x32xf32> to vector<8x32xbf16>
    %211 = vector.extract_strided_slice %24 {offsets = [2, 0, 0], sizes = [1, 32, 128], strides = [1, 1, 1]} : vector<4x32x128xbf16> to vector<1x32x128xbf16>
    %212 = vector.shape_cast %211 : vector<1x32x128xbf16> to vector<32x128xbf16>
    %cst_52 = arith.constant dense<0.000000e+00> : vector<8x128xf32>
    %213 = tpu.matmul %210, %212, %cst_52 {dimension_numbers = #tpu.dot_dimension_numbers<[1], [0], [0], [1], [0, 0, 1, 1], [], []>} : vector<8x32xbf16>, vector<32x128xbf16>, vector<8x128xf32> -> vector<8x128xf32>
    %214 = arith.addf %188, %213 : vector<8x128xf32>
    %215 = vector.extract_strided_slice %133 {offsets = [0, 96], sizes = [8, 32], strides = [1, 1]} : vector<8x128xbf16> to vector<8x32xbf16>
    %216 = vector.extract_strided_slice %134 {offsets = [0, 96], sizes = [8, 32], strides = [1, 1]} : vector<8x128xbf16> to vector<8x32xbf16>
    %cst_53 = arith.constant dense<0.000000e+00> : vector<8x8xf32>
    %217 = tpu.matmul %215, %216, %cst_53 {dimension_numbers = #tpu.dot_dimension_numbers<[1], [1], [0], [0], [0, 0, 1, 0], [], []>} : vector<8x32xbf16>, vector<8x32xbf16>, vector<8x8xf32> -> vector<8x8xf32>
    %218 = vector.extract_strided_slice %23 {offsets = [3, 0, 0], sizes = [1, 8, 8], strides = [1, 1, 1]} : vector<4x8x8xf32> to vector<1x8x8xf32>
    %219 = vector.shape_cast %218 : vector<1x8x8xf32> to vector<8x8xf32>
    %220 = arith.addf %217, %219 : vector<8x8xf32>
    %221 = vector.broadcast %137 : vector<1x8xf32> to vector<8x8xf32>
    %222 = arith.addf %220, %221 : vector<8x8xf32>
    %cst_54 = arith.constant dense<0xFF800000> : vector<8xf32>
    %223 = vector.multi_reduction <maximumf>, %222, %cst_54 [1] : vector<8x8xf32> to vector<8xf32>
    %224 = vector.shape_cast %223 : vector<8xf32> to vector<8x1xf32>
    %225 = vector.broadcast %224 : vector<8x1xf32> to vector<8x8xf32>
    %226 = arith.subf %222, %225 : vector<8x8xf32>
    %227 = math.exp %226 : vector<8x8xf32>
    %cst_55 = arith.constant dense<0.000000e+00> : vector<8xf32>
    %228 = vector.multi_reduction <add>, %227, %cst_55 [1] : vector<8x8xf32> to vector<8xf32>
    %229 = vector.shape_cast %228 : vector<8xf32> to vector<8x1xf32>
    %230 = tpu.reciprocal %229 {approx = true} : vector<8x1xf32> -> vector<8x1xf32>
    %231 = vector.broadcast %230 : vector<8x1xf32> to vector<8x8xf32>
    %232 = arith.mulf %227, %231 : vector<8x8xf32>
    %233 = arith.truncf %232 : vector<8x8xf32> to vector<8x8xbf16>
    %234 = vector.extract_strided_slice %135 {offsets = [0, 96], sizes = [8, 32], strides = [1, 1]} : vector<8x128xbf16> to vector<8x32xbf16>
    %cst_56 = arith.constant dense<0.000000e+00> : vector<8x32xf32>
    %235 = tpu.matmul %233, %234, %cst_56 {dimension_numbers = #tpu.dot_dimension_numbers<[1], [0], [0], [1], [0, 0, 1, 1], [], []>} : vector<8x8xbf16>, vector<8x32xbf16>, vector<8x32xf32> -> vector<8x32xf32>
    %236 = arith.truncf %235 : vector<8x32xf32> to vector<8x32xbf16>
    %237 = vector.extract_strided_slice %24 {offsets = [3, 0, 0], sizes = [1, 32, 128], strides = [1, 1, 1]} : vector<4x32x128xbf16> to vector<1x32x128xbf16>
    %238 = vector.shape_cast %237 : vector<1x32x128xbf16> to vector<32x128xbf16>
    %cst_57 = arith.constant dense<0.000000e+00> : vector<8x128xf32>
    %239 = tpu.matmul %236, %238, %cst_57 {dimension_numbers = #tpu.dot_dimension_numbers<[1], [0], [0], [1], [0, 0, 1, 1], [], []>} : vector<8x32xbf16>, vector<32x128xbf16>, vector<8x128xf32> -> vector<8x128xf32>
    %240 = arith.addf %214, %239 : vector<8x128xf32>
    %241 = tpu.concatenate %132, %240 in 0 : vector<8x128xf32>, vector<8x128xf32> -> vector<16x128xf32>
    %242 = arith.addf %2, %241 : vector<16x128xf32>
    %c0_58 = arith.constant 0 : index
    %c0_59 = arith.constant 0 : index
    %243 = vector.load %arg12[%c0_58, %c0_59] : memref<1x128xf32, #tpu.memory_space<vmem>>, vector<1x128xf32>
    %244 = arith.mulf %242, %242 : vector<16x128xf32>
    %cst_60 = arith.constant dense<0.000000e+00> : vector<16xf32>
    %245 = vector.multi_reduction <add>, %244, %cst_60 [1] : vector<16x128xf32> to vector<16xf32>
    %246 = vector.shape_cast %245 : vector<16xf32> to vector<16x1xf32>
    %cst_61 = arith.constant 1.280000e+02 : f32
    %247 = vector.broadcast %cst_61 : f32 to vector<16x1xf32>
    %248 = arith.divf %246, %247 : vector<16x1xf32>
    %cst_62 = arith.constant 9.99999997E-7 : f32
    %249 = vector.broadcast %cst_62 : f32 to vector<16x1xf32>
    %250 = arith.addf %248, %249 : vector<16x1xf32>
    %251 = math.rsqrt %250 : vector<16x1xf32>
    %252 = vector.broadcast %251 : vector<16x1xf32> to vector<16x128xf32>
    %253 = arith.mulf %242, %252 : vector<16x128xf32>
    %254 = vector.broadcast %243 : vector<1x128xf32> to vector<16x128xf32>
    %255 = arith.mulf %253, %254 : vector<16x128xf32>
    %256 = arith.truncf %255 : vector<16x128xf32> to vector<16x128xbf16>
    %c0_63 = arith.constant 0 : index
    %c0_64 = arith.constant 0 : index
    %257 = vector.load %arg9[%c0_63, %c0_64] : memref<128x256xbf16, #tpu.memory_space<vmem>>, vector<128x256xbf16>
    %cst_65 = arith.constant dense<0.000000e+00> : vector<16x256xf32>
    %258 = tpu.matmul %256, %257, %cst_65 {dimension_numbers = #tpu.dot_dimension_numbers<[1], [0], [0], [1], [0, 0, 1, 1], [], []>} : vector<16x128xbf16>, vector<128x256xbf16>, vector<16x256xf32> -> vector<16x256xf32>
    %cst_66 = arith.constant 0.000000e+00 : f32
    %259 = vector.broadcast %cst_66 : f32 to vector<16x256xf32>
    %260 = arith.maximumf %258, %259 : vector<16x256xf32>
    %261 = arith.truncf %260 : vector<16x256xf32> to vector<16x256xbf16>
    %c0_67 = arith.constant 0 : index
    %c0_68 = arith.constant 0 : index
    %262 = vector.load %arg10[%c0_67, %c0_68] : memref<256x128xbf16, #tpu.memory_space<vmem>>, vector<256x128xbf16>
    %cst_69 = arith.constant dense<0.000000e+00> : vector<16x128xf32>
    %263 = tpu.matmul %261, %262, %cst_69 {dimension_numbers = #tpu.dot_dimension_numbers<[1], [0], [0], [1], [0, 0, 1, 1], [], []>} : vector<16x256xbf16>, vector<256x128xbf16>, vector<16x128xf32> -> vector<16x128xf32>
    %264 = arith.addf %242, %263 : vector<16x128xf32>
    %c0_70 = arith.constant 0 : index
    %c0_71 = arith.constant 0 : index
    %265 = vector.load %arg13[%c0_70, %c0_71] : memref<1x128xf32, #tpu.memory_space<vmem>>, vector<1x128xf32>
    %266 = arith.mulf %264, %264 : vector<16x128xf32>
    %cst_72 = arith.constant dense<0.000000e+00> : vector<16xf32>
    %267 = vector.multi_reduction <add>, %266, %cst_72 [1] : vector<16x128xf32> to vector<16xf32>
    %268 = vector.shape_cast %267 : vector<16xf32> to vector<16x1xf32>
    %cst_73 = arith.constant 1.280000e+02 : f32
    %269 = vector.broadcast %cst_73 : f32 to vector<16x1xf32>
    %270 = arith.divf %268, %269 : vector<16x1xf32>
    %cst_74 = arith.constant 9.99999997E-7 : f32
    %271 = vector.broadcast %cst_74 : f32 to vector<16x1xf32>
    %272 = arith.addf %270, %271 : vector<16x1xf32>
    %273 = math.rsqrt %272 : vector<16x1xf32>
    %274 = vector.broadcast %273 : vector<16x1xf32> to vector<16x128xf32>
    %275 = arith.mulf %264, %274 : vector<16x128xf32>
    %276 = vector.broadcast %265 : vector<1x128xf32> to vector<16x128xf32>
    %277 = arith.mulf %275, %276 : vector<16x128xf32>
    %278 = arith.truncf %277 : vector<16x128xf32> to vector<16x128xbf16>
    %c0_75 = arith.constant 0 : index
    %c0_76 = arith.constant 0 : index
    %c0_77 = arith.constant 0 : index
    %279 = vector.load %arg2[%c0_75, %c0_76, %c0_77] : memref<2x8x128xf32, #tpu.memory_space<vmem>>, vector<2x8x128xf32>
    %280 = vector.shape_cast %279 : vector<2x8x128xf32> to vector<16x128xf32>
    %c0_78 = arith.constant 0 : index
    %c0_79 = arith.constant 0 : index
    %281 = vector.load %arg22[%c0_78, %c0_79] : memref<1x128xf32, #tpu.memory_space<vmem>>, vector<1x128xf32>
    %282 = arith.mulf %280, %280 : vector<16x128xf32>
    %cst_80 = arith.constant dense<0.000000e+00> : vector<16xf32>
    %283 = vector.multi_reduction <add>, %282, %cst_80 [1] : vector<16x128xf32> to vector<16xf32>
    %284 = vector.shape_cast %283 : vector<16xf32> to vector<16x1xf32>
    %cst_81 = arith.constant 1.280000e+02 : f32
    %285 = vector.broadcast %cst_81 : f32 to vector<16x1xf32>
    %286 = arith.divf %284, %285 : vector<16x1xf32>
    %cst_82 = arith.constant 9.99999997E-7 : f32
    %287 = vector.broadcast %cst_82 : f32 to vector<16x1xf32>
    %288 = arith.addf %286, %287 : vector<16x1xf32>
    %289 = math.rsqrt %288 : vector<16x1xf32>
    %290 = vector.broadcast %289 : vector<16x1xf32> to vector<16x128xf32>
    %291 = arith.mulf %280, %290 : vector<16x128xf32>
    %292 = vector.broadcast %281 : vector<1x128xf32> to vector<16x128xf32>
    %293 = arith.mulf %291, %292 : vector<16x128xf32>
    %294 = arith.truncf %293 : vector<16x128xf32> to vector<16x128xbf16>
    %c0_83 = arith.constant 0 : index
    %c0_84 = arith.constant 0 : index
    %295 = vector.load %arg15[%c0_83, %c0_84] : memref<128x384xbf16, #tpu.memory_space<vmem>>, vector<128x384xbf16>
    %cst_85 = arith.constant dense<0.000000e+00> : vector<16x384xf32>
    %296 = tpu.matmul %294, %295, %cst_85 {dimension_numbers = #tpu.dot_dimension_numbers<[1], [0], [0], [1], [0, 0, 1, 1], [], []>} : vector<16x128xbf16>, vector<128x384xbf16>, vector<16x384xf32> -> vector<16x384xf32>
    %297 = arith.truncf %296 : vector<16x384xf32> to vector<16x384xbf16>
    %298 = vector.extract_strided_slice %297 {offsets = [0, 0], sizes = [16, 128], strides = [1, 1]} : vector<16x384xbf16> to vector<16x128xbf16>
    %299 = vector.extract_strided_slice %297 {offsets = [0, 128], sizes = [16, 128], strides = [1, 1]} : vector<16x384xbf16> to vector<16x128xbf16>
    %300 = vector.extract_strided_slice %297 {offsets = [0, 256], sizes = [16, 128], strides = [1, 1]} : vector<16x384xbf16> to vector<16x128xbf16>
    %c0_86 = arith.constant 0 : index
    %c0_87 = arith.constant 0 : index
    %c0_88 = arith.constant 0 : index
    %301 = vector.load %arg14[%c0_86, %c0_87, %c0_88] : memref<4x8x8xf32, #tpu.memory_space<vmem>>, vector<4x8x8xf32>
    %c0_89 = arith.constant 0 : index
    %c0_90 = arith.constant 0 : index
    %c0_91 = arith.constant 0 : index
    %302 = vector.load %arg16[%c0_89, %c0_90, %c0_91] : memref<4x32x128xbf16, #tpu.memory_space<vmem>>, vector<4x32x128xbf16>
    %303 = vector.extract_strided_slice %298 {offsets = [0, 0], sizes = [8, 128], strides = [1, 1]} : vector<16x128xbf16> to vector<8x128xbf16>
    %304 = vector.extract_strided_slice %299 {offsets = [0, 0], sizes = [8, 128], strides = [1, 1]} : vector<16x128xbf16> to vector<8x128xbf16>
    %305 = vector.extract_strided_slice %300 {offsets = [0, 0], sizes = [8, 128], strides = [1, 1]} : vector<16x128xbf16> to vector<8x128xbf16>
    %306 = vector.extract_strided_slice %303 {offsets = [0, 0], sizes = [8, 32], strides = [1, 1]} : vector<8x128xbf16> to vector<8x32xbf16>
    %307 = vector.extract_strided_slice %304 {offsets = [0, 0], sizes = [8, 32], strides = [1, 1]} : vector<8x128xbf16> to vector<8x32xbf16>
    %cst_92 = arith.constant dense<0.000000e+00> : vector<8x8xf32>
    %308 = tpu.matmul %306, %307, %cst_92 {dimension_numbers = #tpu.dot_dimension_numbers<[1], [1], [0], [0], [0, 0, 1, 0], [], []>} : vector<8x32xbf16>, vector<8x32xbf16>, vector<8x8xf32> -> vector<8x8xf32>
    %309 = vector.extract_strided_slice %301 {offsets = [0, 0, 0], sizes = [1, 8, 8], strides = [1, 1, 1]} : vector<4x8x8xf32> to vector<1x8x8xf32>
    %310 = vector.shape_cast %309 : vector<1x8x8xf32> to vector<8x8xf32>
    %311 = arith.addf %308, %310 : vector<8x8xf32>
    %cst_93 = arith.constant dense<0xFF800000> : vector<8xf32>
    %312 = vector.multi_reduction <maximumf>, %311, %cst_93 [1] : vector<8x8xf32> to vector<8xf32>
    %313 = vector.shape_cast %312 : vector<8xf32> to vector<8x1xf32>
    %314 = vector.broadcast %313 : vector<8x1xf32> to vector<8x8xf32>
    %315 = arith.subf %311, %314 : vector<8x8xf32>
    %316 = math.exp %315 : vector<8x8xf32>
    %cst_94 = arith.constant dense<0.000000e+00> : vector<8xf32>
    %317 = vector.multi_reduction <add>, %316, %cst_94 [1] : vector<8x8xf32> to vector<8xf32>
    %318 = vector.shape_cast %317 : vector<8xf32> to vector<8x1xf32>
    %319 = tpu.reciprocal %318 {approx = true} : vector<8x1xf32> -> vector<8x1xf32>
    %320 = vector.broadcast %319 : vector<8x1xf32> to vector<8x8xf32>
    %321 = arith.mulf %316, %320 : vector<8x8xf32>
    %322 = arith.truncf %321 : vector<8x8xf32> to vector<8x8xbf16>
    %323 = vector.extract_strided_slice %305 {offsets = [0, 0], sizes = [8, 32], strides = [1, 1]} : vector<8x128xbf16> to vector<8x32xbf16>
    %cst_95 = arith.constant dense<0.000000e+00> : vector<8x32xf32>
    %324 = tpu.matmul %322, %323, %cst_95 {dimension_numbers = #tpu.dot_dimension_numbers<[1], [0], [0], [1], [0, 0, 1, 1], [], []>} : vector<8x8xbf16>, vector<8x32xbf16>, vector<8x32xf32> -> vector<8x32xf32>
    %325 = arith.truncf %324 : vector<8x32xf32> to vector<8x32xbf16>
    %326 = vector.extract_strided_slice %302 {offsets = [0, 0, 0], sizes = [1, 32, 128], strides = [1, 1, 1]} : vector<4x32x128xbf16> to vector<1x32x128xbf16>
    %327 = vector.shape_cast %326 : vector<1x32x128xbf16> to vector<32x128xbf16>
    %cst_96 = arith.constant dense<0.000000e+00> : vector<8x128xf32>
    %328 = tpu.matmul %325, %327, %cst_96 {dimension_numbers = #tpu.dot_dimension_numbers<[1], [0], [0], [1], [0, 0, 1, 1], [], []>} : vector<8x32xbf16>, vector<32x128xbf16>, vector<8x128xf32> -> vector<8x128xf32>
    %329 = vector.extract_strided_slice %303 {offsets = [0, 32], sizes = [8, 32], strides = [1, 1]} : vector<8x128xbf16> to vector<8x32xbf16>
    %330 = vector.extract_strided_slice %304 {offsets = [0, 32], sizes = [8, 32], strides = [1, 1]} : vector<8x128xbf16> to vector<8x32xbf16>
    %cst_97 = arith.constant dense<0.000000e+00> : vector<8x8xf32>
    %331 = tpu.matmul %329, %330, %cst_97 {dimension_numbers = #tpu.dot_dimension_numbers<[1], [1], [0], [0], [0, 0, 1, 0], [], []>} : vector<8x32xbf16>, vector<8x32xbf16>, vector<8x8xf32> -> vector<8x8xf32>
    %332 = vector.extract_strided_slice %301 {offsets = [1, 0, 0], sizes = [1, 8, 8], strides = [1, 1, 1]} : vector<4x8x8xf32> to vector<1x8x8xf32>
    %333 = vector.shape_cast %332 : vector<1x8x8xf32> to vector<8x8xf32>
    %334 = arith.addf %331, %333 : vector<8x8xf32>
    %cst_98 = arith.constant dense<0xFF800000> : vector<8xf32>
    %335 = vector.multi_reduction <maximumf>, %334, %cst_98 [1] : vector<8x8xf32> to vector<8xf32>
    %336 = vector.shape_cast %335 : vector<8xf32> to vector<8x1xf32>
    %337 = vector.broadcast %336 : vector<8x1xf32> to vector<8x8xf32>
    %338 = arith.subf %334, %337 : vector<8x8xf32>
    %339 = math.exp %338 : vector<8x8xf32>
    %cst_99 = arith.constant dense<0.000000e+00> : vector<8xf32>
    %340 = vector.multi_reduction <add>, %339, %cst_99 [1] : vector<8x8xf32> to vector<8xf32>
    %341 = vector.shape_cast %340 : vector<8xf32> to vector<8x1xf32>
    %342 = tpu.reciprocal %341 {approx = true} : vector<8x1xf32> -> vector<8x1xf32>
    %343 = vector.broadcast %342 : vector<8x1xf32> to vector<8x8xf32>
    %344 = arith.mulf %339, %343 : vector<8x8xf32>
    %345 = arith.truncf %344 : vector<8x8xf32> to vector<8x8xbf16>
    %346 = vector.extract_strided_slice %305 {offsets = [0, 32], sizes = [8, 32], strides = [1, 1]} : vector<8x128xbf16> to vector<8x32xbf16>
    %cst_100 = arith.constant dense<0.000000e+00> : vector<8x32xf32>
    %347 = tpu.matmul %345, %346, %cst_100 {dimension_numbers = #tpu.dot_dimension_numbers<[1], [0], [0], [1], [0, 0, 1, 1], [], []>} : vector<8x8xbf16>, vector<8x32xbf16>, vector<8x32xf32> -> vector<8x32xf32>
    %348 = arith.truncf %347 : vector<8x32xf32> to vector<8x32xbf16>
    %349 = vector.extract_strided_slice %302 {offsets = [1, 0, 0], sizes = [1, 32, 128], strides = [1, 1, 1]} : vector<4x32x128xbf16> to vector<1x32x128xbf16>
    %350 = vector.shape_cast %349 : vector<1x32x128xbf16> to vector<32x128xbf16>
    %cst_101 = arith.constant dense<0.000000e+00> : vector<8x128xf32>
    %351 = tpu.matmul %348, %350, %cst_101 {dimension_numbers = #tpu.dot_dimension_numbers<[1], [0], [0], [1], [0, 0, 1, 1], [], []>} : vector<8x32xbf16>, vector<32x128xbf16>, vector<8x128xf32> -> vector<8x128xf32>
    %352 = arith.addf %328, %351 : vector<8x128xf32>
    %353 = vector.extract_strided_slice %303 {offsets = [0, 64], sizes = [8, 32], strides = [1, 1]} : vector<8x128xbf16> to vector<8x32xbf16>
    %354 = vector.extract_strided_slice %304 {offsets = [0, 64], sizes = [8, 32], strides = [1, 1]} : vector<8x128xbf16> to vector<8x32xbf16>
    %cst_102 = arith.constant dense<0.000000e+00> : vector<8x8xf32>
    %355 = tpu.matmul %353, %354, %cst_102 {dimension_numbers = #tpu.dot_dimension_numbers<[1], [1], [0], [0], [0, 0, 1, 0], [], []>} : vector<8x32xbf16>, vector<8x32xbf16>, vector<8x8xf32> -> vector<8x8xf32>
    %356 = vector.extract_strided_slice %301 {offsets = [2, 0, 0], sizes = [1, 8, 8], strides = [1, 1, 1]} : vector<4x8x8xf32> to vector<1x8x8xf32>
    %357 = vector.shape_cast %356 : vector<1x8x8xf32> to vector<8x8xf32>
    %358 = arith.addf %355, %357 : vector<8x8xf32>
    %cst_103 = arith.constant dense<0xFF800000> : vector<8xf32>
    %359 = vector.multi_reduction <maximumf>, %358, %cst_103 [1] : vector<8x8xf32> to vector<8xf32>
    %360 = vector.shape_cast %359 : vector<8xf32> to vector<8x1xf32>
    %361 = vector.broadcast %360 : vector<8x1xf32> to vector<8x8xf32>
    %362 = arith.subf %358, %361 : vector<8x8xf32>
    %363 = math.exp %362 : vector<8x8xf32>
    %cst_104 = arith.constant dense<0.000000e+00> : vector<8xf32>
    %364 = vector.multi_reduction <add>, %363, %cst_104 [1] : vector<8x8xf32> to vector<8xf32>
    %365 = vector.shape_cast %364 : vector<8xf32> to vector<8x1xf32>
    %366 = tpu.reciprocal %365 {approx = true} : vector<8x1xf32> -> vector<8x1xf32>
    %367 = vector.broadcast %366 : vector<8x1xf32> to vector<8x8xf32>
    %368 = arith.mulf %363, %367 : vector<8x8xf32>
    %369 = arith.truncf %368 : vector<8x8xf32> to vector<8x8xbf16>
    %370 = vector.extract_strided_slice %305 {offsets = [0, 64], sizes = [8, 32], strides = [1, 1]} : vector<8x128xbf16> to vector<8x32xbf16>
    %cst_105 = arith.constant dense<0.000000e+00> : vector<8x32xf32>
    %371 = tpu.matmul %369, %370, %cst_105 {dimension_numbers = #tpu.dot_dimension_numbers<[1], [0], [0], [1], [0, 0, 1, 1], [], []>} : vector<8x8xbf16>, vector<8x32xbf16>, vector<8x32xf32> -> vector<8x32xf32>
    %372 = arith.truncf %371 : vector<8x32xf32> to vector<8x32xbf16>
    %373 = vector.extract_strided_slice %302 {offsets = [2, 0, 0], sizes = [1, 32, 128], strides = [1, 1, 1]} : vector<4x32x128xbf16> to vector<1x32x128xbf16>
    %374 = vector.shape_cast %373 : vector<1x32x128xbf16> to vector<32x128xbf16>
    %cst_106 = arith.constant dense<0.000000e+00> : vector<8x128xf32>
    %375 = tpu.matmul %372, %374, %cst_106 {dimension_numbers = #tpu.dot_dimension_numbers<[1], [0], [0], [1], [0, 0, 1, 1], [], []>} : vector<8x32xbf16>, vector<32x128xbf16>, vector<8x128xf32> -> vector<8x128xf32>
    %376 = arith.addf %352, %375 : vector<8x128xf32>
    %377 = vector.extract_strided_slice %303 {offsets = [0, 96], sizes = [8, 32], strides = [1, 1]} : vector<8x128xbf16> to vector<8x32xbf16>
    %378 = vector.extract_strided_slice %304 {offsets = [0, 96], sizes = [8, 32], strides = [1, 1]} : vector<8x128xbf16> to vector<8x32xbf16>
    %cst_107 = arith.constant dense<0.000000e+00> : vector<8x8xf32>
    %379 = tpu.matmul %377, %378, %cst_107 {dimension_numbers = #tpu.dot_dimension_numbers<[1], [1], [0], [0], [0, 0, 1, 0], [], []>} : vector<8x32xbf16>, vector<8x32xbf16>, vector<8x8xf32> -> vector<8x8xf32>
    %380 = vector.extract_strided_slice %301 {offsets = [3, 0, 0], sizes = [1, 8, 8], strides = [1, 1, 1]} : vector<4x8x8xf32> to vector<1x8x8xf32>
    %381 = vector.shape_cast %380 : vector<1x8x8xf32> to vector<8x8xf32>
    %382 = arith.addf %379, %381 : vector<8x8xf32>
    %cst_108 = arith.constant dense<0xFF800000> : vector<8xf32>
    %383 = vector.multi_reduction <maximumf>, %382, %cst_108 [1] : vector<8x8xf32> to vector<8xf32>
    %384 = vector.shape_cast %383 : vector<8xf32> to vector<8x1xf32>
    %385 = vector.broadcast %384 : vector<8x1xf32> to vector<8x8xf32>
    %386 = arith.subf %382, %385 : vector<8x8xf32>
    %387 = math.exp %386 : vector<8x8xf32>
    %cst_109 = arith.constant dense<0.000000e+00> : vector<8xf32>
    %388 = vector.multi_reduction <add>, %387, %cst_109 [1] : vector<8x8xf32> to vector<8xf32>
    %389 = vector.shape_cast %388 : vector<8xf32> to vector<8x1xf32>
    %390 = tpu.reciprocal %389 {approx = true} : vector<8x1xf32> -> vector<8x1xf32>
    %391 = vector.broadcast %390 : vector<8x1xf32> to vector<8x8xf32>
    %392 = arith.mulf %387, %391 : vector<8x8xf32>
    %393 = arith.truncf %392 : vector<8x8xf32> to vector<8x8xbf16>
    %394 = vector.extract_strided_slice %305 {offsets = [0, 96], sizes = [8, 32], strides = [1, 1]} : vector<8x128xbf16> to vector<8x32xbf16>
    %cst_110 = arith.constant dense<0.000000e+00> : vector<8x32xf32>
    %395 = tpu.matmul %393, %394, %cst_110 {dimension_numbers = #tpu.dot_dimension_numbers<[1], [0], [0], [1], [0, 0, 1, 1], [], []>} : vector<8x8xbf16>, vector<8x32xbf16>, vector<8x32xf32> -> vector<8x32xf32>
    %396 = arith.truncf %395 : vector<8x32xf32> to vector<8x32xbf16>
    %397 = vector.extract_strided_slice %302 {offsets = [3, 0, 0], sizes = [1, 32, 128], strides = [1, 1, 1]} : vector<4x32x128xbf16> to vector<1x32x128xbf16>
    %398 = vector.shape_cast %397 : vector<1x32x128xbf16> to vector<32x128xbf16>
    %cst_111 = arith.constant dense<0.000000e+00> : vector<8x128xf32>
    %399 = tpu.matmul %396, %398, %cst_111 {dimension_numbers = #tpu.dot_dimension_numbers<[1], [0], [0], [1], [0, 0, 1, 1], [], []>} : vector<8x32xbf16>, vector<32x128xbf16>, vector<8x128xf32> -> vector<8x128xf32>
    %400 = arith.addf %376, %399 : vector<8x128xf32>
    %401 = vector.extract_strided_slice %298 {offsets = [8, 0], sizes = [8, 128], strides = [1, 1]} : vector<16x128xbf16> to vector<8x128xbf16>
    %402 = vector.extract_strided_slice %299 {offsets = [8, 0], sizes = [8, 128], strides = [1, 1]} : vector<16x128xbf16> to vector<8x128xbf16>
    %403 = vector.extract_strided_slice %300 {offsets = [8, 0], sizes = [8, 128], strides = [1, 1]} : vector<16x128xbf16> to vector<8x128xbf16>
    %404 = vector.extract_strided_slice %401 {offsets = [0, 0], sizes = [8, 32], strides = [1, 1]} : vector<8x128xbf16> to vector<8x32xbf16>
    %405 = vector.extract_strided_slice %402 {offsets = [0, 0], sizes = [8, 32], strides = [1, 1]} : vector<8x128xbf16> to vector<8x32xbf16>
    %cst_112 = arith.constant dense<0.000000e+00> : vector<8x8xf32>
    %406 = tpu.matmul %404, %405, %cst_112 {dimension_numbers = #tpu.dot_dimension_numbers<[1], [1], [0], [0], [0, 0, 1, 0], [], []>} : vector<8x32xbf16>, vector<8x32xbf16>, vector<8x8xf32> -> vector<8x8xf32>
    %407 = vector.extract_strided_slice %301 {offsets = [0, 0, 0], sizes = [1, 8, 8], strides = [1, 1, 1]} : vector<4x8x8xf32> to vector<1x8x8xf32>
    %408 = vector.shape_cast %407 : vector<1x8x8xf32> to vector<8x8xf32>
    %409 = arith.addf %406, %408 : vector<8x8xf32>
    %cst_113 = arith.constant dense<0xFF800000> : vector<8xf32>
    %410 = vector.multi_reduction <maximumf>, %409, %cst_113 [1] : vector<8x8xf32> to vector<8xf32>
    %411 = vector.shape_cast %410 : vector<8xf32> to vector<8x1xf32>
    %412 = vector.broadcast %411 : vector<8x1xf32> to vector<8x8xf32>
    %413 = arith.subf %409, %412 : vector<8x8xf32>
    %414 = math.exp %413 : vector<8x8xf32>
    %cst_114 = arith.constant dense<0.000000e+00> : vector<8xf32>
    %415 = vector.multi_reduction <add>, %414, %cst_114 [1] : vector<8x8xf32> to vector<8xf32>
    %416 = vector.shape_cast %415 : vector<8xf32> to vector<8x1xf32>
    %417 = tpu.reciprocal %416 {approx = true} : vector<8x1xf32> -> vector<8x1xf32>
    %418 = vector.broadcast %417 : vector<8x1xf32> to vector<8x8xf32>
    %419 = arith.mulf %414, %418 : vector<8x8xf32>
    %420 = arith.truncf %419 : vector<8x8xf32> to vector<8x8xbf16>
    %421 = vector.extract_strided_slice %403 {offsets = [0, 0], sizes = [8, 32], strides = [1, 1]} : vector<8x128xbf16> to vector<8x32xbf16>
    %cst_115 = arith.constant dense<0.000000e+00> : vector<8x32xf32>
    %422 = tpu.matmul %420, %421, %cst_115 {dimension_numbers = #tpu.dot_dimension_numbers<[1], [0], [0], [1], [0, 0, 1, 1], [], []>} : vector<8x8xbf16>, vector<8x32xbf16>, vector<8x32xf32> -> vector<8x32xf32>
    %423 = arith.truncf %422 : vector<8x32xf32> to vector<8x32xbf16>
    %424 = vector.extract_strided_slice %302 {offsets = [0, 0, 0], sizes = [1, 32, 128], strides = [1, 1, 1]} : vector<4x32x128xbf16> to vector<1x32x128xbf16>
    %425 = vector.shape_cast %424 : vector<1x32x128xbf16> to vector<32x128xbf16>
    %cst_116 = arith.constant dense<0.000000e+00> : vector<8x128xf32>
    %426 = tpu.matmul %423, %425, %cst_116 {dimension_numbers = #tpu.dot_dimension_numbers<[1], [0], [0], [1], [0, 0, 1, 1], [], []>} : vector<8x32xbf16>, vector<32x128xbf16>, vector<8x128xf32> -> vector<8x128xf32>
    %427 = vector.extract_strided_slice %401 {offsets = [0, 32], sizes = [8, 32], strides = [1, 1]} : vector<8x128xbf16> to vector<8x32xbf16>
    %428 = vector.extract_strided_slice %402 {offsets = [0, 32], sizes = [8, 32], strides = [1, 1]} : vector<8x128xbf16> to vector<8x32xbf16>
    %cst_117 = arith.constant dense<0.000000e+00> : vector<8x8xf32>
    %429 = tpu.matmul %427, %428, %cst_117 {dimension_numbers = #tpu.dot_dimension_numbers<[1], [1], [0], [0], [0, 0, 1, 0], [], []>} : vector<8x32xbf16>, vector<8x32xbf16>, vector<8x8xf32> -> vector<8x8xf32>
    %430 = vector.extract_strided_slice %301 {offsets = [1, 0, 0], sizes = [1, 8, 8], strides = [1, 1, 1]} : vector<4x8x8xf32> to vector<1x8x8xf32>
    %431 = vector.shape_cast %430 : vector<1x8x8xf32> to vector<8x8xf32>
    %432 = arith.addf %429, %431 : vector<8x8xf32>
    %cst_118 = arith.constant dense<0xFF800000> : vector<8xf32>
    %433 = vector.multi_reduction <maximumf>, %432, %cst_118 [1] : vector<8x8xf32> to vector<8xf32>
    %434 = vector.shape_cast %433 : vector<8xf32> to vector<8x1xf32>
    %435 = vector.broadcast %434 : vector<8x1xf32> to vector<8x8xf32>
    %436 = arith.subf %432, %435 : vector<8x8xf32>
    %437 = math.exp %436 : vector<8x8xf32>
    %cst_119 = arith.constant dense<0.000000e+00> : vector<8xf32>
    %438 = vector.multi_reduction <add>, %437, %cst_119 [1] : vector<8x8xf32> to vector<8xf32>
    %439 = vector.shape_cast %438 : vector<8xf32> to vector<8x1xf32>
    %440 = tpu.reciprocal %439 {approx = true} : vector<8x1xf32> -> vector<8x1xf32>
    %441 = vector.broadcast %440 : vector<8x1xf32> to vector<8x8xf32>
    %442 = arith.mulf %437, %441 : vector<8x8xf32>
    %443 = arith.truncf %442 : vector<8x8xf32> to vector<8x8xbf16>
    %444 = vector.extract_strided_slice %403 {offsets = [0, 32], sizes = [8, 32], strides = [1, 1]} : vector<8x128xbf16> to vector<8x32xbf16>
    %cst_120 = arith.constant dense<0.000000e+00> : vector<8x32xf32>
    %445 = tpu.matmul %443, %444, %cst_120 {dimension_numbers = #tpu.dot_dimension_numbers<[1], [0], [0], [1], [0, 0, 1, 1], [], []>} : vector<8x8xbf16>, vector<8x32xbf16>, vector<8x32xf32> -> vector<8x32xf32>
    %446 = arith.truncf %445 : vector<8x32xf32> to vector<8x32xbf16>
    %447 = vector.extract_strided_slice %302 {offsets = [1, 0, 0], sizes = [1, 32, 128], strides = [1, 1, 1]} : vector<4x32x128xbf16> to vector<1x32x128xbf16>
    %448 = vector.shape_cast %447 : vector<1x32x128xbf16> to vector<32x128xbf16>
    %cst_121 = arith.constant dense<0.000000e+00> : vector<8x128xf32>
    %449 = tpu.matmul %446, %448, %cst_121 {dimension_numbers = #tpu.dot_dimension_numbers<[1], [0], [0], [1], [0, 0, 1, 1], [], []>} : vector<8x32xbf16>, vector<32x128xbf16>, vector<8x128xf32> -> vector<8x128xf32>
    %450 = arith.addf %426, %449 : vector<8x128xf32>
    %451 = vector.extract_strided_slice %401 {offsets = [0, 64], sizes = [8, 32], strides = [1, 1]} : vector<8x128xbf16> to vector<8x32xbf16>
    %452 = vector.extract_strided_slice %402 {offsets = [0, 64], sizes = [8, 32], strides = [1, 1]} : vector<8x128xbf16> to vector<8x32xbf16>
    %cst_122 = arith.constant dense<0.000000e+00> : vector<8x8xf32>
    %453 = tpu.matmul %451, %452, %cst_122 {dimension_numbers = #tpu.dot_dimension_numbers<[1], [1], [0], [0], [0, 0, 1, 0], [], []>} : vector<8x32xbf16>, vector<8x32xbf16>, vector<8x8xf32> -> vector<8x8xf32>
    %454 = vector.extract_strided_slice %301 {offsets = [2, 0, 0], sizes = [1, 8, 8], strides = [1, 1, 1]} : vector<4x8x8xf32> to vector<1x8x8xf32>
    %455 = vector.shape_cast %454 : vector<1x8x8xf32> to vector<8x8xf32>
    %456 = arith.addf %453, %455 : vector<8x8xf32>
    %cst_123 = arith.constant dense<0xFF800000> : vector<8xf32>
    %457 = vector.multi_reduction <maximumf>, %456, %cst_123 [1] : vector<8x8xf32> to vector<8xf32>
    %458 = vector.shape_cast %457 : vector<8xf32> to vector<8x1xf32>
    %459 = vector.broadcast %458 : vector<8x1xf32> to vector<8x8xf32>
    %460 = arith.subf %456, %459 : vector<8x8xf32>
    %461 = math.exp %460 : vector<8x8xf32>
    %cst_124 = arith.constant dense<0.000000e+00> : vector<8xf32>
    %462 = vector.multi_reduction <add>, %461, %cst_124 [1] : vector<8x8xf32> to vector<8xf32>
    %463 = vector.shape_cast %462 : vector<8xf32> to vector<8x1xf32>
    %464 = tpu.reciprocal %463 {approx = true} : vector<8x1xf32> -> vector<8x1xf32>
    %465 = vector.broadcast %464 : vector<8x1xf32> to vector<8x8xf32>
    %466 = arith.mulf %461, %465 : vector<8x8xf32>
    %467 = arith.truncf %466 : vector<8x8xf32> to vector<8x8xbf16>
    %468 = vector.extract_strided_slice %403 {offsets = [0, 64], sizes = [8, 32], strides = [1, 1]} : vector<8x128xbf16> to vector<8x32xbf16>
    %cst_125 = arith.constant dense<0.000000e+00> : vector<8x32xf32>
    %469 = tpu.matmul %467, %468, %cst_125 {dimension_numbers = #tpu.dot_dimension_numbers<[1], [0], [0], [1], [0, 0, 1, 1], [], []>} : vector<8x8xbf16>, vector<8x32xbf16>, vector<8x32xf32> -> vector<8x32xf32>
    %470 = arith.truncf %469 : vector<8x32xf32> to vector<8x32xbf16>
    %471 = vector.extract_strided_slice %302 {offsets = [2, 0, 0], sizes = [1, 32, 128], strides = [1, 1, 1]} : vector<4x32x128xbf16> to vector<1x32x128xbf16>
    %472 = vector.shape_cast %471 : vector<1x32x128xbf16> to vector<32x128xbf16>
    %cst_126 = arith.constant dense<0.000000e+00> : vector<8x128xf32>
    %473 = tpu.matmul %470, %472, %cst_126 {dimension_numbers = #tpu.dot_dimension_numbers<[1], [0], [0], [1], [0, 0, 1, 1], [], []>} : vector<8x32xbf16>, vector<32x128xbf16>, vector<8x128xf32> -> vector<8x128xf32>
    %474 = arith.addf %450, %473 : vector<8x128xf32>
    %475 = vector.extract_strided_slice %401 {offsets = [0, 96], sizes = [8, 32], strides = [1, 1]} : vector<8x128xbf16> to vector<8x32xbf16>
    %476 = vector.extract_strided_slice %402 {offsets = [0, 96], sizes = [8, 32], strides = [1, 1]} : vector<8x128xbf16> to vector<8x32xbf16>
    %cst_127 = arith.constant dense<0.000000e+00> : vector<8x8xf32>
    %477 = tpu.matmul %475, %476, %cst_127 {dimension_numbers = #tpu.dot_dimension_numbers<[1], [1], [0], [0], [0, 0, 1, 0], [], []>} : vector<8x32xbf16>, vector<8x32xbf16>, vector<8x8xf32> -> vector<8x8xf32>
    %478 = vector.extract_strided_slice %301 {offsets = [3, 0, 0], sizes = [1, 8, 8], strides = [1, 1, 1]} : vector<4x8x8xf32> to vector<1x8x8xf32>
    %479 = vector.shape_cast %478 : vector<1x8x8xf32> to vector<8x8xf32>
    %480 = arith.addf %477, %479 : vector<8x8xf32>
    %cst_128 = arith.constant dense<0xFF800000> : vector<8xf32>
    %481 = vector.multi_reduction <maximumf>, %480, %cst_128 [1] : vector<8x8xf32> to vector<8xf32>
    %482 = vector.shape_cast %481 : vector<8xf32> to vector<8x1xf32>
    %483 = vector.broadcast %482 : vector<8x1xf32> to vector<8x8xf32>
    %484 = arith.subf %480, %483 : vector<8x8xf32>
    %485 = math.exp %484 : vector<8x8xf32>
    %cst_129 = arith.constant dense<0.000000e+00> : vector<8xf32>
    %486 = vector.multi_reduction <add>, %485, %cst_129 [1] : vector<8x8xf32> to vector<8xf32>
    %487 = vector.shape_cast %486 : vector<8xf32> to vector<8x1xf32>
    %488 = tpu.reciprocal %487 {approx = true} : vector<8x1xf32> -> vector<8x1xf32>
    %489 = vector.broadcast %488 : vector<8x1xf32> to vector<8x8xf32>
    %490 = arith.mulf %485, %489 : vector<8x8xf32>
    %491 = arith.truncf %490 : vector<8x8xf32> to vector<8x8xbf16>
    %492 = vector.extract_strided_slice %403 {offsets = [0, 96], sizes = [8, 32], strides = [1, 1]} : vector<8x128xbf16> to vector<8x32xbf16>
    %cst_130 = arith.constant dense<0.000000e+00> : vector<8x32xf32>
    %493 = tpu.matmul %491, %492, %cst_130 {dimension_numbers = #tpu.dot_dimension_numbers<[1], [0], [0], [1], [0, 0, 1, 1], [], []>} : vector<8x8xbf16>, vector<8x32xbf16>, vector<8x32xf32> -> vector<8x32xf32>
    %494 = arith.truncf %493 : vector<8x32xf32> to vector<8x32xbf16>
    %495 = vector.extract_strided_slice %302 {offsets = [3, 0, 0], sizes = [1, 32, 128], strides = [1, 1, 1]} : vector<4x32x128xbf16> to vector<1x32x128xbf16>
    %496 = vector.shape_cast %495 : vector<1x32x128xbf16> to vector<32x128xbf16>
    %cst_131 = arith.constant dense<0.000000e+00> : vector<8x128xf32>
    %497 = tpu.matmul %494, %496, %cst_131 {dimension_numbers = #tpu.dot_dimension_numbers<[1], [0], [0], [1], [0, 0, 1, 1], [], []>} : vector<8x32xbf16>, vector<32x128xbf16>, vector<8x128xf32> -> vector<8x128xf32>
    %498 = arith.addf %474, %497 : vector<8x128xf32>
    %499 = tpu.concatenate %400, %498 in 0 : vector<8x128xf32>, vector<8x128xf32> -> vector<16x128xf32>
    %500 = arith.addf %280, %499 : vector<16x128xf32>
    %c0_132 = arith.constant 0 : index
    %c0_133 = arith.constant 0 : index
    %501 = vector.load %arg23[%c0_132, %c0_133] : memref<1x128xf32, #tpu.memory_space<vmem>>, vector<1x128xf32>
    %502 = arith.mulf %500, %500 : vector<16x128xf32>
    %cst_134 = arith.constant dense<0.000000e+00> : vector<16xf32>
    %503 = vector.multi_reduction <add>, %502, %cst_134 [1] : vector<16x128xf32> to vector<16xf32>
    %504 = vector.shape_cast %503 : vector<16xf32> to vector<16x1xf32>
    %cst_135 = arith.constant 1.280000e+02 : f32
    %505 = vector.broadcast %cst_135 : f32 to vector<16x1xf32>
    %506 = arith.divf %504, %505 : vector<16x1xf32>
    %cst_136 = arith.constant 9.99999997E-7 : f32
    %507 = vector.broadcast %cst_136 : f32 to vector<16x1xf32>
    %508 = arith.addf %506, %507 : vector<16x1xf32>
    %509 = math.rsqrt %508 : vector<16x1xf32>
    %510 = vector.broadcast %509 : vector<16x1xf32> to vector<16x128xf32>
    %511 = arith.mulf %500, %510 : vector<16x128xf32>
    %512 = vector.broadcast %501 : vector<1x128xf32> to vector<16x128xf32>
    %513 = arith.mulf %511, %512 : vector<16x128xf32>
    %514 = arith.truncf %513 : vector<16x128xf32> to vector<16x128xbf16>
    %c0_137 = arith.constant 0 : index
    %c0_138 = arith.constant 0 : index
    %515 = vector.load %arg17[%c0_137, %c0_138] : memref<128x128xbf16, #tpu.memory_space<vmem>>, vector<128x128xbf16>
    %cst_139 = arith.constant dense<0.000000e+00> : vector<16x128xf32>
    %516 = tpu.matmul %514, %515, %cst_139 {dimension_numbers = #tpu.dot_dimension_numbers<[1], [0], [0], [1], [0, 0, 1, 1], [], []>} : vector<16x128xbf16>, vector<128x128xbf16>, vector<16x128xf32> -> vector<16x128xf32>
    %517 = arith.truncf %516 : vector<16x128xf32> to vector<16x128xbf16>
    %c0_140 = arith.constant 0 : index
    %c0_141 = arith.constant 0 : index
    %518 = vector.load %arg18[%c0_140, %c0_141] : memref<128x256xbf16, #tpu.memory_space<vmem>>, vector<128x256xbf16>
    %cst_142 = arith.constant dense<0.000000e+00> : vector<16x256xf32>
    %519 = tpu.matmul %278, %518, %cst_142 {dimension_numbers = #tpu.dot_dimension_numbers<[1], [0], [0], [1], [0, 0, 1, 1], [], []>} : vector<16x128xbf16>, vector<128x256xbf16>, vector<16x256xf32> -> vector<16x256xf32>
    %520 = arith.truncf %519 : vector<16x256xf32> to vector<16x256xbf16>
    %521 = vector.extract_strided_slice %520 {offsets = [0, 0], sizes = [16, 128], strides = [1, 1]} : vector<16x256xbf16> to vector<16x128xbf16>
    %522 = vector.extract_strided_slice %520 {offsets = [0, 128], sizes = [16, 128], strides = [1, 1]} : vector<16x256xbf16> to vector<16x128xbf16>
    %c0_143 = arith.constant 0 : index
    %c0_144 = arith.constant 0 : index
    %c0_145 = arith.constant 0 : index
    %523 = vector.load %arg19[%c0_143, %c0_144, %c0_145] : memref<4x32x128xbf16, #tpu.memory_space<vmem>>, vector<4x32x128xbf16>
    %524 = vector.extract_strided_slice %517 {offsets = [0, 0], sizes = [8, 128], strides = [1, 1]} : vector<16x128xbf16> to vector<8x128xbf16>
    %525 = vector.extract_strided_slice %521 {offsets = [0, 0], sizes = [8, 128], strides = [1, 1]} : vector<16x128xbf16> to vector<8x128xbf16>
    %526 = vector.extract_strided_slice %522 {offsets = [0, 0], sizes = [8, 128], strides = [1, 1]} : vector<16x128xbf16> to vector<8x128xbf16>
    %527 = vector.extract_strided_slice %0 {offsets = [0, 0, 0], sizes = [1, 1, 8], strides = [1, 1, 1]} : vector<2x1x8xf32> to vector<1x1x8xf32>
    %528 = vector.shape_cast %527 : vector<1x1x8xf32> to vector<1x8xf32>
    %529 = vector.extract_strided_slice %524 {offsets = [0, 0], sizes = [8, 32], strides = [1, 1]} : vector<8x128xbf16> to vector<8x32xbf16>
    %530 = vector.extract_strided_slice %525 {offsets = [0, 0], sizes = [8, 32], strides = [1, 1]} : vector<8x128xbf16> to vector<8x32xbf16>
    %cst_146 = arith.constant dense<0.000000e+00> : vector<8x8xf32>
    %531 = tpu.matmul %529, %530, %cst_146 {dimension_numbers = #tpu.dot_dimension_numbers<[1], [1], [0], [0], [0, 0, 1, 0], [], []>} : vector<8x32xbf16>, vector<8x32xbf16>, vector<8x8xf32> -> vector<8x8xf32>
    %532 = vector.broadcast %528 : vector<1x8xf32> to vector<8x8xf32>
    %533 = arith.addf %531, %532 : vector<8x8xf32>
    %cst_147 = arith.constant dense<0xFF800000> : vector<8xf32>
    %534 = vector.multi_reduction <maximumf>, %533, %cst_147 [1] : vector<8x8xf32> to vector<8xf32>
    %535 = vector.shape_cast %534 : vector<8xf32> to vector<8x1xf32>
    %536 = vector.broadcast %535 : vector<8x1xf32> to vector<8x8xf32>
    %537 = arith.subf %533, %536 : vector<8x8xf32>
    %538 = math.exp %537 : vector<8x8xf32>
    %cst_148 = arith.constant dense<0.000000e+00> : vector<8xf32>
    %539 = vector.multi_reduction <add>, %538, %cst_148 [1] : vector<8x8xf32> to vector<8xf32>
    %540 = vector.shape_cast %539 : vector<8xf32> to vector<8x1xf32>
    %541 = tpu.reciprocal %540 {approx = true} : vector<8x1xf32> -> vector<8x1xf32>
    %542 = vector.broadcast %541 : vector<8x1xf32> to vector<8x8xf32>
    %543 = arith.mulf %538, %542 : vector<8x8xf32>
    %544 = arith.truncf %543 : vector<8x8xf32> to vector<8x8xbf16>
    %545 = vector.extract_strided_slice %526 {offsets = [0, 0], sizes = [8, 32], strides = [1, 1]} : vector<8x128xbf16> to vector<8x32xbf16>
    %cst_149 = arith.constant dense<0.000000e+00> : vector<8x32xf32>
    %546 = tpu.matmul %544, %545, %cst_149 {dimension_numbers = #tpu.dot_dimension_numbers<[1], [0], [0], [1], [0, 0, 1, 1], [], []>} : vector<8x8xbf16>, vector<8x32xbf16>, vector<8x32xf32> -> vector<8x32xf32>
    %547 = arith.truncf %546 : vector<8x32xf32> to vector<8x32xbf16>
    %548 = vector.extract_strided_slice %523 {offsets = [0, 0, 0], sizes = [1, 32, 128], strides = [1, 1, 1]} : vector<4x32x128xbf16> to vector<1x32x128xbf16>
    %549 = vector.shape_cast %548 : vector<1x32x128xbf16> to vector<32x128xbf16>
    %cst_150 = arith.constant dense<0.000000e+00> : vector<8x128xf32>
    %550 = tpu.matmul %547, %549, %cst_150 {dimension_numbers = #tpu.dot_dimension_numbers<[1], [0], [0], [1], [0, 0, 1, 1], [], []>} : vector<8x32xbf16>, vector<32x128xbf16>, vector<8x128xf32> -> vector<8x128xf32>
    %551 = vector.extract_strided_slice %524 {offsets = [0, 32], sizes = [8, 32], strides = [1, 1]} : vector<8x128xbf16> to vector<8x32xbf16>
    %552 = vector.extract_strided_slice %525 {offsets = [0, 32], sizes = [8, 32], strides = [1, 1]} : vector<8x128xbf16> to vector<8x32xbf16>
    %cst_151 = arith.constant dense<0.000000e+00> : vector<8x8xf32>
    %553 = tpu.matmul %551, %552, %cst_151 {dimension_numbers = #tpu.dot_dimension_numbers<[1], [1], [0], [0], [0, 0, 1, 0], [], []>} : vector<8x32xbf16>, vector<8x32xbf16>, vector<8x8xf32> -> vector<8x8xf32>
    %554 = vector.broadcast %528 : vector<1x8xf32> to vector<8x8xf32>
    %555 = arith.addf %553, %554 : vector<8x8xf32>
    %cst_152 = arith.constant dense<0xFF800000> : vector<8xf32>
    %556 = vector.multi_reduction <maximumf>, %555, %cst_152 [1] : vector<8x8xf32> to vector<8xf32>
    %557 = vector.shape_cast %556 : vector<8xf32> to vector<8x1xf32>
    %558 = vector.broadcast %557 : vector<8x1xf32> to vector<8x8xf32>
    %559 = arith.subf %555, %558 : vector<8x8xf32>
    %560 = math.exp %559 : vector<8x8xf32>
    %cst_153 = arith.constant dense<0.000000e+00> : vector<8xf32>
    %561 = vector.multi_reduction <add>, %560, %cst_153 [1] : vector<8x8xf32> to vector<8xf32>
    %562 = vector.shape_cast %561 : vector<8xf32> to vector<8x1xf32>
    %563 = tpu.reciprocal %562 {approx = true} : vector<8x1xf32> -> vector<8x1xf32>
    %564 = vector.broadcast %563 : vector<8x1xf32> to vector<8x8xf32>
    %565 = arith.mulf %560, %564 : vector<8x8xf32>
    %566 = arith.truncf %565 : vector<8x8xf32> to vector<8x8xbf16>
    %567 = vector.extract_strided_slice %526 {offsets = [0, 32], sizes = [8, 32], strides = [1, 1]} : vector<8x128xbf16> to vector<8x32xbf16>
    %cst_154 = arith.constant dense<0.000000e+00> : vector<8x32xf32>
    %568 = tpu.matmul %566, %567, %cst_154 {dimension_numbers = #tpu.dot_dimension_numbers<[1], [0], [0], [1], [0, 0, 1, 1], [], []>} : vector<8x8xbf16>, vector<8x32xbf16>, vector<8x32xf32> -> vector<8x32xf32>
    %569 = arith.truncf %568 : vector<8x32xf32> to vector<8x32xbf16>
    %570 = vector.extract_strided_slice %523 {offsets = [1, 0, 0], sizes = [1, 32, 128], strides = [1, 1, 1]} : vector<4x32x128xbf16> to vector<1x32x128xbf16>
    %571 = vector.shape_cast %570 : vector<1x32x128xbf16> to vector<32x128xbf16>
    %cst_155 = arith.constant dense<0.000000e+00> : vector<8x128xf32>
    %572 = tpu.matmul %569, %571, %cst_155 {dimension_numbers = #tpu.dot_dimension_numbers<[1], [0], [0], [1], [0, 0, 1, 1], [], []>} : vector<8x32xbf16>, vector<32x128xbf16>, vector<8x128xf32> -> vector<8x128xf32>
    %573 = arith.addf %550, %572 : vector<8x128xf32>
    %574 = vector.extract_strided_slice %524 {offsets = [0, 64], sizes = [8, 32], strides = [1, 1]} : vector<8x128xbf16> to vector<8x32xbf16>
    %575 = vector.extract_strided_slice %525 {offsets = [0, 64], sizes = [8, 32], strides = [1, 1]} : vector<8x128xbf16> to vector<8x32xbf16>
    %cst_156 = arith.constant dense<0.000000e+00> : vector<8x8xf32>
    %576 = tpu.matmul %574, %575, %cst_156 {dimension_numbers = #tpu.dot_dimension_numbers<[1], [1], [0], [0], [0, 0, 1, 0], [], []>} : vector<8x32xbf16>, vector<8x32xbf16>, vector<8x8xf32> -> vector<8x8xf32>
    %577 = vector.broadcast %528 : vector<1x8xf32> to vector<8x8xf32>
    %578 = arith.addf %576, %577 : vector<8x8xf32>
    %cst_157 = arith.constant dense<0xFF800000> : vector<8xf32>
    %579 = vector.multi_reduction <maximumf>, %578, %cst_157 [1] : vector<8x8xf32> to vector<8xf32>
    %580 = vector.shape_cast %579 : vector<8xf32> to vector<8x1xf32>
    %581 = vector.broadcast %580 : vector<8x1xf32> to vector<8x8xf32>
    %582 = arith.subf %578, %581 : vector<8x8xf32>
    %583 = math.exp %582 : vector<8x8xf32>
    %cst_158 = arith.constant dense<0.000000e+00> : vector<8xf32>
    %584 = vector.multi_reduction <add>, %583, %cst_158 [1] : vector<8x8xf32> to vector<8xf32>
    %585 = vector.shape_cast %584 : vector<8xf32> to vector<8x1xf32>
    %586 = tpu.reciprocal %585 {approx = true} : vector<8x1xf32> -> vector<8x1xf32>
    %587 = vector.broadcast %586 : vector<8x1xf32> to vector<8x8xf32>
    %588 = arith.mulf %583, %587 : vector<8x8xf32>
    %589 = arith.truncf %588 : vector<8x8xf32> to vector<8x8xbf16>
    %590 = vector.extract_strided_slice %526 {offsets = [0, 64], sizes = [8, 32], strides = [1, 1]} : vector<8x128xbf16> to vector<8x32xbf16>
    %cst_159 = arith.constant dense<0.000000e+00> : vector<8x32xf32>
    %591 = tpu.matmul %589, %590, %cst_159 {dimension_numbers = #tpu.dot_dimension_numbers<[1], [0], [0], [1], [0, 0, 1, 1], [], []>} : vector<8x8xbf16>, vector<8x32xbf16>, vector<8x32xf32> -> vector<8x32xf32>
    %592 = arith.truncf %591 : vector<8x32xf32> to vector<8x32xbf16>
    %593 = vector.extract_strided_slice %523 {offsets = [2, 0, 0], sizes = [1, 32, 128], strides = [1, 1, 1]} : vector<4x32x128xbf16> to vector<1x32x128xbf16>
    %594 = vector.shape_cast %593 : vector<1x32x128xbf16> to vector<32x128xbf16>
    %cst_160 = arith.constant dense<0.000000e+00> : vector<8x128xf32>
    %595 = tpu.matmul %592, %594, %cst_160 {dimension_numbers = #tpu.dot_dimension_numbers<[1], [0], [0], [1], [0, 0, 1, 1], [], []>} : vector<8x32xbf16>, vector<32x128xbf16>, vector<8x128xf32> -> vector<8x128xf32>
    %596 = arith.addf %573, %595 : vector<8x128xf32>
    %597 = vector.extract_strided_slice %524 {offsets = [0, 96], sizes = [8, 32], strides = [1, 1]} : vector<8x128xbf16> to vector<8x32xbf16>
    %598 = vector.extract_strided_slice %525 {offsets = [0, 96], sizes = [8, 32], strides = [1, 1]} : vector<8x128xbf16> to vector<8x32xbf16>
    %cst_161 = arith.constant dense<0.000000e+00> : vector<8x8xf32>
    %599 = tpu.matmul %597, %598, %cst_161 {dimension_numbers = #tpu.dot_dimension_numbers<[1], [1], [0], [0], [0, 0, 1, 0], [], []>} : vector<8x32xbf16>, vector<8x32xbf16>, vector<8x8xf32> -> vector<8x8xf32>
    %600 = vector.broadcast %528 : vector<1x8xf32> to vector<8x8xf32>
    %601 = arith.addf %599, %600 : vector<8x8xf32>
    %cst_162 = arith.constant dense<0xFF800000> : vector<8xf32>
    %602 = vector.multi_reduction <maximumf>, %601, %cst_162 [1] : vector<8x8xf32> to vector<8xf32>
    %603 = vector.shape_cast %602 : vector<8xf32> to vector<8x1xf32>
    %604 = vector.broadcast %603 : vector<8x1xf32> to vector<8x8xf32>
    %605 = arith.subf %601, %604 : vector<8x8xf32>
    %606 = math.exp %605 : vector<8x8xf32>
    %cst_163 = arith.constant dense<0.000000e+00> : vector<8xf32>
    %607 = vector.multi_reduction <add>, %606, %cst_163 [1] : vector<8x8xf32> to vector<8xf32>
    %608 = vector.shape_cast %607 : vector<8xf32> to vector<8x1xf32>
    %609 = tpu.reciprocal %608 {approx = true} : vector<8x1xf32> -> vector<8x1xf32>
    %610 = vector.broadcast %609 : vector<8x1xf32> to vector<8x8xf32>
    %611 = arith.mulf %606, %610 : vector<8x8xf32>
    %612 = arith.truncf %611 : vector<8x8xf32> to vector<8x8xbf16>
    %613 = vector.extract_strided_slice %526 {offsets = [0, 96], sizes = [8, 32], strides = [1, 1]} : vector<8x128xbf16> to vector<8x32xbf16>
    %cst_164 = arith.constant dense<0.000000e+00> : vector<8x32xf32>
    %614 = tpu.matmul %612, %613, %cst_164 {dimension_numbers = #tpu.dot_dimension_numbers<[1], [0], [0], [1], [0, 0, 1, 1], [], []>} : vector<8x8xbf16>, vector<8x32xbf16>, vector<8x32xf32> -> vector<8x32xf32>
    %615 = arith.truncf %614 : vector<8x32xf32> to vector<8x32xbf16>
    %616 = vector.extract_strided_slice %523 {offsets = [3, 0, 0], sizes = [1, 32, 128], strides = [1, 1, 1]} : vector<4x32x128xbf16> to vector<1x32x128xbf16>
    %617 = vector.shape_cast %616 : vector<1x32x128xbf16> to vector<32x128xbf16>
    %cst_165 = arith.constant dense<0.000000e+00> : vector<8x128xf32>
    %618 = tpu.matmul %615, %617, %cst_165 {dimension_numbers = #tpu.dot_dimension_numbers<[1], [0], [0], [1], [0, 0, 1, 1], [], []>} : vector<8x32xbf16>, vector<32x128xbf16>, vector<8x128xf32> -> vector<8x128xf32>
    %619 = arith.addf %596, %618 : vector<8x128xf32>
    %620 = vector.extract_strided_slice %517 {offsets = [8, 0], sizes = [8, 128], strides = [1, 1]} : vector<16x128xbf16> to vector<8x128xbf16>
    %621 = vector.extract_strided_slice %521 {offsets = [8, 0], sizes = [8, 128], strides = [1, 1]} : vector<16x128xbf16> to vector<8x128xbf16>
    %622 = vector.extract_strided_slice %522 {offsets = [8, 0], sizes = [8, 128], strides = [1, 1]} : vector<16x128xbf16> to vector<8x128xbf16>
    %623 = vector.extract_strided_slice %0 {offsets = [1, 0, 0], sizes = [1, 1, 8], strides = [1, 1, 1]} : vector<2x1x8xf32> to vector<1x1x8xf32>
    %624 = vector.shape_cast %623 : vector<1x1x8xf32> to vector<1x8xf32>
    %625 = vector.extract_strided_slice %620 {offsets = [0, 0], sizes = [8, 32], strides = [1, 1]} : vector<8x128xbf16> to vector<8x32xbf16>
    %626 = vector.extract_strided_slice %621 {offsets = [0, 0], sizes = [8, 32], strides = [1, 1]} : vector<8x128xbf16> to vector<8x32xbf16>
    %cst_166 = arith.constant dense<0.000000e+00> : vector<8x8xf32>
    %627 = tpu.matmul %625, %626, %cst_166 {dimension_numbers = #tpu.dot_dimension_numbers<[1], [1], [0], [0], [0, 0, 1, 0], [], []>} : vector<8x32xbf16>, vector<8x32xbf16>, vector<8x8xf32> -> vector<8x8xf32>
    %628 = vector.broadcast %624 : vector<1x8xf32> to vector<8x8xf32>
    %629 = arith.addf %627, %628 : vector<8x8xf32>
    %cst_167 = arith.constant dense<0xFF800000> : vector<8xf32>
    %630 = vector.multi_reduction <maximumf>, %629, %cst_167 [1] : vector<8x8xf32> to vector<8xf32>
    %631 = vector.shape_cast %630 : vector<8xf32> to vector<8x1xf32>
    %632 = vector.broadcast %631 : vector<8x1xf32> to vector<8x8xf32>
    %633 = arith.subf %629, %632 : vector<8x8xf32>
    %634 = math.exp %633 : vector<8x8xf32>
    %cst_168 = arith.constant dense<0.000000e+00> : vector<8xf32>
    %635 = vector.multi_reduction <add>, %634, %cst_168 [1] : vector<8x8xf32> to vector<8xf32>
    %636 = vector.shape_cast %635 : vector<8xf32> to vector<8x1xf32>
    %637 = tpu.reciprocal %636 {approx = true} : vector<8x1xf32> -> vector<8x1xf32>
    %638 = vector.broadcast %637 : vector<8x1xf32> to vector<8x8xf32>
    %639 = arith.mulf %634, %638 : vector<8x8xf32>
    %640 = arith.truncf %639 : vector<8x8xf32> to vector<8x8xbf16>
    %641 = vector.extract_strided_slice %622 {offsets = [0, 0], sizes = [8, 32], strides = [1, 1]} : vector<8x128xbf16> to vector<8x32xbf16>
    %cst_169 = arith.constant dense<0.000000e+00> : vector<8x32xf32>
    %642 = tpu.matmul %640, %641, %cst_169 {dimension_numbers = #tpu.dot_dimension_numbers<[1], [0], [0], [1], [0, 0, 1, 1], [], []>} : vector<8x8xbf16>, vector<8x32xbf16>, vector<8x32xf32> -> vector<8x32xf32>
    %643 = arith.truncf %642 : vector<8x32xf32> to vector<8x32xbf16>
    %644 = vector.extract_strided_slice %523 {offsets = [0, 0, 0], sizes = [1, 32, 128], strides = [1, 1, 1]} : vector<4x32x128xbf16> to vector<1x32x128xbf16>
    %645 = vector.shape_cast %644 : vector<1x32x128xbf16> to vector<32x128xbf16>
    %cst_170 = arith.constant dense<0.000000e+00> : vector<8x128xf32>
    %646 = tpu.matmul %643, %645, %cst_170 {dimension_numbers = #tpu.dot_dimension_numbers<[1], [0], [0], [1], [0, 0, 1, 1], [], []>} : vector<8x32xbf16>, vector<32x128xbf16>, vector<8x128xf32> -> vector<8x128xf32>
    %647 = vector.extract_strided_slice %620 {offsets = [0, 32], sizes = [8, 32], strides = [1, 1]} : vector<8x128xbf16> to vector<8x32xbf16>
    %648 = vector.extract_strided_slice %621 {offsets = [0, 32], sizes = [8, 32], strides = [1, 1]} : vector<8x128xbf16> to vector<8x32xbf16>
    %cst_171 = arith.constant dense<0.000000e+00> : vector<8x8xf32>
    %649 = tpu.matmul %647, %648, %cst_171 {dimension_numbers = #tpu.dot_dimension_numbers<[1], [1], [0], [0], [0, 0, 1, 0], [], []>} : vector<8x32xbf16>, vector<8x32xbf16>, vector<8x8xf32> -> vector<8x8xf32>
    %650 = vector.broadcast %624 : vector<1x8xf32> to vector<8x8xf32>
    %651 = arith.addf %649, %650 : vector<8x8xf32>
    %cst_172 = arith.constant dense<0xFF800000> : vector<8xf32>
    %652 = vector.multi_reduction <maximumf>, %651, %cst_172 [1] : vector<8x8xf32> to vector<8xf32>
    %653 = vector.shape_cast %652 : vector<8xf32> to vector<8x1xf32>
    %654 = vector.broadcast %653 : vector<8x1xf32> to vector<8x8xf32>
    %655 = arith.subf %651, %654 : vector<8x8xf32>
    %656 = math.exp %655 : vector<8x8xf32>
    %cst_173 = arith.constant dense<0.000000e+00> : vector<8xf32>
    %657 = vector.multi_reduction <add>, %656, %cst_173 [1] : vector<8x8xf32> to vector<8xf32>
    %658 = vector.shape_cast %657 : vector<8xf32> to vector<8x1xf32>
    %659 = tpu.reciprocal %658 {approx = true} : vector<8x1xf32> -> vector<8x1xf32>
    %660 = vector.broadcast %659 : vector<8x1xf32> to vector<8x8xf32>
    %661 = arith.mulf %656, %660 : vector<8x8xf32>
    %662 = arith.truncf %661 : vector<8x8xf32> to vector<8x8xbf16>
    %663 = vector.extract_strided_slice %622 {offsets = [0, 32], sizes = [8, 32], strides = [1, 1]} : vector<8x128xbf16> to vector<8x32xbf16>
    %cst_174 = arith.constant dense<0.000000e+00> : vector<8x32xf32>
    %664 = tpu.matmul %662, %663, %cst_174 {dimension_numbers = #tpu.dot_dimension_numbers<[1], [0], [0], [1], [0, 0, 1, 1], [], []>} : vector<8x8xbf16>, vector<8x32xbf16>, vector<8x32xf32> -> vector<8x32xf32>
    %665 = arith.truncf %664 : vector<8x32xf32> to vector<8x32xbf16>
    %666 = vector.extract_strided_slice %523 {offsets = [1, 0, 0], sizes = [1, 32, 128], strides = [1, 1, 1]} : vector<4x32x128xbf16> to vector<1x32x128xbf16>
    %667 = vector.shape_cast %666 : vector<1x32x128xbf16> to vector<32x128xbf16>
    %cst_175 = arith.constant dense<0.000000e+00> : vector<8x128xf32>
    %668 = tpu.matmul %665, %667, %cst_175 {dimension_numbers = #tpu.dot_dimension_numbers<[1], [0], [0], [1], [0, 0, 1, 1], [], []>} : vector<8x32xbf16>, vector<32x128xbf16>, vector<8x128xf32> -> vector<8x128xf32>
    %669 = arith.addf %646, %668 : vector<8x128xf32>
    %670 = vector.extract_strided_slice %620 {offsets = [0, 64], sizes = [8, 32], strides = [1, 1]} : vector<8x128xbf16> to vector<8x32xbf16>
    %671 = vector.extract_strided_slice %621 {offsets = [0, 64], sizes = [8, 32], strides = [1, 1]} : vector<8x128xbf16> to vector<8x32xbf16>
    %cst_176 = arith.constant dense<0.000000e+00> : vector<8x8xf32>
    %672 = tpu.matmul %670, %671, %cst_176 {dimension_numbers = #tpu.dot_dimension_numbers<[1], [1], [0], [0], [0, 0, 1, 0], [], []>} : vector<8x32xbf16>, vector<8x32xbf16>, vector<8x8xf32> -> vector<8x8xf32>
    %673 = vector.broadcast %624 : vector<1x8xf32> to vector<8x8xf32>
    %674 = arith.addf %672, %673 : vector<8x8xf32>
    %cst_177 = arith.constant dense<0xFF800000> : vector<8xf32>
    %675 = vector.multi_reduction <maximumf>, %674, %cst_177 [1] : vector<8x8xf32> to vector<8xf32>
    %676 = vector.shape_cast %675 : vector<8xf32> to vector<8x1xf32>
    %677 = vector.broadcast %676 : vector<8x1xf32> to vector<8x8xf32>
    %678 = arith.subf %674, %677 : vector<8x8xf32>
    %679 = math.exp %678 : vector<8x8xf32>
    %cst_178 = arith.constant dense<0.000000e+00> : vector<8xf32>
    %680 = vector.multi_reduction <add>, %679, %cst_178 [1] : vector<8x8xf32> to vector<8xf32>
    %681 = vector.shape_cast %680 : vector<8xf32> to vector<8x1xf32>
    %682 = tpu.reciprocal %681 {approx = true} : vector<8x1xf32> -> vector<8x1xf32>
    %683 = vector.broadcast %682 : vector<8x1xf32> to vector<8x8xf32>
    %684 = arith.mulf %679, %683 : vector<8x8xf32>
    %685 = arith.truncf %684 : vector<8x8xf32> to vector<8x8xbf16>
    %686 = vector.extract_strided_slice %622 {offsets = [0, 64], sizes = [8, 32], strides = [1, 1]} : vector<8x128xbf16> to vector<8x32xbf16>
    %cst_179 = arith.constant dense<0.000000e+00> : vector<8x32xf32>
    %687 = tpu.matmul %685, %686, %cst_179 {dimension_numbers = #tpu.dot_dimension_numbers<[1], [0], [0], [1], [0, 0, 1, 1], [], []>} : vector<8x8xbf16>, vector<8x32xbf16>, vector<8x32xf32> -> vector<8x32xf32>
    %688 = arith.truncf %687 : vector<8x32xf32> to vector<8x32xbf16>
    %689 = vector.extract_strided_slice %523 {offsets = [2, 0, 0], sizes = [1, 32, 128], strides = [1, 1, 1]} : vector<4x32x128xbf16> to vector<1x32x128xbf16>
    %690 = vector.shape_cast %689 : vector<1x32x128xbf16> to vector<32x128xbf16>
    %cst_180 = arith.constant dense<0.000000e+00> : vector<8x128xf32>
    %691 = tpu.matmul %688, %690, %cst_180 {dimension_numbers = #tpu.dot_dimension_numbers<[1], [0], [0], [1], [0, 0, 1, 1], [], []>} : vector<8x32xbf16>, vector<32x128xbf16>, vector<8x128xf32> -> vector<8x128xf32>
    %692 = arith.addf %669, %691 : vector<8x128xf32>
    %693 = vector.extract_strided_slice %620 {offsets = [0, 96], sizes = [8, 32], strides = [1, 1]} : vector<8x128xbf16> to vector<8x32xbf16>
    %694 = vector.extract_strided_slice %621 {offsets = [0, 96], sizes = [8, 32], strides = [1, 1]} : vector<8x128xbf16> to vector<8x32xbf16>
    %cst_181 = arith.constant dense<0.000000e+00> : vector<8x8xf32>
    %695 = tpu.matmul %693, %694, %cst_181 {dimension_numbers = #tpu.dot_dimension_numbers<[1], [1], [0], [0], [0, 0, 1, 0], [], []>} : vector<8x32xbf16>, vector<8x32xbf16>, vector<8x8xf32> -> vector<8x8xf32>
    %696 = vector.broadcast %624 : vector<1x8xf32> to vector<8x8xf32>
    %697 = arith.addf %695, %696 : vector<8x8xf32>
    %cst_182 = arith.constant dense<0xFF800000> : vector<8xf32>
    %698 = vector.multi_reduction <maximumf>, %697, %cst_182 [1] : vector<8x8xf32> to vector<8xf32>
    %699 = vector.shape_cast %698 : vector<8xf32> to vector<8x1xf32>
    %700 = vector.broadcast %699 : vector<8x1xf32> to vector<8x8xf32>
    %701 = arith.subf %697, %700 : vector<8x8xf32>
    %702 = math.exp %701 : vector<8x8xf32>
    %cst_183 = arith.constant dense<0.000000e+00> : vector<8xf32>
    %703 = vector.multi_reduction <add>, %702, %cst_183 [1] : vector<8x8xf32> to vector<8xf32>
    %704 = vector.shape_cast %703 : vector<8xf32> to vector<8x1xf32>
    %705 = tpu.reciprocal %704 {approx = true} : vector<8x1xf32> -> vector<8x1xf32>
    %706 = vector.broadcast %705 : vector<8x1xf32> to vector<8x8xf32>
    %707 = arith.mulf %702, %706 : vector<8x8xf32>
    %708 = arith.truncf %707 : vector<8x8xf32> to vector<8x8xbf16>
    %709 = vector.extract_strided_slice %622 {offsets = [0, 96], sizes = [8, 32], strides = [1, 1]} : vector<8x128xbf16> to vector<8x32xbf16>
    %cst_184 = arith.constant dense<0.000000e+00> : vector<8x32xf32>
    %710 = tpu.matmul %708, %709, %cst_184 {dimension_numbers = #tpu.dot_dimension_numbers<[1], [0], [0], [1], [0, 0, 1, 1], [], []>} : vector<8x8xbf16>, vector<8x32xbf16>, vector<8x32xf32> -> vector<8x32xf32>
    %711 = arith.truncf %710 : vector<8x32xf32> to vector<8x32xbf16>
    %712 = vector.extract_strided_slice %523 {offsets = [3, 0, 0], sizes = [1, 32, 128], strides = [1, 1, 1]} : vector<4x32x128xbf16> to vector<1x32x128xbf16>
    %713 = vector.shape_cast %712 : vector<1x32x128xbf16> to vector<32x128xbf16>
    %cst_185 = arith.constant dense<0.000000e+00> : vector<8x128xf32>
    %714 = tpu.matmul %711, %713, %cst_185 {dimension_numbers = #tpu.dot_dimension_numbers<[1], [0], [0], [1], [0, 0, 1, 1], [], []>} : vector<8x32xbf16>, vector<32x128xbf16>, vector<8x128xf32> -> vector<8x128xf32>
    %715 = arith.addf %692, %714 : vector<8x128xf32>
    %716 = tpu.concatenate %619, %715 in 0 : vector<8x128xf32>, vector<8x128xf32> -> vector<16x128xf32>
    %717 = arith.addf %500, %716 : vector<16x128xf32>
    %c0_186 = arith.constant 0 : index
    %c0_187 = arith.constant 0 : index
    %718 = vector.load %arg24[%c0_186, %c0_187] : memref<1x128xf32, #tpu.memory_space<vmem>>, vector<1x128xf32>
    %719 = arith.mulf %717, %717 : vector<16x128xf32>
    %cst_188 = arith.constant dense<0.000000e+00> : vector<16xf32>
    %720 = vector.multi_reduction <add>, %719, %cst_188 [1] : vector<16x128xf32> to vector<16xf32>
    %721 = vector.shape_cast %720 : vector<16xf32> to vector<16x1xf32>
    %cst_189 = arith.constant 1.280000e+02 : f32
    %722 = vector.broadcast %cst_189 : f32 to vector<16x1xf32>
    %723 = arith.divf %721, %722 : vector<16x1xf32>
    %cst_190 = arith.constant 9.99999997E-7 : f32
    %724 = vector.broadcast %cst_190 : f32 to vector<16x1xf32>
    %725 = arith.addf %723, %724 : vector<16x1xf32>
    %726 = math.rsqrt %725 : vector<16x1xf32>
    %727 = vector.broadcast %726 : vector<16x1xf32> to vector<16x128xf32>
    %728 = arith.mulf %717, %727 : vector<16x128xf32>
    %729 = vector.broadcast %718 : vector<1x128xf32> to vector<16x128xf32>
    %730 = arith.mulf %728, %729 : vector<16x128xf32>
    %731 = arith.truncf %730 : vector<16x128xf32> to vector<16x128xbf16>
    %c0_191 = arith.constant 0 : index
    %c0_192 = arith.constant 0 : index
    %732 = vector.load %arg20[%c0_191, %c0_192] : memref<128x256xbf16, #tpu.memory_space<vmem>>, vector<128x256xbf16>
    %cst_193 = arith.constant dense<0.000000e+00> : vector<16x256xf32>
    %733 = tpu.matmul %731, %732, %cst_193 {dimension_numbers = #tpu.dot_dimension_numbers<[1], [0], [0], [1], [0, 0, 1, 1], [], []>} : vector<16x128xbf16>, vector<128x256xbf16>, vector<16x256xf32> -> vector<16x256xf32>
    %cst_194 = arith.constant 0.000000e+00 : f32
    %734 = vector.broadcast %cst_194 : f32 to vector<16x256xf32>
    %735 = arith.maximumf %733, %734 : vector<16x256xf32>
    %736 = arith.truncf %735 : vector<16x256xf32> to vector<16x256xbf16>
    %c0_195 = arith.constant 0 : index
    %c0_196 = arith.constant 0 : index
    %737 = vector.load %arg21[%c0_195, %c0_196] : memref<256x128xbf16, #tpu.memory_space<vmem>>, vector<256x128xbf16>
    %cst_197 = arith.constant dense<0.000000e+00> : vector<16x128xf32>
    %738 = tpu.matmul %736, %737, %cst_197 {dimension_numbers = #tpu.dot_dimension_numbers<[1], [0], [0], [1], [0, 0, 1, 1], [], []>} : vector<16x256xbf16>, vector<256x128xbf16>, vector<16x128xf32> -> vector<16x128xf32>
    %739 = arith.addf %717, %738 : vector<16x128xf32>
    %c0_198 = arith.constant 0 : index
    %c0_199 = arith.constant 0 : index
    %740 = vector.load %arg25[%c0_198, %c0_199] : memref<1x128xf32, #tpu.memory_space<vmem>>, vector<1x128xf32>
    %741 = arith.mulf %739, %739 : vector<16x128xf32>
    %cst_200 = arith.constant dense<0.000000e+00> : vector<16xf32>
    %742 = vector.multi_reduction <add>, %741, %cst_200 [1] : vector<16x128xf32> to vector<16xf32>
    %743 = vector.shape_cast %742 : vector<16xf32> to vector<16x1xf32>
    %cst_201 = arith.constant 1.280000e+02 : f32
    %744 = vector.broadcast %cst_201 : f32 to vector<16x1xf32>
    %745 = arith.divf %743, %744 : vector<16x1xf32>
    %cst_202 = arith.constant 9.99999997E-7 : f32
    %746 = vector.broadcast %cst_202 : f32 to vector<16x1xf32>
    %747 = arith.addf %745, %746 : vector<16x1xf32>
    %748 = math.rsqrt %747 : vector<16x1xf32>
    %749 = vector.broadcast %748 : vector<16x1xf32> to vector<16x128xf32>
    %750 = arith.mulf %739, %749 : vector<16x128xf32>
    %751 = vector.broadcast %740 : vector<1x128xf32> to vector<16x128xf32>
    %752 = arith.mulf %750, %751 : vector<16x128xf32>
    %cst_203 = arith.constant 0.0883883461 : f32
    %753 = vector.broadcast %cst_203 : f32 to vector<16x128xf32>
    %754 = arith.mulf %752, %753 : vector<16x128xf32>
    %755 = arith.truncf %754 : vector<16x128xf32> to vector<16x128xbf16>
    %c0_204 = arith.constant 0 : index
    %c0_205 = arith.constant 0 : index
    %756 = vector.load %arg26[%c0_204, %c0_205] : memref<256x128xbf16, #tpu.memory_space<vmem>>, vector<256x128xbf16>
    %cst_206 = arith.constant dense<0.000000e+00> : vector<16x256xf32>
    %757 = tpu.matmul %755, %756, %cst_206 {dimension_numbers = #tpu.dot_dimension_numbers<[1], [1], [0], [0], [0, 0, 1, 0], [], []>} : vector<16x128xbf16>, vector<256x128xbf16>, vector<16x256xf32> -> vector<16x256xf32>
    %c0_207 = arith.constant 0 : index
    %c0_208 = arith.constant 0 : index
    %758 = vector.load %arg27[%c0_207, %c0_208] : memref<16x256xf32, #tpu.memory_space<vmem>>, vector<16x256xf32>
    tpu.vector_store %arg27[%c0_207, %c0_208], %757 {strides = array<i32>} : memref<16x256xf32, #tpu.memory_space<vmem>>, vector<16x256xf32>,
    %cst_209 = arith.constant dense<0xFF800000> : vector<16xf32>
    %759 = vector.multi_reduction <maximumf>, %757, %cst_209 [1] : vector<16x256xf32> to vector<16xf32>
    %760 = vector.shape_cast %759 : vector<16xf32> to vector<16x1xf32>
    %761 = vector.broadcast %760 : vector<16x1xf32> to vector<16x256xf32>
    %762 = arith.subf %757, %761 : vector<16x256xf32>
    %763 = math.exp %762 : vector<16x256xf32>
    %cst_210 = arith.constant dense<0.000000e+00> : vector<16xf32>
    %764 = vector.multi_reduction <add>, %763, %cst_210 [1] : vector<16x256xf32> to vector<16xf32>
    %765 = vector.shape_cast %764 : vector<16xf32> to vector<16x1xf32>
    %766 = math.log %765 : vector<16x1xf32>
    %767 = tpu.iota {dimensions = array<i32: 1>} : vector<16x256xi32>
    %c0_211 = arith.constant 0 : index
    %c0_212 = arith.constant 0 : index
    %768 = vector.load %arg4[%c0_211, %c0_212] : memref<16x1xi32, #tpu.memory_space<vmem>>, vector<16x1xi32>
    %769 = vector.broadcast %768 : vector<16x1xi32> to vector<16x256xi32>
    %770 = arith.cmpi eq, %767, %769 : vector<16x256xi32>
    %771 = vector.broadcast %766 : vector<16x1xf32> to vector<16x256xf32>
    %772 = arith.subf %762, %771 : vector<16x256xf32>
    %cst_213 = arith.constant 0.000000e+00 : f32
    %773 = vector.broadcast %cst_213 : f32 to vector<16x256xf32>
    %774 = arith.select %770, %772, %773 : vector<16x256xi1>, vector<16x256xf32>
    %cst_214 = arith.constant dense<0.000000e+00> : vector<16xf32>
    %775 = vector.multi_reduction <add>, %774, %cst_214 [1] : vector<16x256xf32> to vector<16xf32>
    %776 = vector.shape_cast %775 : vector<16xf32> to vector<16x1xf32>
    %777 = vector.shape_cast %776 : vector<16x1xf32> to vector<1x16x1xf32>
    %cst_215 = arith.constant dense<0.000000e+00> : vector<1xf32>
    %778 = vector.multi_reduction <add>, %777, %cst_215 [1, 2] : vector<1x16x1xf32> to vector<1xf32>
    %779 = vector.shape_cast %778 : vector<1xf32> to vector<1x1x1xf32>
    %780 = vector.extract %779[0, 0, 0] : f32 from vector<1x1x1xf32>
    %781 = vector.broadcast %780 : f32 to vector<1x1xf32>
    %c0_216 = arith.constant 0 : index
    %c0_217 = arith.constant 0 : index
    %782 = vector.load %arg5[%c0_216, %c0_217] : memref<16x1xf32, #tpu.memory_space<vmem>>, vector<16x1xf32>
    %783 = arith.mulf %776, %782 : vector<16x1xf32>
    %784 = vector.shape_cast %783 : vector<16x1xf32> to vector<1x16x1xf32>
    %cst_218 = arith.constant dense<0.000000e+00> : vector<1xf32>
    %785 = vector.multi_reduction <add>, %784, %cst_218 [1, 2] : vector<1x16x1xf32> to vector<1xf32>
    %786 = vector.shape_cast %785 : vector<1xf32> to vector<1x1x1xf32>
    %787 = vector.extract %786[0, 0, 0] : f32 from vector<1x1x1xf32>
    %788 = vector.broadcast %787 : f32 to vector<1x1xf32>
    %789 = tpu.iota {dimensions = array<i32: 0>} : vector<8x128xi32>
    %790 = tpu.iota {dimensions = array<i32: 1>} : vector<8x128xi32>
    %c0_i32 = arith.constant 0 : i32
    %791 = vector.broadcast %c0_i32 : i32 to vector<8x128xi32>
    %792 = arith.cmpi eq, %789, %791 : vector<8x128xi32>
    %c0_i32_219 = arith.constant 0 : i32
    %793 = vector.broadcast %c0_i32_219 : i32 to vector<8x128xi32>
    %794 = arith.cmpi eq, %790, %793 : vector<8x128xi32>
    %795 = arith.andi %792, %794 : vector<8x128xi1>
    %cst_220 = arith.constant 0.000000e+00 : f32
    %796 = vector.shape_cast %781 : vector<1x1xf32> to vector<1x1xf32>
    %797 = vector.broadcast %796 : vector<1x1xf32> to vector<8x128xf32>
    %798 = vector.broadcast %cst_220 : f32 to vector<8x128xf32>
    %799 = arith.select %795, %797, %798 : vector<8x128xi1>, vector<8x128xf32>
    %c0_i32_221 = arith.constant 0 : i32
    %800 = vector.broadcast %c0_i32_221 : i32 to vector<8x128xi32>
    %801 = arith.cmpi eq, %789, %800 : vector<8x128xi32>
    %c1_i32 = arith.constant 1 : i32
    %802 = vector.broadcast %c1_i32 : i32 to vector<8x128xi32>
    %803 = arith.cmpi eq, %790, %802 : vector<8x128xi32>
    %804 = arith.andi %801, %803 : vector<8x128xi1>
    %cst_222 = arith.constant 0.000000e+00 : f32
    %805 = vector.shape_cast %788 : vector<1x1xf32> to vector<1x1xf32>
    %806 = vector.broadcast %805 : vector<1x1xf32> to vector<8x128xf32>
    %807 = vector.broadcast %cst_222 : f32 to vector<8x128xf32>
    %808 = arith.select %804, %806, %807 : vector<8x128xi1>, vector<8x128xf32>
    %809 = arith.addf %799, %808 : vector<8x128xf32>
    %c0_223 = arith.constant 0 : index
    %c0_224 = arith.constant 0 : index
    %c0_225 = arith.constant 0 : index
    %810 = vector.load %arg28[%c0_223, %c0_224, %c0_225] : memref<1x8x128xf32, #tpu.memory_space<vmem>>, vector<1x8x128xf32>
    %811 = vector.shape_cast %810 : vector<1x8x128xf32> to vector<8x128xf32>
    %812 = vector.shape_cast %809 : vector<8x128xf32> to vector<1x8x128xf32>
    tpu.vector_store %arg28[%c0_223, %c0_224, %c0_225], %812 {strides = array<i32>} : memref<1x8x128xf32, #tpu.memory_space<vmem>>, vector<1x8x128xf32>,
    return
  }
  func.func @transform_0(%arg0: i32) -> (i32, i32, i32) {
    %c0_i32 = arith.constant 0 : i32
    %c0_i32_0 = arith.constant 0 : i32
    %c0_i32_1 = arith.constant 0 : i32
    return %arg0, %c0_i32, %c0_i32_0 : i32, i32, i32
  }
  func.func @transform_1(%arg0: i32) -> (i32, i32, i32) {
    %c0_i32 = arith.constant 0 : i32
    %c0_i32_0 = arith.constant 0 : i32
    %c0_i32_1 = arith.constant 0 : i32
    return %arg0, %c0_i32, %c0_i32_0 : i32, i32, i32
  }
  func.func @transform_2(%arg0: i32) -> (i32, i32, i32) {
    %c0_i32 = arith.constant 0 : i32
    %c0_i32_0 = arith.constant 0 : i32
    %c0_i32_1 = arith.constant 0 : i32
    return %arg0, %c0_i32, %c0_i32_0 : i32, i32, i32
  }
  func.func @transform_3(%arg0: i32) -> (i32, i32) {
    %c0_i32 = arith.constant 0 : i32
    %c0_i32_0 = arith.constant 0 : i32
    return %arg0, %c0_i32 : i32, i32
  }
  func.func @transform_4(%arg0: i32) -> (i32, i32) {
    %c0_i32 = arith.constant 0 : i32
    %c0_i32_0 = arith.constant 0 : i32
    return %arg0, %c0_i32 : i32, i32
  }
  func.func @transform_5(%arg0: i32) -> (i32, i32, i32) {
    %c0_i32 = arith.constant 0 : i32
    %c0_i32_0 = arith.constant 0 : i32
    %c0_i32_1 = arith.constant 0 : i32
    %c0_i32_2 = arith.constant 0 : i32
    return %c0_i32, %c0_i32_0, %c0_i32_1 : i32, i32, i32
  }
  func.func @transform_6(%arg0: i32) -> (i32, i32) {
    %c0_i32 = arith.constant 0 : i32
    %c0_i32_0 = arith.constant 0 : i32
    %c0_i32_1 = arith.constant 0 : i32
    return %c0_i32, %c0_i32_0 : i32, i32
  }
  func.func @transform_7(%arg0: i32) -> (i32, i32, i32) {
    %c0_i32 = arith.constant 0 : i32
    %c0_i32_0 = arith.constant 0 : i32
    %c0_i32_1 = arith.constant 0 : i32
    %c0_i32_2 = arith.constant 0 : i32
    return %c0_i32, %c0_i32_0, %c0_i32_1 : i32, i32, i32
  }
  func.func @transform_8(%arg0: i32) -> (i32, i32) {
    %c0_i32 = arith.constant 0 : i32
    %c0_i32_0 = arith.constant 0 : i32
    %c0_i32_1 = arith.constant 0 : i32
    return %c0_i32, %c0_i32_0 : i32, i32
  }
  func.func @transform_9(%arg0: i32) -> (i32, i32) {
    %c0_i32 = arith.constant 0 : i32
    %c0_i32_0 = arith.constant 0 : i32
    %c0_i32_1 = arith.constant 0 : i32
    return %c0_i32, %c0_i32_0 : i32, i32
  }
  func.func @transform_10(%arg0: i32) -> (i32, i32) {
    %c0_i32 = arith.constant 0 : i32
    %c0_i32_0 = arith.constant 0 : i32
    %c0_i32_1 = arith.constant 0 : i32
    return %c0_i32, %c0_i32_0 : i32, i32
  }
  func.func @transform_11(%arg0: i32) -> (i32, i32) {
    %c0_i32 = arith.constant 0 : i32
    %c0_i32_0 = arith.constant 0 : i32
    %c0_i32_1 = arith.constant 0 : i32
    return %c0_i32, %c0_i32_0 : i32, i32
  }
  func.func @transform_12(%arg0: i32) -> (i32, i32) {
    %c0_i32 = arith.constant 0 : i32
    %c0_i32_0 = arith.constant 0 : i32
    %c0_i32_1 = arith.constant 0 : i32
    return %c0_i32, %c0_i32_0 : i32, i32
  }
  func.func @transform_13(%arg0: i32) -> (i32, i32, i32) {
    %c0_i32 = arith.constant 0 : i32
    %c0_i32_0 = arith.constant 0 : i32
    %c0_i32_1 = arith.constant 0 : i32
    %c0_i32_2 = arith.constant 0 : i32
    return %c0_i32, %c0_i32_0, %c0_i32_1 : i32, i32, i32
  }
  func.func @transform_14(%arg0: i32) -> (i32, i32) {
    %c0_i32 = arith.constant 0 : i32
    %c0_i32_0 = arith.constant 0 : i32
    %c0_i32_1 = arith.constant 0 : i32
    return %c0_i32, %c0_i32_0 : i32, i32
  }
  func.func @transform_15(%arg0: i32) -> (i32, i32, i32) {
    %c0_i32 = arith.constant 0 : i32
    %c0_i32_0 = arith.constant 0 : i32
    %c0_i32_1 = arith.constant 0 : i32
    %c0_i32_2 = arith.constant 0 : i32
    return %c0_i32, %c0_i32_0, %c0_i32_1 : i32, i32, i32
  }
  func.func @transform_16(%arg0: i32) -> (i32, i32) {
    %c0_i32 = arith.constant 0 : i32
    %c0_i32_0 = arith.constant 0 : i32
    %c0_i32_1 = arith.constant 0 : i32
    return %c0_i32, %c0_i32_0 : i32, i32
  }
  func.func @transform_17(%arg0: i32) -> (i32, i32) {
    %c0_i32 = arith.constant 0 : i32
    %c0_i32_0 = arith.constant 0 : i32
    %c0_i32_1 = arith.constant 0 : i32
    return %c0_i32, %c0_i32_0 : i32, i32
  }
  func.func @transform_18(%arg0: i32) -> (i32, i32, i32) {
    %c0_i32 = arith.constant 0 : i32
    %c0_i32_0 = arith.constant 0 : i32
    %c0_i32_1 = arith.constant 0 : i32
    %c0_i32_2 = arith.constant 0 : i32
    return %c0_i32, %c0_i32_0, %c0_i32_1 : i32, i32, i32
  }
  func.func @transform_19(%arg0: i32) -> (i32, i32) {
    %c0_i32 = arith.constant 0 : i32
    %c0_i32_0 = arith.constant 0 : i32
    %c0_i32_1 = arith.constant 0 : i32
    return %c0_i32, %c0_i32_0 : i32, i32
  }
  func.func @transform_20(%arg0: i32) -> (i32, i32) {
    %c0_i32 = arith.constant 0 : i32
    %c0_i32_0 = arith.constant 0 : i32
    %c0_i32_1 = arith.constant 0 : i32
    return %c0_i32, %c0_i32_0 : i32, i32
  }
  func.func @transform_21(%arg0: i32) -> (i32, i32) {
    %c0_i32 = arith.constant 0 : i32
    %c0_i32_0 = arith.constant 0 : i32
    %c0_i32_1 = arith.constant 0 : i32
    return %c0_i32, %c0_i32_0 : i32, i32
  }
  func.func @transform_22(%arg0: i32) -> (i32, i32) {
    %c0_i32 = arith.constant 0 : i32
    %c0_i32_0 = arith.constant 0 : i32
    %c0_i32_1 = arith.constant 0 : i32
    return %c0_i32, %c0_i32_0 : i32, i32
  }
  func.func @transform_23(%arg0: i32) -> (i32, i32) {
    %c0_i32 = arith.constant 0 : i32
    %c0_i32_0 = arith.constant 0 : i32
    %c0_i32_1 = arith.constant 0 : i32
    return %c0_i32, %c0_i32_0 : i32, i32
  }
  func.func @transform_24(%arg0: i32) -> (i32, i32) {
    %c0_i32 = arith.constant 0 : i32
    %c0_i32_0 = arith.constant 0 : i32
    %c0_i32_1 = arith.constant 0 : i32
    return %c0_i32, %c0_i32_0 : i32, i32
  }
  func.func @transform_25(%arg0: i32) -> (i32, i32) {
    %c0_i32 = arith.constant 0 : i32
    %c0_i32_0 = arith.constant 0 : i32
    %c0_i32_1 = arith.constant 0 : i32
    return %c0_i32, %c0_i32_0 : i32, i32
  }
  func.func @transform_26(%arg0: i32) -> (i32, i32) {
    %c0_i32 = arith.constant 0 : i32
    %c0_i32_0 = arith.constant 0 : i32
    return %arg0, %c0_i32 : i32, i32
  }
  func.func @transform_27(%arg0: i32) -> (i32, i32, i32) {
    %c0_i32 = arith.constant 0 : i32
    %c0_i32_0 = arith.constant 0 : i32
    %c0_i32_1 = arith.constant 0 : i32
    return %arg0, %c0_i32, %c0_i32_0 : i32, i32, i32
  }
}

</mosaic_0001>

<bundles_post_ra>
// kernel: t5_generator_forward.1
= control target key start
LH: loop header
LB: loop body
LE: loop exit
PB: predicated region body
PF: predicated region fallthrough
CT: control target
= control target key end

     0   :  { %s11078_s0 = inlined_call_operand.vmem [shape: f32[4,8,128], index: 0, kind: input, shape index: {}]   ;;  %s11079_s1 = inlined_call_operand.vmem [shape: f32[4,8,128], index: 1, kind: input, shape index: {}]   ;;  %s11080_s2 = inlined_call_operand.vmem [shape: f32[4,1,8], index: 2, kind: input, shape index: {}]   ;;  %s11081_s3 = inlined_call_operand.vmem [shape: s32[32,1], index: 3, kind: input, shape index: {}]   ;;  %s11082_s4 = inlined_call_operand.vmem [shape: f32[32,1], index: 4, kind: input, shape index: {}]   ;;  %s11083_s5 = inlined_call_operand.hbm [shape: f32[4,8,8], index: 5, kind: input, shape index: {}]   ;;  %s11084_s6 = inlined_call_operand.vmem [shape: bf16[128,384], index: 6, kind: input, shape index: {}]   ;;  %s11085_s7 = inlined_call_operand.hbm [shape: bf16[4,32,128], index: 7, kind: input, shape index: {}]   ;;  %s11086_s8 = inlined_call_operand.vmem [shape: bf16[128,256], index: 8, kind: input, shape index: {}]   ;;  %s11087_s9 = inlined_call_operand.vmem [shape: bf16[256,128], index: 9, kind: input, shape index: {}]   ;;  %s11088_s10 = inlined_call_operand.vmem [shape: f32[1,128], index: 10, kind: input, shape index: {}]   ;;  %s11089_s11 = inlined_call_operand.vmem [shape: f32[1,128], index: 11, kind: input, shape index: {}]   ;;  %s11090_s12 = inlined_call_operand.vmem [shape: f32[1,128], index: 12, kind: input, shape index: {}]   ;;  %s11091_s13 = inlined_call_operand.hbm [shape: f32[4,8,8], index: 13, kind: input, shape index: {}]   ;;  %s11092_s14 = inlined_call_operand.vmem [shape: bf16[128,384], index: 14, kind: input, shape index: {}]   ;;  %s11093_s15 = inlined_call_operand.hbm [shape: bf16[4,32,128], index: 15, kind: input, shape index: {}]   ;;  %s11094_s16 = inlined_call_operand.hbm [shape: bf16[128,128], index: 16, kind: input, shape index: {}]   ;;  %s11095_s17 = inlined_call_operand.hbm [shape: bf16[128,256], index: 17, kind: input, shape index: {}]   ;;  %s11096_s18 = inlined_call_operand.hbm [shape: bf16[4,32,128], index: 18, kind: input, shape index: {}]   ;;  %s11097_s19 = inlined_call_operand.hbm [shape: bf16[128,256], index: 19, kind: input, shape index: {}]   ;;  %s11098_s20 = inlined_call_operand.hbm [shape: bf16[256,128], index: 20, kind: input, shape index: {}]   ;;  %s11099_s21 = inlined_call_operand.hbm [shape: f32[1,128], index: 21, kind: input, shape index: {}]   ;;  %s11100_s22 = inlined_call_operand.hbm [shape: f32[1,128], index: 22, kind: input, shape index: {}]   ;;  %s11101_s23 = inlined_call_operand.hbm [shape: f32[1,128], index: 23, kind: input, shape index: {}]   ;;  %s11102_s24 = inlined_call_operand.hbm [shape: f32[1,128], index: 24, kind: input, shape index: {}]   ;;  %s11103_s25 = inlined_call_operand.vmem [shape: bf16[256,128], index: 25, kind: input, shape index: {}]   ;;  %s11104_s26 = inlined_call_operand.hbm [shape: f32[32,256], index: 26, kind: output, shape index: {0}]   ;;  %s11105_s27 = inlined_call_operand.vmem [shape: f32[2,8,128], index: 27, kind: output, shape index: {1}]  }
   0x1   :  { %11138 = sst [smem:[#allocation40_spill]] %s11078_s0 }
   0x2   :  { %11139 = sst [smem:[#allocation41_spill]] %s11079_s1 }
   0x3   :  { %11140 = sst [smem:[#allocation42_spill]] %s11080_s2 }
   0x4   :  { %11141 = sst [smem:[#allocation43_spill]] %s11081_s3 }
   0x5   :  { %11142 = sst [smem:[#allocation44_spill]] %s11082_s4 }
   0x6   :  { %11143 = sst [smem:[#allocation45_spill]] %s11083_s5 }
   0x7   :  { %11144 = sst [smem:[#allocation46_spill]] %s11084_s6 }
   0x8   :  { %11145 = sst [smem:[#allocation47_spill]] %s11085_s7 }
   0x9   :  { %11146 = sst [smem:[#allocation48_spill]] %s11086_s8 }
   0xa   :  { %11147 = sst [smem:[#allocation49_spill]] %s11087_s9 }
   0xb   :  { %11148 = sst [smem:[#allocation50_spill]] %s11088_s10 }
   0xc   :  { %11149 = sst [smem:[#allocation51_spill]] %s11089_s11 }
   0xd   :  { %11150 = sst [smem:[#allocation52_spill]] %s11093_s15 }
   0xe   :  { %11151 = sst [smem:[#allocation53_spill]] %s11103_s25 }
   0xf   :  { %11152 = sst [smem:[#allocation54_spill]] %s11104_s26 }
  0x10   :  { %11153 = sst [smem:[#allocation55_spill]] %s11105_s27 }
  0x11   :  { %33 = vsyncpa [#allocation3], 0 }
  0x12   :  { %34 = vsyncpa [#allocation6], 0 }
  0x13   :  { %35 = vsyncpa [#allocation9], 0 }
  0x14   :  { %36 = vsyncpa [#allocation12], 0 }
  0x15   :  { %37 = vsyncpa [#allocation15], 0 }
  0x16   :  { %38 = vsyncpa [#allocation18], 0 }
  0x17   :  { %39 = vsyncpa [#allocation21], 0 }
  0x18   :  { %40 = vsyncpa [#allocation4], 0 }
  0x19   :  { %42 = vsyncpa [#allocation4 + $0x1], 0  ;;  %s9391_s7 = smov 0   ;;  %s9393_s4 = smov 0  }
  0x1a   :  { %s9395_s8 = smov 0   ;;  %s9397_s30 = smov 0  }
  0x1b LB: > { %11154 = sst [smem:[#allocation32_spill]] %s9211_s7  ;;  %s9412_s9 = sadd.s32 4294967295, %s9223_s30   ;;  %s9223_s30 = sphi %s9397_s30, %s11211_s30   ;;  %s9219_s8 = sphi %s9395_s8, %s11214_s8   ;;  %s9215_s4 = sphi %s9393_s4, %s11213_s4   ;;  %s9211_s7 = sphi %s9391_s7, %s11212_s7  }
  0x1c   : > { %11155 = sst [smem:[#allocation33_spill]] %s9215_s4  ;;  %s7120_s5 = sadd.s32 4294967294, %s9223_s30  }
  0x1d   : > { %11156 = sst [smem:[#allocation34_spill]] %s9219_s8  ;;  %s9416_s28 = sadd.s32 1, %s9223_s30  }
  0x1e   : > { %11157 = sst [smem:[#allocation35_spill]] %s9223_s30  ;;  %s626_s0 = sadd.s32 1, %s9219_s8 }
  0x1f   : > { %11158 = sst [smem:[#allocation36_spill]] %s9416_s28  ;;  %s623_s10 = ssub.s32 %s9223_s30, %s9416_s28 }
  0x20   : > { %p636_p0 = scmp.ne.s32.totalorder %s9219_s8, %s9215_s4  ;;  %p624_p1 = scmp.eq.s32.totalorder %s623_s10, 0 }
  0x21   : > { %p637_p2 = scmp.eq.s32.totalorder %s9412_s9, 1  ;;  %p642_p3 = scmp.ne.s32.totalorder %s9215_s4, %s9211_s7 }
  0x22   : > { %p643_p4 = scmp.eq.s32.totalorder %s7120_s5, 1  ;;  %p7121_p7 = scmp.ge.s32.totalorder %s9223_s30, 1 }
  0x23   : > { %s9427_s29 = scalar_select %p624_p1, %s9219_s8, %s626_s0  }
  0x24   : > { %p9429_p5 = por %p637_p2, %p636_p0  ;;  %p9433_p6 = por %p643_p4, %p642_p3 }
  0x25   : > { %11159 = sst [smem:[#allocation37_spill]] %s9427_s29  ;;  %p676_p8 = scmp.lt.s32.totalorder %s9223_s30, 3 }
  0x26   : > { %s11160_s1 = scalar_select %p9429_p5, 1, 0 }
  0x27   : > { %s11162_s6 = scalar_select %p9433_p6, 1, 0 }
  0x28   : > { %11161 = sst [smem:[#allocation38_spill]] %s11160_s1  ;;  %p11117_p9 = scmp.eq.s32.totalorder %s9412_s9, 0 }
  0x29   : > { %11163 = sst [smem:[#allocation39_spill]] %s11162_s6  ;;  %p9440_p10 = pnand %p7121_p7, %p676_p8 }
  0x2a   : > { %s9225_s2 = smov [#allocation5]   ;;  %s9226_s0 = smov [#allocation8]  }
  0x2b   : > { %s11164_s11 = scalar_select %p9440_p10, 1, 0 }
  0x2c   : > { %s704_s3 = sshll.u32 %s9225_s2, 4  ;;  %p8281_p11 = pneg %p9440_p10  ;;  %s705_s3 = int_to_ptr.vmem [resolvable:$true] %s704_s3 }
  0x2d   : > { %s748_s10 = sshll.u32 %s9226_s0, 4  ;;  %s11166_s28 = sld [smem:[#allocation47_spill]]  ;;  %s9452_s10 = int_to_ptr.vmem [resolvable:$true] %s748_s10 }
  0x2e   : > { %p9448_p12 = pnand %p11117_p9, %p8281_p11 }
  0x30   : > { %p9462_p0 = pneg %p9448_p12 }
  0x33   : > { %s8769_s6 = scalar_lea.hbm %s11166_s28, 1024 }
  0x34   : > { %p8770_p13 = scmp.ne.s32.totalorder %s11166_s28, %s8769_s6  ;;  %p8776_p3 = scmp.lt.u32.totalorder %s8769_s6, %s11166_s28 }
  0x36   : > { %p8772_p1 = pnand %p9462_p0, %p8770_p13 }
  0x38   : > { %p8773_p2 = pneg %p8772_p1 }
  0x3a   : > { %p8778_p4 = pnand %p8776_p3, %p8773_p2 }
  0x3c   : > { %8781 = shalt.err (!%p8778_p4)
}
  0x3d   : > { %s8782_s8 = scalar_lea.vmem %s705_s3, 1024  ;;  %p8790_p9 = scmp.lt.s32.totalorder %s705_s3, %s705_s3 }
  0x3e   : > { %p8783_p7 = scmp.ne.s32.totalorder %s705_s3, %s8782_s8  ;;  %p8791_p6 = scmp.lt.s32.totalorder %s8782_s8, %s8782_s8 }
  0x40   : > { %p8785_p8 = pnand %p8783_p7, %p9462_p0  ;;  %p8792_p5 = por %p8791_p6, %p8790_p9 }
  0x42   : > { %p8786_p11 = pneg %p8785_p8 }
  0x44   : > { %p8793_p10 = pnand %p8792_p5, %p8786_p11 }
  0x46   : > { %8796 = shalt.err (!%p8793_p10)
}
  0x47   : > { %s11127_s7 = smov 64   ;;  %s11129_s30 = smov 4  }
  0x48   : > { %8287 = dma.hbm_to_vmem [thread:$0]  (!%p9448_p12), %s11166_s28, 1024, %s705_s3, [#allocation6], %s11127_s7, %s11127_s7, %s11129_s30  }
  0x49   : > { %s11168_s15 = sld [smem:[#allocation52_spill]] }
  0x4f   : > { %s8797_s26 = scalar_lea.hbm %s11168_s15, 1024 }
  0x50   : > { %p8798_p5 = scmp.ne.s32.totalorder %s11168_s15, %s8797_s26  ;;  %p8804_p10 = scmp.lt.u32.totalorder %s8797_s26, %s11168_s15 }
  0x52   : > { %p8800_p6 = pnand %p8798_p5, %p9462_p0 }
  0x54   : > { %p8801_p9 = pneg %p8800_p6 }
  0x56   : > { %p8806_p13 = pnand %p8804_p10, %p8801_p9 }
  0x58   : > { %8809 = shalt.err (!%p8806_p13)
}
  0x59   : > { %s8810_s3 = scalar_lea.vmem %s9452_s10, 1024  ;;  %p8818_p4 = scmp.lt.s32.totalorder %s9452_s10, %s9452_s10 }
  0x5a   : > { %p8811_p1 = scmp.ne.s32.totalorder %s9452_s10, %s8810_s3  ;;  %p8819_p7 = scmp.lt.s32.totalorder %s8810_s3, %s8810_s3 }
  0x5c   : > { %p8813_p2 = pnand %p8811_p1, %p9462_p0  ;;  %p8820_p8 = por %p8819_p7, %p8818_p4 }
  0x5e   : > { %p8814_p3 = pneg %p8813_p2 }
  0x60   : > { %p8821_p11 = pnand %p8820_p8, %p8814_p3 }
  0x62   : > { %8824 = shalt.err (!%p8821_p11)
}
  0x63   : > { %8293 = dma.hbm_to_vmem [thread:$0]  (!%p9448_p12), %s11168_s15, 1024, %s9452_s10, [#allocation9], %s11127_s7, %s11127_s7, %s11129_s30  }
  0x64   : > { %s9229_s4 = smov [#allocation11]   ;;  %s9230_s27 = smov [#allocation14]  }
  0x65   : > { %s774_s1 = sshll.u32 %s9229_s4, 4  ;;  %s800_s29 = sshll.u32 %s9230_s27, 4  ;;  %s775_s1 = int_to_ptr.vmem [resolvable:$true] %s774_s1  ;;  %s9507_s29 = int_to_ptr.vmem [resolvable:$true] %s800_s29 }
  0x66   : > { %s8825_s8 = scalar_lea.hbm %s11095_s17, 2048 }
  0x67   : > { %p8826_p5 = scmp.ne.s32.totalorder %s11095_s17, %s8825_s8  ;;  %p8832_p10 = scmp.lt.u32.totalorder %s8825_s8, %s11095_s17 }
  0x69   : > { %p8828_p6 = pnand %p8826_p5, %p9462_p0 }
  0x6b   : > { %p8829_p9 = pneg %p8828_p6 }
  0x6d   : > { %p8834_p13 = pnand %p8832_p10, %p8829_p9 }
  0x6f   : > { %8837 = shalt.err (!%p8834_p13)
}
  0x70   : > { %s8838_s26 = scalar_lea.vmem %s775_s1, 2048  ;;  %p8846_p4 = scmp.lt.s32.totalorder %s775_s1, %s775_s1 }
  0x71   : > { %p8839_p1 = scmp.ne.s32.totalorder %s775_s1, %s8838_s26  ;;  %p8847_p7 = scmp.lt.s32.totalorder %s8838_s26, %s8838_s26 }
  0x73   : > { %p8841_p2 = pnand %p8839_p1, %p9462_p0  ;;  %p8848_p8 = por %p8847_p7, %p8846_p4 }
  0x75   : > { %p8842_p3 = pneg %p8841_p2 }
  0x77   : > { %p8849_p11 = pnand %p8848_p8, %p8842_p3 }
  0x79   : > { %8852 = shalt.err (!%p8849_p11)
}
  0x7a   : > { %s11131_s28 = smov 128   ;;  %s9232_s4 = smov 8  }
  0x7b   : > { %8299 = dma.hbm_to_vmem [thread:$0]  (!%p9448_p12), %s11095_s17, 2048, %s775_s1, [#allocation12], %s11131_s28, %s11131_s28, %s9232_s4  }
  0x7c   : > { %s8853_s3 = scalar_lea.hbm %s11097_s19, 2048 }
  0x7d   : > { %p8854_p5 = scmp.ne.s32.totalorder %s11097_s19, %s8853_s3  ;;  %p8860_p10 = scmp.lt.u32.totalorder %s8853_s3, %s11097_s19 }
  0x7f   : > { %p8856_p6 = pnand %p8854_p5, %p9462_p0 }
  0x81   : > { %p8857_p9 = pneg %p8856_p6 }
  0x83   : > { %p8862_p13 = pnand %p8860_p10, %p8857_p9 }
  0x85   : > { %8865 = shalt.err (!%p8862_p13)
}
  0x86   : > { %s8866_s1 = scalar_lea.vmem %s9507_s29, 2048  ;;  %p8874_p4 = scmp.lt.s32.totalorder %s9507_s29, %s9507_s29 }
  0x87   : > { %p8867_p1 = scmp.ne.s32.totalorder %s9507_s29, %s8866_s1  ;;  %p8875_p7 = scmp.lt.s32.totalorder %s8866_s1, %s8866_s1 }
  0x89   : > { %p8869_p2 = pnand %p8867_p1, %p9462_p0  ;;  %p8876_p8 = por %p8875_p7, %p8874_p4 }
  0x8b   : > { %p8870_p3 = pneg %p8869_p2 }
  0x8d   : > { %p8877_p11 = pnand %p8876_p8, %p8870_p3 }
  0x8f   : > { %8880 = shalt.err (!%p8877_p11)
}
  0x90   : > { %8305 = dma.hbm_to_vmem [thread:$0]  (!%p9448_p12), %s11097_s19, 2048, %s9507_s29, [#allocation15], %s11131_s28, %s11131_s28, %s9232_s4  }
  0x91   : > { %s9233_s6 = smov [#allocation17]   ;;  %s9234_s8 = smov [#allocation20]  }
  0x92   : > { %s827_s0 = sshll.u32 %s9233_s6, 4  ;;  %s849_s3 = sshll.u32 %s9234_s8, 4  ;;  %s828_s0 = int_to_ptr.vmem [resolvable:$true] %s827_s0  ;;  %s9556_s3 = int_to_ptr.vmem [resolvable:$true] %s849_s3 }
  0x93   : > { %s8881_s26 = scalar_lea.hbm %s11099_s21, 16 }
  0x94   : > { %p8882_p5 = scmp.ne.s32.totalorder %s11099_s21, %s8881_s26  ;;  %p8888_p10 = scmp.lt.u32.totalorder %s8881_s26, %s11099_s21 }
  0x96   : > { %p8884_p6 = pnand %p8882_p5, %p9462_p0 }
  0x98   : > { %p8885_p9 = pneg %p8884_p6 }
  0x9a   : > { %p8890_p13 = pnand %p8888_p10, %p8885_p9 }
  0x9c   : > { %8893 = shalt.err (!%p8890_p13)
}
  0x9d   : > { %s8894_s27 = scalar_lea.vmem %s828_s0, 16  ;;  %s8901_s6 = scalar_lea.vmem %s828_s0, 32 }
  0x9e   : > { %p8895_p1 = scmp.ne.s32.totalorder %s828_s0, %s8894_s27  ;;  %p8902_p4 = scmp.lt.s32.totalorder %s828_s0, %s828_s0 }
  0x9f   : > { %p8903_p7 = scmp.lt.s32.totalorder %s8901_s6, %s8894_s27 }
  0xa0   : > { %p8897_p2 = pnand %p8895_p1, %p9462_p0 }
  0xa1   : > { %p8904_p8 = por %p8903_p7, %p8902_p4 }
  0xa2   : > { %p8898_p3 = pneg %p8897_p2 }
  0xa4   : > { %p8905_p11 = pnand %p8904_p8, %p8898_p3 }
  0xa6   : > { %8908 = shalt.err (!%p8905_p11)
}
  0xa7   : > { %8311 = dma.hbm_to_vmem [thread:$0]  (!%p9448_p12), %s11099_s21, 16, %s828_s0, [#allocation18]  }
  0xa8   : > { %s8909_s26 = scalar_lea.hbm %s11101_s23, 16 }
  0xa9   : > { %p8910_p5 = scmp.ne.s32.totalorder %s11101_s23, %s8909_s26  ;;  %p8916_p10 = scmp.lt.u32.totalorder %s8909_s26, %s11101_s23 }
  0xab   : > { %p8912_p6 = pnand %p8910_p5, %p9462_p0 }
  0xad   : > { %p8913_p9 = pneg %p8912_p6 }
  0xaf   : > { %p8918_p13 = pnand %p8916_p10, %p8913_p9 }
  0xb1   : > { %8921 = shalt.err (!%p8918_p13)
}
  0xb2   : > { %s8922_s0 = scalar_lea.vmem %s9556_s3, 16  ;;  %s8929_s6 = scalar_lea.vmem %s9556_s3, 32 }
  0xb3   : > { %p8923_p1 = scmp.ne.s32.totalorder %s9556_s3, %s8922_s0  ;;  %p8930_p4 = scmp.lt.s32.totalorder %s9556_s3, %s9556_s3 }
  0xb4   : > { %p8931_p7 = scmp.lt.s32.totalorder %s8929_s6, %s8922_s0 }
  0xb5   : > { %p8925_p2 = pnand %p8923_p1, %p9462_p0 }
  0xb6   : > { %p8932_p8 = por %p8931_p7, %p8930_p4 }
  0xb7   : > { %p8926_p3 = pneg %p8925_p2 }
  0xb9   : > { %p8933_p11 = pnand %p8932_p8, %p8926_p3 }
  0xbb   : > { %8936 = shalt.err (!%p8933_p11)
}
  0xbc   : > { %8317 = dma.hbm_to_vmem [thread:$0]  (!%p9448_p12), %s11101_s23, 16, %s9556_s3, [#allocation21]  }
  0xbd   : > { %s9235_s25 = smov [#allocation2]   ;;  %s9236_s26 = smov [#allocation7]  }
  0xbe   : > { %s688_s10 = sshll.u32 %s9235_s25, 4  ;;  %s732_s1 = sshll.u32 %s9236_s26, 4  ;;  %s689_s10 = int_to_ptr.vmem [resolvable:$true] %s688_s10  ;;  %s9600_s1 = int_to_ptr.vmem [resolvable:$true] %s732_s1 }
  0xbf   : > { %s11169_s27 = sld [smem:[#allocation45_spill]] }
  0xc5   : > { %s8937_s0 = scalar_lea.hbm %s11169_s27, 512 }
  0xc6   : > { %p8938_p5 = scmp.ne.s32.totalorder %s11169_s27, %s8937_s0  ;;  %p8944_p10 = scmp.lt.u32.totalorder %s8937_s0, %s11169_s27 }
  0xc8   : > { %p8940_p6 = pnand %p8938_p5, %p9462_p0 }
  0xca   : > { %p8941_p9 = pneg %p8940_p6 }
  0xcc   : > { %p8946_p13 = pnand %p8944_p10, %p8941_p9 }
  0xce   : > { %8949 = shalt.err (!%p8946_p13)
}
  0xcf   : > { %s8950_s8 = scalar_lea.vmem %s689_s10, 512  ;;  %p8958_p4 = scmp.lt.s32.totalorder %s689_s10, %s689_s10 }
  0xd0   : > { %p8951_p1 = scmp.ne.s32.totalorder %s689_s10, %s8950_s8  ;;  %p8959_p7 = scmp.lt.s32.totalorder %s8950_s8, %s8950_s8 }
  0xd2   : > { %p8953_p2 = pnand %p8951_p1, %p9462_p0  ;;  %p8960_p8 = por %p8959_p7, %p8958_p4 }
  0xd4   : > { %p8954_p3 = pneg %p8953_p2 }
  0xd6   : > { %p8961_p11 = pnand %p8960_p8, %p8954_p3 }
  0xd8   : > { %8964 = shalt.err (!%p8961_p11)
}
  0xd9   : > { %s11170_s28 = smov 128   ;;  %s8965_s0 = scalar_lea.hbm %s11091_s13, 512 }
  0xda   : > { %8284 = dma.hbm_to_vmem [thread:$0]  (!%p9448_p12), %s11169_s27, 512, %s689_s10, [#allocation3], %s11170_s28, %s11170_s28, %s9232_s4  }
  0xdb   : > { %p8966_p5 = scmp.ne.s32.totalorder %s11091_s13, %s8965_s0  ;;  %p8972_p10 = scmp.lt.u32.totalorder %s8965_s0, %s11091_s13 }
  0xdd   : > { %p8968_p6 = pnand %p8966_p5, %p9462_p0 }
  0xdf   : > { %p8969_p9 = pneg %p8968_p6 }
  0xe1   : > { %p8974_p13 = pnand %p8972_p10, %p8969_p9 }
  0xe3   : > { %8977 = shalt.err (!%p8974_p13)
}
  0xe4   : > { %s8978_s10 = scalar_lea.vmem %s9600_s1, 512  ;;  %p8986_p4 = scmp.lt.s32.totalorder %s9600_s1, %s9600_s1 }
  0xe5   : > { %p8979_p1 = scmp.ne.s32.totalorder %s9600_s1, %s8978_s10  ;;  %p8987_p7 = scmp.lt.s32.totalorder %s8978_s10, %s8978_s10 }
  0xe7   : > { %p8981_p2 = pnand %p8979_p1, %p9462_p0  ;;  %p8988_p8 = por %p8987_p7, %p8986_p4 }
  0xe9   : > { %p8982_p3 = pneg %p8981_p2 }
  0xeb   : > { %p8989_p11 = pnand %p8988_p8, %p8982_p3 }
  0xed   : > { %8992 = shalt.err (!%p8989_p11)
}
  0xee   : > { %8290 = dma.hbm_to_vmem [thread:$0]  (!%p9448_p12), %s11091_s13, 512, %s9600_s1, [#allocation6], %s11170_s28, %s11170_s28, %s9232_s4  }
  0xef   : > { %s9237_s7 = smov [#allocation10]   ;;  %s9238_s0 = smov [#allocation13]  }
  0xf0   : > { %s761_s29 = sshll.u32 %s9237_s7, 4  ;;  %s787_s6 = sshll.u32 %s9238_s0, 4  ;;  %s762_s29 = int_to_ptr.vmem [resolvable:$true] %s761_s29  ;;  %s9649_s6 = int_to_ptr.vmem [resolvable:$true] %s787_s6 }
  0xf1   : > { %s8993_s8 = scalar_lea.hbm %s11094_s16, 1024 }
  0xf2   : > { %p8994_p5 = scmp.ne.s32.totalorder %s11094_s16, %s8993_s8  ;;  %p9000_p10 = scmp.lt.u32.totalorder %s8993_s8, %s11094_s16 }
  0xf4   : > { %p8996_p6 = pnand %p8994_p5, %p9462_p0 }
  0xf6   : > { %p8997_p9 = pneg %p8996_p6 }
  0xf8   : > { %p9002_p13 = pnand %p9000_p10, %p8997_p9 }
  0xfa   : > { %9005 = shalt.err (!%p9002_p13)
}
  0xfb   : > { %s9006_s1 = scalar_lea.vmem %s762_s29, 1024  ;;  %p9014_p4 = scmp.lt.s32.totalorder %s762_s29, %s762_s29 }
  0xfc   : > { %p9007_p1 = scmp.ne.s32.totalorder %s762_s29, %s9006_s1  ;;  %p9015_p7 = scmp.lt.s32.totalorder %s9006_s1, %s9006_s1 }
  0xfe   : > { %p9009_p2 = pnand %p9007_p1, %p9462_p0  ;;  %p9016_p8 = por %p9015_p7, %p9014_p4 }
 0x100   : > { %p9010_p3 = pneg %p9009_p2 }
 0x102   : > { %p9017_p11 = pnand %p9016_p8, %p9010_p3 }
 0x104   : > { %9020 = shalt.err (!%p9017_p11)
}
 0x105   : > { %s11171_s15 = smov 4   ;;  %s11172_s28 = smov 64  }
 0x106   : > { %8296 = dma.hbm_to_vmem [thread:$0]  (!%p9448_p12), %s11094_s16, 1024, %s762_s29, [#allocation9], %s11172_s28, %s11172_s28, %s11171_s15  }
 0x107   : > { %s9021_s3 = scalar_lea.hbm %s11096_s18, 1024 }
 0x108   : > { %p9022_p5 = scmp.ne.s32.totalorder %s11096_s18, %s9021_s3  ;;  %p9028_p10 = scmp.lt.u32.totalorder %s9021_s3, %s11096_s18 }
 0x10a   : > { %p9024_p6 = pnand %p9022_p5, %p9462_p0 }
 0x10c   : > { %p9025_p9 = pneg %p9024_p6 }
 0x10e   : > { %p9030_p13 = pnand %p9028_p10, %p9025_p9 }
 0x110   : > { %9033 = shalt.err (!%p9030_p13)
}
 0x111   : > { %s9034_s29 = scalar_lea.vmem %s9649_s6, 1024  ;;  %p9042_p4 = scmp.lt.s32.totalorder %s9649_s6, %s9649_s6 }
 0x112   : > { %p9035_p1 = scmp.ne.s32.totalorder %s9649_s6, %s9034_s29  ;;  %p9043_p7 = scmp.lt.s32.totalorder %s9034_s29, %s9034_s29 }
 0x114   : > { %p9037_p2 = pnand %p9035_p1, %p9462_p0  ;;  %p9044_p8 = por %p9043_p7, %p9042_p4 }
 0x116   : > { %p9038_p3 = pneg %p9037_p2 }
 0x118   : > { %p9045_p11 = pnand %p9044_p8, %p9038_p3 }
 0x11a   : > { %9048 = shalt.err (!%p9045_p11)
}
 0x11b   : > { %8302 = dma.hbm_to_vmem [thread:$0]  (!%p9448_p12), %s11096_s18, 1024, %s9649_s6, [#allocation12], %s11172_s28, %s11172_s28, %s11171_s15  }
 0x11c   : > { %s9239_s7 = smov [#allocation16]   ;;  %s9240_s30 = smov [#allocation19]  }
 0x11d   : > { %s813_s0 = sshll.u32 %s9239_s7, 4  ;;  %s838_s3 = sshll.u32 %s9240_s30, 4  ;;  %s814_s0 = int_to_ptr.vmem [resolvable:$true] %s813_s0  ;;  %s9698_s3 = int_to_ptr.vmem [resolvable:$true] %s838_s3 }
 0x11e   : > { %s9049_s25 = scalar_lea.hbm %s11098_s20, 2048 }
 0x11f   : > { %p9050_p5 = scmp.ne.s32.totalorder %s11098_s20, %s9049_s25  ;;  %p9056_p10 = scmp.lt.u32.totalorder %s9049_s25, %s11098_s20 }
 0x121   : > { %p9052_p6 = pnand %p9050_p5, %p9462_p0 }
 0x123   : > { %p9053_p9 = pneg %p9052_p6 }
 0x125   : > { %p9058_p13 = pnand %p9056_p10, %p9053_p9 }
 0x127   : > { %9061 = shalt.err (!%p9058_p13)
}
 0x128   : > { %s9062_s26 = scalar_lea.vmem %s814_s0, 2048  ;;  %p9070_p4 = scmp.lt.s32.totalorder %s814_s0, %s814_s0 }
 0x129   : > { %p9063_p1 = scmp.ne.s32.totalorder %s814_s0, %s9062_s26  ;;  %p9071_p7 = scmp.lt.s32.totalorder %s9062_s26, %s9062_s26 }
 0x12b   : > { %p9065_p2 = pnand %p9063_p1, %p9462_p0  ;;  %p9072_p8 = por %p9071_p7, %p9070_p4 }
 0x12d   : > { %p9066_p3 = pneg %p9065_p2 }
 0x12f   : > { %p9073_p11 = pnand %p9072_p8, %p9066_p3 }
 0x131   : > { %9076 = shalt.err (!%p9073_p11)
}
 0x132   : > { %8308 = dma.hbm_to_vmem [thread:$0]  (!%p9448_p12), %s11098_s20, 2048, %s814_s0, [#allocation15], %s11172_s28, %s11172_s28, %s11171_s15  }
 0x133   : > { %s9077_s25 = scalar_lea.hbm %s11100_s22, 16 }
 0x134   : > { %p9078_p5 = scmp.ne.s32.totalorder %s11100_s22, %s9077_s25  ;;  %p9084_p10 = scmp.lt.u32.totalorder %s9077_s25, %s11100_s22 }
 0x136   : > { %p9080_p6 = pnand %p9078_p5, %p9462_p0 }
 0x138   : > { %p9081_p9 = pneg %p9080_p6 }
 0x13a   : > { %p9086_p13 = pnand %p9084_p10, %p9081_p9 }
 0x13c   : > { %9089 = shalt.err (!%p9086_p13)
}
 0x13d   : > { %s9090_s15 = scalar_lea.vmem %s9698_s3, 16  ;;  %s9097_s28 = scalar_lea.vmem %s9698_s3, 32 }
 0x13e   : > { %p9091_p1 = scmp.ne.s32.totalorder %s9698_s3, %s9090_s15  ;;  %p9098_p4 = scmp.lt.s32.totalorder %s9698_s3, %s9698_s3 }
 0x13f   : > { %p9099_p7 = scmp.lt.s32.totalorder %s9097_s28, %s9090_s15 }
 0x140   : > { %p9093_p2 = pnand %p9091_p1, %p9462_p0 }
 0x141   : > { %p9100_p8 = por %p9099_p7, %p9098_p4 }
 0x142   : > { %p9094_p3 = pneg %p9093_p2 }
 0x144   : > { %p9101_p11 = pnand %p9100_p8, %p9094_p3 }
 0x146   : > { %9104 = shalt.err (!%p9101_p11)
}
 0x147   : > { %8314 = dma.hbm_to_vmem [thread:$0]  (!%p9448_p12), %s11100_s22, 16, %s9698_s3, [#allocation18]  }
 0x148   : > { %s9241_s7 = smov [#allocation22]   ;;  %s9105_s25 = scalar_lea.hbm %s11102_s24, 16 }
 0x149   : > { %s860_s30 = sshll.u32 %s9241_s7, 4  ;;  %p9106_p5 = scmp.ne.s32.totalorder %s11102_s24, %s9105_s25  ;;  %s861_s30 = int_to_ptr.vmem [resolvable:$true] %s860_s30 }
 0x14a   : > { %p9112_p10 = scmp.lt.u32.totalorder %s9105_s25, %s11102_s24 }
 0x14b   : > { %p9108_p6 = pnand %p9106_p5, %p9462_p0 }
 0x14d   : > { %p9109_p9 = pneg %p9108_p6 }
 0x14f   : > { %p9114_p13 = pnand %p9112_p10, %p9109_p9 }
 0x151   : > { %9117 = shalt.err (!%p9114_p13)
}
 0x152   : > { %s9118_s3 = scalar_lea.vmem %s861_s30, 16  ;;  %s9125_s15 = scalar_lea.vmem %s861_s30, 32 }
 0x153   : > { %p9119_p1 = scmp.ne.s32.totalorder %s861_s30, %s9118_s3  ;;  %p9126_p4 = scmp.lt.s32.totalorder %s861_s30, %s861_s30 }
 0x154   : > { %p9127_p7 = scmp.lt.s32.totalorder %s9125_s15, %s9118_s3 }
 0x155   : > { %p9121_p2 = pnand %p9119_p1, %p9462_p0 }
 0x156   : > { %p9128_p8 = por %p9127_p7, %p9126_p4 }
 0x157   : > { %p9122_p3 = pneg %p9121_p2 }
 0x159   : > { %p9129_p11 = pnand %p9128_p8, %p9122_p3 }
 0x15b   : > { %9132 = shalt.err (!%p9129_p11)
}
 0x15c   : > { %8320 = dma.hbm_to_vmem [thread:$0]  (!%p9448_p12), %s11102_s24, 16, %s861_s30, [#allocation21]  }
 0x15d   : > { %p11173_p5 = scmp.ne.s32.totalorder %s11164_s11, 0 }
 0x15e   : > { %p11174_p6 = scmp.eq.s32.totalorder (!%p11173_p5), %s9412_s9, 0 }
 0x15f   : > { %920 = sbr.rel (%p11173_p5) target bundleno = 15869 (0x3dfd), region = 124 }
 0x166   : > { %9178 = dma.done.wait (%p11174_p6), [#allocation3], 512   ;;  %p11175_p0 = pmov %p11174_p6 }
 0x168   : > { %9180 = vsyncadd (%p11175_p0), [#allocation3], 4294966784  ;;  %p11176_p9 = pmov %p11175_p0 }
 0x169   : > { %p11177_p10 = pmov %p11175_p0 }
 0x16a   : > { %9182 = dma.done.wait (%p11176_p9), [#allocation6], 1536  }
 0x16b   : > { %9184 = vsyncadd (%p11177_p10), [#allocation6], 4294965760  ;;  %p11178_p13 = pmov %p11175_p0 }
 0x16c   : > { %p11179_p12 = pmov %p11175_p0 }
 0x16d   : > { %9186 = dma.done.wait (%p11178_p13), [#allocation9], 2048  }
 0x16e   : > { %9188 = vsyncadd (%p11179_p12), [#allocation9], 4294965248  ;;  %p11180_p1 = pmov %p11175_p0 }
 0x16f   : > { %p11181_p2 = pmov %p11175_p0 }
 0x170   : > { %9190 = dma.done.wait (%p11180_p1), [#allocation12], 3072  }
 0x171   : > { %9192 = vsyncadd (%p11181_p2), [#allocation12], 4294964224  ;;  %p11182_p3 = pmov %p11175_p0 }
 0x172   : > { %p11183_p4 = pmov %p11175_p0 }
 0x173   : > { %9194 = dma.done.wait (%p11182_p3), [#allocation15], 4096  }
 0x174   : > { %9196 = vsyncadd (%p11183_p4), [#allocation15], 4294963200  ;;  %p11184_p7 = pmov %p11175_p0 }
 0x175   : > { %p11185_p8 = pmov %p11175_p0 }
 0x176   : > { %9198 = dma.done.wait (%p11184_p7), [#allocation18], 32  }
 0x177   : > { %9200 = vsyncadd (%p11185_p8), [#allocation18], 4294967264  ;;  %p11186_p11 = pmov %p11175_p0 }
 0x178   : > { %p11187_p5 = pmov %p11175_p0 }
 0x179   : > { %9202 = dma.done.wait (%p11186_p11), [#allocation21], 32  }
 0x17a   : > { %9204 = vsyncadd (%p11187_p5), [#allocation21], 4294967264  ;;  %s7151_s11 = sshll.u32 %s9412_s9, 1  ;;  %s11188_s7 = sld [smem:[#allocation40_spill]]  ;;  %v9242_v18 = vmov 0   ;;  %v9243_v19 = vmov 0.0  }
 0x17b   : > { %p1064_p6 = scmp.lt.s32.totalorder %s7151_s11, 3  ;;  %s11189_s25 = sld [smem:[#allocation46_spill]]  ;;  %1319 = vmatprep.mubr.bf16.mxu1 %v9242_v18  ;;  %7703 = vmatprep.subr.bf16.mxu0 %v9243_v19  ;;  %vm9244_vm0 = vmmov 0   ;;  %vm1394_vm1 = vcmask 261120   ;;  %vm1464_vm2 = vcmask 1043456   ;;  %v9932_v60 = vld [vmem:[#allocation2] sm:$0xff] }
 0x17c   : > { %8409 = vset.pattern.permute.xlu1 %v9242_v18  ;;  %8410 = vset.pattern.permute.xlu0 %v9242_v18  ;;  %s11190_s28 = sld [smem:[#allocation50_spill]]  ;;  %vm1448_vm3 = vcmask 64512   ;;  %s11133_s1 = smov 32   ;;  %vm6799_vm8 = vcmask 7168  }
 0x17d   : > { %s11216_s11 = smov (!%p1064_p6, %s7151_s11), 3  ;;  %7705 = vmatprep.mubr.msk.bf16.mxu0 %vm9244_vm0, %v9243_v19  ;;  %s11191_s4 = sld [smem:[#allocation42_spill]] }
 0x17e   : > { %s9797_s5 = sshll.u32 %s11216_s11, 3  ;;  %s11192_s15 = sld [smem:[#allocation48_spill]] }
 0x17f   : > { %s11193_s26 = sld [smem:[#allocation41_spill]]  ;;  %s11195_s2 = sld [smem:[#allocation51_spill]] }
 0x180   : > { %s9803_s30 = scalar_lea.vmem %s11188_s7, %s9797_s5  ;;  %s9245_s7 = smov 96  }
 0x181   : > { %v1100_v0 = vld [vmem:[%s9803_s30] sm:$0xff]  ;;  %v1101_v2 = vld [vmem:[%s9803_s30 + $0x8] sm:$0xff]  ;;  %v8419_v9 = vld [vmem:[%s11189_s25 + $0x30] ss:$12 sps:$4 sm:$0xff]   ;;  %s11194_s3 = sld [smem:[#allocation49_spill]]  ;;  %s11196_s6 = smov 64  }
 0x182   : > { %v1103_v1 = vmul.f32 %v1100_v0, %v1100_v0  ;;  %v8411_v3 = vld [vmem:[%s11189_s25 + $0x4] ss:$12 sps:$4 sm:$0xff]   ;;  %v8413_v4 = vld [vmem:[%s11189_s25] ss:$12 sps:$4 sm:$0xff]   ;;  %v1104_v5 = vmul.f32 %v1101_v2, %v1101_v2  ;;  %v8414_v6 = vld [vmem:[%s11189_s25 + $0x1c] ss:$12 sps:$4 sm:$0xff]  }
 0x183   : > { %v8416_v7 = vld [vmem:[%s11189_s25 + $0x18] ss:$12 sps:$4 sm:$0xff]   ;;  %1287 = vmatprep.subr.bf16.mxu1 %v8411_v3  ;;  %v8417_v8 = vld [vmem:[%s11189_s25 + $0x34] ss:$12 sps:$4 sm:$0xff]   ;;  %v8426_v14 = vld [vmem:[%s11189_s25 + $0x7c] ss:$12 sps:$4 sm:$0xff]   ;;  %s9930_s29 = scalar_lea.vmem %s11191_s4, %s11216_s11 }
 0x184   : > { %1105 = vadd.xlane.f32.xlu0 %v1103_v1  ;;  %1288 = vmatpush1.bf16.msra.mxu1 %v8413_v4  ;;  %v8420_v10 = vld [vmem:[%s11189_s25 + $0x4c] ss:$12 sps:$4 sm:$0xff]   ;;  %v8422_v11 = vld [vmem:[%s11189_s25 + $0x48] ss:$12 sps:$4 sm:$0xff]   ;;  %v8423_v12 = vld [vmem:[%s11189_s25 + $0x64] ss:$12 sps:$4 sm:$0xff]  }
 0x185   : > { %1289 = vmatprep.subr.bf16.mxu1 %v8414_v6  ;;  %v8425_v13 = vld [vmem:[%s11189_s25 + $0x60] ss:$12 sps:$4 sm:$0xff]   ;;  %v8428_v15 = vld [vmem:[%s11189_s25 + $0x78] ss:$12 sps:$4 sm:$0xff]   ;;  %v8431_v17 = vld [vmem:[%s11189_s25 + $0x90] ss:$12 sps:$4 sm:$0xff]   ;;  %s10196_s8 = scalar_lea.vmem %s11193_s26, %s9797_s5 }
 0x186   : > { %v8429_v16 = vld [vmem:[%s11189_s25 + $0x94] ss:$12 sps:$4 sm:$0xff]   ;;  %v8432_v20 = vld [vmem:[%s11189_s25 + $0xac] ss:$12 sps:$4 sm:$0xff]   ;;  %v8438_v39 = vld [vmem:[%s11189_s25 + $0x50] ss:$12 sps:$4 sm:$0xff]  }
 0x187   : > { %v8434_v21 = vld [vmem:[%s11189_s25 + $0xa8] ss:$12 sps:$4 sm:$0xff]   ;;  %v7161_v31 = vld [vmem:[%s11190_s28] ss:$0 sm:$0xff]  ;;  %v8437_v38 = vld [vmem:[%s11189_s25 + $0x38] ss:$12 sps:$4 sm:$0xff]  }
 0x188   : > { %1107 = vadd.xlane.f32.xlu0 %v1104_v5  ;;  %1290 = vmatpush1.bf16.msra.mxu1 %v8416_v7  ;;  %v8435_v35 = vld [vmem:[%s11189_s25 + $0x8] ss:$12 sps:$4 sm:$0xff]   ;;  %v8436_v37 = vld [vmem:[%s11189_s25 + $0x20] ss:$12 sps:$4 sm:$0xff]   ;;  %v8441_v42 = vld [vmem:[%s11189_s25 + $0x98] ss:$12 sps:$4 sm:$0xff]  }
 0x189   : > { %1291 = vmatprep.subr.bf16.mxu1 %v8417_v8  ;;  %v8439_v40 = vld [vmem:[%s11189_s25 + $0x68] ss:$12 sps:$4 sm:$0xff]   ;;  %v8440_v41 = vld [vmem:[%s11189_s25 + $0x80] ss:$12 sps:$4 sm:$0xff]   ;;  %v8442_v43 = vld [vmem:[%s11189_s25 + $0xb0] ss:$12 sps:$4 sm:$0xff]  }
 0x18a   : > { %v9935_v61 = vld [vmem:[%s9930_s29] ss:$0 sm:$0xff]  ;;  %v9940_v5 = vld [vmem:[#allocation2 + $0x8] sm:$0xff]  ;;  %s11135_s11 = smov 64   ;;  %s11202_s4 = sld [smem:[#allocation44_spill]] }
 0x18c   : > { %1292 = vmatpush1.bf16.msra.mxu1 %v8419_v9 }
 0x18d   : > { %1293 = vmatprep.subr.bf16.mxu1 %v8420_v10 }
 0x190   : > { %1294 = vmatpush1.bf16.msra.mxu1 %v8422_v11 }
 0x191   : > { %1295 = vmatprep.subr.bf16.mxu1 %v8423_v12 }
 0x194   : > { %1296 = vmatpush1.bf16.msra.mxu1 %v8425_v13 }
 0x195   : > { %1297 = vmatprep.subr.bf16.mxu1 %v8426_v14 }
 0x198   : > { %1298 = vmatpush1.bf16.msra.mxu1 %v8428_v15 }
 0x199   : > { %1299 = vmatprep.subr.bf16.mxu1 %v8429_v16 }
 0x19c   : > { %1300 = vmatpush1.bf16.msra.mxu1 %v8431_v17 }
 0x19d   : > { %1301 = vmatprep.subr.bf16.mxu1 %v8432_v20 }
 0x1a0   : > { %1302 = vmatpush1.bf16.msra.mxu1 %v8434_v21 }
 0x1a1   : > { %7683 = vmatprep.subr.bf16.mxu1 %v9243_v19 }
 0x211   : > { %v1106_v22 = vpop.xlane.xlu0 %1105 }
 0x212   : > { %v1110_v23 = vmul.f32 0.0078125, %v1106_v22 }
 0x214   : > { %v1112_v24 = vadd.f32 1e-06, %v1110_v23 }
 0x215   : > { %v1108_v25 = vpop.xlane.xlu0 %1107 }
 0x216   : > { %8627 = vrsqrt.f32 %v1112_v24  ;;  %v1111_v26 = vmul.f32 0.0078125, %v1108_v25 }
 0x218   : > { %v1113_v27 = vadd.f32 1e-06, %v1111_v26 }
 0x21a   : > { %8629 = vrsqrt.f32 %v1113_v27 }
 0x220   : > { %v8628_v28 = vpop.eup %8627 }
 0x221   : > { %v1116_v29 = vmul.f32 %v8628_v28, %v1100_v0 }
 0x223   : > { %v1124_v33 = vmul.f32 %v7161_v31, %v1116_v29  ;;  %v9956_v29 = vld [vmem:[#allocation5 + $0x10] sm:$0xff]  }
 0x224   : > { %v8630_v30 = vpop.eup %8629 }
 0x225   : > { %v1117_v32 = vmul.f32 %v8630_v30, %v1101_v2  ;;  %v9959_v30 = vld [vmem:[#allocation5 + $0x18] sm:$0xff]  }
 0x227   : > { %v1125_v34 = vmul.f32 %v7161_v31, %v1117_v32 }
 0x229   : > { %v1126_v36 = vpack.c.bf16 %v1125_v34, %v1124_v33 }
 0x22b   : > { %1320 = vmatmul.mubr.bf16.vlgmr.msra.gmra.mrb[0].mxu1 %v1126_v36 }
 0x22c   : > { %7684 = vmatpush3.bf16.msra.mxu1 %v8435_v35  ;;  %7699 = vmatprep.mubr.msk.bf16.mxu1 %vm9244_vm0, %v9243_v19 }
 0x22d   : > { %7685 = vmatprep.subr.bf16.mxu1 %v9243_v19 }
 0x230   : > { %7686 = vmatpush3.bf16.msra.mxu1 %v8436_v37 }
 0x231   : > { %7687 = vmatprep.subr.bf16.mxu1 %v9243_v19 }
 0x234   : > { %7688 = vmatpush3.bf16.msra.mxu1 %v8437_v38  ;;  %v9970_v38 = vld [vmem:[#allocation5 + $0x8] sm:$0xff]  }
 0x235   : > { %7689 = vmatprep.subr.bf16.mxu1 %v9243_v19 }
 0x238   : > { %7690 = vmatpush3.bf16.msra.mxu1 %v8438_v39 }
 0x239   : > { %7691 = vmatprep.subr.bf16.mxu1 %v9243_v19 }
 0x23c   : > { %7692 = vmatpush3.bf16.msra.mxu1 %v8439_v40 }
 0x23d   : > { %7693 = vmatprep.subr.bf16.mxu1 %v9243_v19 }
 0x240   : > { %7694 = vmatpush3.bf16.msra.mxu1 %v8440_v41 }
 0x241   : > { %7695 = vmatprep.subr.bf16.mxu1 %v9243_v19 }
 0x244   : > { %7696 = vmatpush3.bf16.msra.mxu1 %v8441_v42 }
 0x245   : > { %7697 = vmatprep.subr.bf16.mxu1 %v9243_v19 }
 0x248   : > { %7698 = vmatpush3.bf16.msra.mxu1 %v8442_v43 }
 0x249   : > { %7709 = vmatprep.subr.bf16.mxu1 %v9243_v19 }
 0x24b   : > { %7700 = vmatmul.mubr.bf16.vlgmr.msra.gmra.mrb[4].mxu1 %v1126_v36  ;;  %v9966_v36 = vld [vmem:[#allocation5] sm:$0xff]  }
 0x24c   : > { %7711 = vmatprep.mubr.msk.bf16.mxu1 %vm9244_vm0, %v9243_v19 }
 0x2fe   : > { %v1321_v44 = vpop.f32.mrb[0].mxu1 }
 0x2ff   : > { %v1323_v45 = vpop.f32.mrb[1].mxu1 }
 0x300   : > { %v1325_v46 = vpop.f32.mrb[2].mxu1 }
 0x301   : > { %v9901_v47 = vpack.c.bf16 %v1325_v46, %v1321_v44  ;;  %v1327_v48 = vpop.f32.mrb[3].mxu1 }
 0x302   : > { %v9903_v49 = vpack.c.bf16 %v1327_v48, %v1323_v45 }
 0x304   : > { %1513 = vrot.lane.b32.xlu1 %v9903_v49, %s9245_s7  ;;  %v1399_v50 = vsel %vm1394_vm1, %v9903_v49, 0 }
 0x305   : > { %7704 = vmatpush3.bf16.xpose.msra.mxu0 %v1399_v50 }
 0x306   : > { %7715 = vmatprep.subr.bf16.mxu0 %v9243_v19 }
 0x308   : > { %1510 = vrot.lane.b32.xlu1 %v9901_v47, %s9245_s7 }
 0x30c   : > { %7706 = vmatmul.mubr.msk.bf16.vlgmr.msra.gmra.mrb[0].mxu0 %vm1394_vm1, %v9901_v47 }
 0x30d   : > { %7717 = vmatprep.mubr.msk.bf16.mxu0 %vm9244_vm0, %v9243_v19 }
 0x31e   : > { %v1364_v51 = vpop.f32.mrb[4].mxu1 }
 0x31f   : > { %v7701_v52 = vpop.f32.mrb[5].mxu1 }
 0x320   : > { %v1367_v53 = vpop.f32.mrb[6].mxu1 }
 0x321   : > { %v9916_v54 = vpack.c.bf16 %v1367_v53, %v1364_v51  ;;  %v7702_v55 = vpop.f32.mrb[7].mxu1 }
 0x323   : > { %v1466_v56 = vsel %vm1464_vm2, %v9916_v54, 0 }
 0x324   : > { %7710 = vmatpush3.bf16.msra.mxu1 %v1466_v56 }
 0x325   : > { %7721 = vmatprep.subr.bf16.mxu1 %v9243_v19 }
 0x376   : > { %v1514_v57 = vpop.permute.xlu1 %1513 }
 0x377   : > { %v1519_v58 = vsel %vm1394_vm1, %v1514_v57, 0 }
 0x378   : > { %7716 = vmatpush3.bf16.xpose.msra.mxu0 %v1519_v58 }
 0x379   : > { %7727 = vmatprep.subr.bf16.mxu0 %v9243_v19 }
 0x37a   : > { %v1511_v59 = vpop.permute.xlu1 %1510 }
 0x37f   : > { %7718 = vmatmul.mubr.msk.bf16.vlgmr.msra.gmra.mrb[4].mxu0 %vm1394_vm1, %v1511_v59 }
 0x380   : > { %7731 = vmatprep.mubr.msk.bf16.mxu0 %vm9244_vm0, %v9243_v19  ;;  %7728 = vmatpush3.bf16.msra.mxu0 %v9956_v29 }
 0x381   : > { %7729 = vmatprep.subr.bf16.mxu0 %v9243_v19 }
 0x384   : > { %7730 = vmatpush3.bf16.msra.mxu0 %v9959_v30 }
 0x385   : > { %7743 = vmatprep.subr.bf16.mxu0 %v9243_v19 }
 0x3df   : > { %v1435_v62 = vpop.f32.mrb[0].mxu0 }
 0x3e0   : > { %v1436_v63 = vadd.f32 %v1435_v62, %v9932_v60  ;;  %v7707_v0 = vpop.f32.mrb[1].mxu0 }
 0x3e1   : > { %v1438_v1 = vpop.f32.mrb[2].mxu0 }
 0x3e2   : > { %v7708_v2 = vpop.f32.mrb[3].mxu0  ;;  %v1447_v3 = vadd.f32 %v9935_v61, %v1436_v63 }
 0x3e3   : > { %v9990_v2 = vld [vmem:[#allocation2 + $0x10] sm:$0xff] }
 0x3e4   : > { %v1449_v4 = vsel %vm1448_vm3, %v1447_v3, -inf }
 0x3e5   : > { %1450 = vmax.xlane.f32.xlu0 %v1449_v4 }
 0x452   : > { %v1555_v6 = vpop.f32.mrb[4].mxu0 }
 0x453   : > { %v1556_v7 = vadd.f32 %v1555_v6, %v9940_v5  ;;  %v7719_v8 = vpop.f32.mrb[5].mxu0 }
 0x454   : > { %v1558_v9 = vpop.f32.mrb[6].mxu0 }
 0x455   : > { %v7720_v10 = vpop.f32.mrb[7].mxu0  ;;  %v1561_v11 = vadd.f32 %v9935_v61, %v1556_v7 }
 0x457   : > { %v1562_v12 = vsel %vm1448_vm3, %v1561_v11, -inf }
 0x458   : > { %1563 = vmax.xlane.f32.xlu1 %v1562_v12 }
 0x469   : > { %1734 = vrot.lane.b32.xlu1 %v9901_v47, %s11135_s11 }
 0x472   : > { %v1451_v13 = vpop.xlane.xlu0 %1450 }
 0x473   : > { %v1452_v14 = vsub.f32 %v1447_v3, %v1451_v13 }
 0x475   : > { %v1453_v15 = vmul.f32 1.442695, %v1452_v14 }
 0x477   : > { %8631 = vpow2.f32 %v1453_v15 }
 0x481   : > { %v8632_v16 = vpop.eup %8631 }
 0x482   : > { %v1455_v17 = vsel %vm1448_vm3, %v8632_v16, 0.0 }
 0x483   : > { %1456 = vadd.xlane.f32.xlu0 %v1455_v17 }
 0x4e5   : > { %v1564_v20 = vpop.xlane.xlu1 %1563 }
 0x4e6   : > { %v1565_v21 = vsub.f32 %v1561_v11, %v1564_v20  ;;  %v10004_v20 = vld [vmem:[#allocation5 + $0x20] sm:$0xff]  }
 0x4e8   : > { %v1566_v22 = vmul.f32 1.442695, %v1565_v21 }
 0x4e9   : > { %v1735_v53 = vpop.permute.xlu1 %1734 }
 0x4ea   : > { %8633 = vpow2.f32 %v1566_v22 }
 0x4f4   : > { %v8634_v23 = vpop.eup %8633 }
 0x4f5   : > { %v1568_v24 = vsel %vm1448_vm3, %v8634_v23, 0.0 }
 0x4f6   : > { %1569 = vadd.xlane.f32.xlu0 %v1568_v24 }
 0x50c   : > { %1575 = vrot.lane.b32.xlu0 %v9916_v54, %s9245_s7 }
 0x510   : > { %1736 = vrot.lane.b32.xlu0 %v9903_v49, %s11135_s11  ;;  %v1457_v25 = vpop.xlane.xlu0 %1456 }
 0x511   : > { %8635 = vrcp.f32 %v1457_v25 }
 0x51b   : > { %v8636_v26 = vpop.eup %8635 }
 0x51c   : > { %v1459_v27 = vmul.f32 %v8636_v26, %v8632_v16 }
 0x51e   : > { %v1460_v28 = vpack.c.bf16 %v1459_v27, %v1459_v27 }
 0x520   : > { %7712 = vmatmul.mubr.msk.bf16.vlgmr.msra.gmra.mrb[8].mxu1 %vm1448_vm3, %v1460_v28  ;;  %v10016_v28 = vld [vmem:[#allocation5 + $0x28] sm:$0xff]  }
 0x521   : > { %7723 = vmatprep.mubr.msk.bf16.mxu1 %vm9244_vm0, %v9243_v19 }
 0x583   : > { %v1570_v31 = vpop.xlane.xlu0 %1569 }
 0x584   : > { %8637 = vrcp.f32 %v1570_v31 }
 0x587   : > { %v1576_v32 = vpop.permute.xlu0 %1575 }
 0x588   : > { %v1581_v33 = vsel %vm1464_vm2, %v1576_v32, 0 }
 0x589   : > { %7722 = vmatpush3.bf16.msra.mxu1 %v1581_v33 }
 0x58a   : > { %7735 = vmatprep.subr.bf16.mxu1 %v9243_v19 }
 0x58b   : > { %v1737_v44 = vpop.permute.xlu0 %1736 }
 0x58c   : > { %v1742_v51 = vsel %vm1394_vm1, %v1737_v44, 0 }
 0x58e   : > { %v8638_v34 = vpop.eup %8637 }
 0x58f   : > { %v1572_v35 = vmul.f32 %v8638_v34, %v8634_v23 }
 0x591   : > { %v1573_v37 = vpack.c.bf16 %v1572_v35, %v1572_v35 }
 0x593   : > { %7724 = vmatmul.mubr.msk.bf16.vlgmr.msra.gmra.mrb[12].mxu1 %vm1448_vm3, %v1573_v37  ;;  %v10023_v37 = vld [vmem:[#allocation2 + $0x18] sm:$0xff] }
 0x594   : > { %7736 = vmatpush3.bf16.msra.mxu1 %v9966_v36  ;;  %7739 = vmatprep.mubr.msk.bf16.mxu1 %vm9244_vm0, %v9243_v19 }
 0x595   : > { %7737 = vmatprep.subr.bf16.mxu1 %v9243_v19 }
 0x598   : > { %7738 = vmatpush3.bf16.msra.mxu1 %v9970_v38 }
 0x599   : > { %7749 = vmatprep.subr.bf16.mxu1 %v9243_v19 }
 0x5f3   : > { %v1502_v39 = vpop.f32.mrb[8].mxu1 }
 0x5f4   : > { %v1508_v40 = vpack.c.bf16 %v1502_v39, %v1502_v39  ;;  %v7713_v41 = vpop.f32.mrb[9].mxu1 }
 0x5f5   : > { %v1505_v42 = vpop.f32.mrb[10].mxu1 }
 0x5f6   : > { %v7714_v43 = vpop.f32.mrb[11].mxu1  ;;  %7740 = vmatmul.mubr.msk.bf16.vlgmr.msra.gmra.mrb[16].mxu1 %vm1394_vm1, %v1508_v40 }
 0x5f7   : > { %7751 = vmatprep.mubr.msk.bf16.mxu1 %vm9244_vm0, %v9243_v19 }
 0x666   : > { %v1617_v45 = vpop.f32.mrb[12].mxu1 }
 0x667   : > { %v1623_v46 = vpack.c.bf16 %v1617_v45, %v1617_v45  ;;  %v7725_v48 = vpop.f32.mrb[13].mxu1 }
 0x668   : > { %v1620_v50 = vpop.f32.mrb[14].mxu1 }
 0x669   : > { %v7726_v52 = vpop.f32.mrb[15].mxu1  ;;  %7732 = vmatmul.mubr.msk.bf16.vlgmr.msra.gmra.mrb[8].mxu0 %vm1394_vm1, %v1623_v46  ;;  %v10031_v46 = vrot.slane %v9901_v47, 4 }
 0x66a   : > { %7744 = vmatpush3.bf16.xpose.msra.mxu0 %v1742_v51  ;;  %7745 = vmatprep.mubr.msk.bf16.mxu0 %vm9244_vm0, %v9243_v19 }
 0x66b   : > { %7755 = vmatprep.subr.bf16.mxu0 %v9243_v19 }
 0x671   : > { %7746 = vmatmul.mubr.msk.bf16.vlgmr.msra.gmra.mrb[12].mxu0 %vm1394_vm1, %v1735_v53 }
 0x672   : > { %7759 = vmatprep.mubr.msk.bf16.mxu0 %vm9244_vm0, %v9243_v19  ;;  %7756 = vmatpush3.bf16.msra.mxu0 %v10004_v20 }
 0x673   : > { %7757 = vmatprep.subr.bf16.mxu0 %v9243_v19 }
 0x676   : > { %7758 = vmatpush3.bf16.msra.mxu0 %v10016_v28 }
 0x677   : > { %7769 = vmatprep.subr.bf16.mxu0 %v9243_v19 }
 0x6c9   : > { %v1728_v55 = vpop.f32.mrb[16].mxu1 }
 0x6ca   : > { %v7741_v56 = vpop.f32.mrb[17].mxu1 }
 0x6cb   : > { %v1731_v57 = vpop.f32.mrb[18].mxu1 }
 0x6cc   : > { %v7742_v58 = vpop.f32.mrb[19].mxu1 }
 0x73c   : > { %v1673_v59 = vpop.f32.mrb[8].mxu0 }
 0x73d   : > { %v9988_v62 = vadd.f32 %v1728_v55, %v1673_v59  ;;  %v7733_v63 = vpop.f32.mrb[9].mxu0 }
 0x73e   : > { %v1676_v0 = vpop.f32.mrb[10].mxu0 }
 0x73f   : > { %v7734_v1 = vpop.f32.mrb[11].mxu0  ;;  %v10046_v0 = vld [vmem:[#allocation5 + $0x30] sm:$0xff]  }
 0x740   : > { %v10049_v1 = vld [vmem:[#allocation5 + $0x38] sm:$0xff]  }
 0x744   : > { %v1778_v3 = vpop.f32.mrb[12].mxu0 }
 0x745   : > { %v1779_v4 = vadd.f32 %v1778_v3, %v9990_v2  ;;  %v7747_v6 = vpop.f32.mrb[13].mxu0 }
 0x746   : > { %v1781_v7 = vpop.f32.mrb[14].mxu0 }
 0x747   : > { %v7748_v8 = vpop.f32.mrb[15].mxu0  ;;  %v1784_v9 = vadd.f32 %v9935_v61, %v1779_v4 }
 0x749   : > { %v1785_v10 = vsel %vm1448_vm3, %v1784_v9, -inf }
 0x74a   : > { %1786 = vmax.xlane.f32.xlu0 %v1785_v10  ;;  %v10074_v10 = vrot.slane %v9916_v54, 4 }
 0x760   : > { %1797 = vrot.lane.b32.xlu0 %v9916_v54, %s11135_s11 }
 0x764   : > { %1902 = vrot.lane.b32.xlu0 %v9901_v47, %s11133_s1  ;;  %v10039_v47 = vrot.slane %v9903_v49, 4 }
 0x766   : > { %v2076_v6 = vsel %vm1394_vm1, %v10039_v47, 0 }
 0x7d7   : > { %v1787_v11 = vpop.xlane.xlu0 %1786 }
 0x7d8   : > { %v1788_v12 = vsub.f32 %v1784_v9, %v1787_v11 }
 0x7da   : > { %v1789_v13 = vmul.f32 1.442695, %v1788_v12 }
 0x7db   : > { %v1798_v14 = vpop.permute.xlu0 %1797 }
 0x7dc   : > { %8639 = vpow2.f32 %v1789_v13  ;;  %v1803_v15 = vsel %vm1464_vm2, %v1798_v14, 0 }
 0x7dd   : > { %7750 = vmatpush3.bf16.msra.mxu1 %v1803_v15 }
 0x7de   : > { %7763 = vmatprep.subr.bf16.mxu1 %v9243_v19 }
 0x7df   : > { %v1903_v27 = vpop.permute.xlu0 %1902 }
 0x7e6   : > { %v8640_v16 = vpop.eup %8639 }
 0x7e7   : > { %v1791_v17 = vsel %vm1448_vm3, %v8640_v16, 0.0 }
 0x7e8   : > { %1792 = vadd.xlane.f32.xlu1 %v1791_v17 }
 0x7f9   : > { %1904 = vrot.lane.b32.xlu1 %v9903_v49, %s11133_s1 }
 0x875   : > { %v1793_v21 = vpop.xlane.xlu1 %1792 }
 0x876   : > { %8641 = vrcp.f32 %v1793_v21 }
 0x879   : > { %v1905_v24 = vpop.permute.xlu1 %1904 }
 0x87a   : > { %v1910_v26 = vsel %vm1394_vm1, %v1905_v24, 0 }
 0x880   : > { %v8642_v22 = vpop.eup %8641 }
 0x881   : > { %v1795_v23 = vmul.f32 %v8642_v22, %v8640_v16 }
 0x883   : > { %v1796_v25 = vpack.c.bf16 %v1795_v23, %v1795_v23 }
 0x885   : > { %7752 = vmatmul.mubr.msk.bf16.vlgmr.msra.gmra.mrb[20].mxu1 %vm1448_vm3, %v1796_v25 }
 0x886   : > { %7764 = vmatpush3.bf16.xpose.msra.mxu1 %v1910_v26  ;;  %7765 = vmatprep.mubr.msk.bf16.mxu1 %vm9244_vm0, %v9243_v19 }
 0x887   : > { %7775 = vmatprep.subr.bf16.mxu1 %v9243_v19 }
 0x88d   : > { %7766 = vmatmul.mubr.msk.bf16.vlgmr.msra.gmra.mrb[24].mxu1 %vm1394_vm1, %v1903_v27 }
 0x88e   : > { %7779 = vmatprep.mubr.msk.bf16.mxu1 %vm9244_vm0, %v9243_v19  ;;  %7776 = vmatpush3.bf16.msra.mxu1 %v10046_v0 }
 0x88f   : > { %7777 = vmatprep.subr.bf16.mxu1 %v9243_v19 }
 0x892   : > { %7778 = vmatpush3.bf16.msra.mxu1 %v10049_v1 }
 0x893   : > { %7789 = vmatprep.subr.bf16.mxu1 %v9243_v19 }
 0x958   : > { %v1839_v31 = vpop.f32.mrb[20].mxu1 }
 0x959   : > { %v1845_v32 = vpack.c.bf16 %v1839_v31, %v1839_v31  ;;  %v7753_v33 = vpop.f32.mrb[21].mxu1 }
 0x95a   : > { %v1842_v34 = vpop.f32.mrb[22].mxu1 }
 0x95b   : > { %v7754_v35 = vpop.f32.mrb[23].mxu1  ;;  %7760 = vmatmul.mubr.msk.bf16.vlgmr.msra.gmra.mrb[16].mxu0 %vm1394_vm1, %v1845_v32 }
 0x95c   : > { %7771 = vmatprep.mubr.msk.bf16.mxu0 %vm9244_vm0, %v9243_v19 }
 0x960   : > { %v1946_v39 = vpop.f32.mrb[24].mxu1 }
 0x961   : > { %v1947_v40 = vadd.f32 %v1946_v39, %v10023_v37  ;;  %v7767_v41 = vpop.f32.mrb[25].mxu1 }
 0x962   : > { %v1949_v42 = vpop.f32.mrb[26].mxu1 }
 0x963   : > { %v7768_v43 = vpop.f32.mrb[27].mxu1  ;;  %v1952_v44 = vadd.f32 %v9935_v61, %v1947_v40 }
 0x965   : > { %v1953_v45 = vsel %vm1448_vm3, %v1952_v44, -inf }
 0x966   : > { %1954 = vmax.xlane.f32.xlu0 %v1953_v45 }
 0x97c   : > { %1965 = vrot.lane.b32.xlu0 %v9916_v54, %s11133_s1 }
 0x980   : > { %2185 = vrot.lane.b32.xlu0 %v10031_v46, %s9245_s7 }
 0x9f3   : > { %v1955_v48 = vpop.xlane.xlu0 %1954 }
 0x9f4   : > { %v1956_v50 = vsub.f32 %v1952_v44, %v1955_v48 }
 0x9f6   : > { %v1957_v51 = vmul.f32 1.442695, %v1956_v50 }
 0x9f7   : > { %v1966_v52 = vpop.permute.xlu0 %1965 }
 0x9f8   : > { %8643 = vpow2.f32 %v1957_v51  ;;  %v1971_v53 = vsel %vm1464_vm2, %v1966_v52, 0 }
 0x9f9   : > { %7770 = vmatpush3.bf16.msra.mxu0 %v1971_v53 }
 0x9fa   : > { %7783 = vmatprep.subr.bf16.mxu0 %v9243_v19 }
 0x9fb   : > { %v2186_v9 = vpop.permute.xlu0 %2185 }
 0xa02   : > { %v8644_v61 = vpop.eup %8643 }
 0xa03   : > { %v1959_v55 = vsel %vm1448_vm3, %v8644_v61, 0.0 }
 0xa04   : > { %1960 = vadd.xlane.f32.xlu1 %v1959_v55 }
 0xa15   : > { %2187 = vrot.lane.b32.xlu1 %v10039_v47, %s9245_s7 }
 0xa2e   : > { %v1895_v56 = vpop.f32.mrb[16].mxu0 }
 0xa2f   : > { %v10044_v57 = vadd.f32 %v1895_v56, %v9988_v62  ;;  %v7761_v58 = vpop.f32.mrb[17].mxu0 }
 0xa30   : > { %v1898_v59 = vpop.f32.mrb[18].mxu0 }
 0xa31   : > { %v7762_v63 = vpop.f32.mrb[19].mxu0 }
 0xa91   : > { %v1961_v49 = vpop.xlane.xlu1 %1960 }
 0xa92   : > { %8645 = vrcp.f32 %v1961_v49 }
 0xa95   : > { %v2188_v7 = vpop.permute.xlu1 %2187 }
 0xa96   : > { %v2193_v8 = vsel %vm1394_vm1, %v2188_v7, 0 }
 0xa9c   : > { %v8646_v3 = vpop.eup %8645 }
 0xa9d   : > { %v1963_v62 = vmul.f32 %v8646_v3, %v8644_v61 }
 0xa9f   : > { %v1964_v4 = vpack.c.bf16 %v1963_v62, %v1963_v62 }
 0xaa1   : > { %7772 = vmatmul.mubr.msk.bf16.vlgmr.msra.gmra.mrb[20].mxu0 %vm1448_vm3, %v1964_v4 }
 0xaa2   : > { %7784 = vmatpush3.bf16.xpose.msra.mxu0 %v2076_v6  ;;  %7785 = vmatprep.mubr.msk.bf16.mxu0 %vm9244_vm0, %v9243_v19 }
 0xaa3   : > { %7795 = vmatprep.subr.bf16.mxu0 %v9243_v19 }
 0xaa9   : > { %7786 = vmatmul.mubr.msk.bf16.vlgmr.msra.gmra.mrb[24].mxu0 %vm1394_vm1, %v10031_v46 }
 0xaaa   : > { %7796 = vmatpush3.bf16.xpose.msra.mxu0 %v2193_v8  ;;  %7797 = vmatprep.mubr.msk.bf16.mxu0 %vm9244_vm0, %v9243_v19 }
 0xaab   : > { %7807 = vmatprep.subr.bf16.mxu0 %v9243_v19 }
 0xab1   : > { %7798 = vmatmul.mubr.msk.bf16.vlgmr.msra.gmra.mrb[28].mxu0 %vm1394_vm1, %v2186_v9 }
 0xab2   : > { %7808 = vmatpush3.bf16.msra.mxu0 %v9956_v29  ;;  %7811 = vmatprep.mubr.msk.bf16.mxu0 %vm9244_vm0, %v9243_v19  ;;  %v2142_v29 = vsel %vm1464_vm2, %v10074_v10, 0 }
 0xab3   : > { %7809 = vmatprep.subr.bf16.mxu0 %v9243_v19 }
 0xab6   : > { %7810 = vmatpush3.bf16.msra.mxu0 %v9959_v30  ;;  %v10083_v30 = vld [vmem:[%s9930_s29 + $0x1] ss:$0 sm:$0xff] }
 0xab7   : > { %7823 = vmatprep.subr.bf16.mxu0 %v9243_v19 }
 0xb74   : > { %v2007_v11 = vpop.f32.mrb[20].mxu0 }
 0xb75   : > { %v2013_v12 = vpack.c.bf16 %v2007_v11, %v2007_v11  ;;  %v7773_v13 = vpop.f32.mrb[21].mxu0 }
 0xb76   : > { %v2010_v14 = vpop.f32.mrb[22].mxu0 }
 0xb77   : > { %v7774_v15 = vpop.f32.mrb[23].mxu0  ;;  %7780 = vmatmul.mubr.msk.bf16.vlgmr.msra.gmra.mrb[28].mxu1 %vm1394_vm1, %v2013_v12 }
 0xb78   : > { %7790 = vmatpush3.bf16.msra.mxu1 %v2142_v29  ;;  %7791 = vmatprep.mubr.msk.bf16.mxu1 %vm9244_vm0, %v9243_v19 }
 0xb79   : > { %7801 = vmatprep.subr.bf16.mxu1 %v9243_v19 }
 0xb7c   : > { %v2112_v54 = vpop.f32.mrb[24].mxu0 }
 0xb7d   : > { %v2113_v16 = vadd.f32 %v2112_v54, %v9932_v60  ;;  %v7787_v17 = vpop.f32.mrb[25].mxu0 }
 0xb7e   : > { %v2115_v21 = vpop.f32.mrb[26].mxu0 }
 0xb7f   : > { %v7788_v22 = vpop.f32.mrb[27].mxu0  ;;  %v2124_v23 = vadd.f32 %v10083_v30, %v2113_v16 }
 0xb81   : > { %v2125_v24 = vsel %vm1448_vm3, %v2124_v23, -inf }
 0xb82   : > { %2126 = vmax.xlane.f32.xlu0 %v2125_v24 }
 0xb84   : > { %v2229_v25 = vpop.f32.mrb[28].mxu0 }
 0xb85   : > { %v2230_v26 = vadd.f32 %v2229_v25, %v9940_v5  ;;  %v7799_v27 = vpop.f32.mrb[29].mxu0 }
 0xb86   : > { %v2232_v31 = vpop.f32.mrb[30].mxu0 }
 0xb87   : > { %v7800_v32 = vpop.f32.mrb[31].mxu0  ;;  %v2235_v33 = vadd.f32 %v10083_v30, %v2230_v26 }
 0xb89   : > { %v2236_v34 = vsel %vm1448_vm3, %v2235_v33, -inf }
 0xb8a   : > { %2237 = vmax.xlane.f32.xlu1 %v2236_v34 }
 0xb9b   : > { %2385 = vrot.lane.b32.xlu1 %v10039_v47, %s11135_s11 }
 0xb9f   : > { %2383 = vrot.lane.b32.xlu1 %v10031_v46, %s11135_s11 }
 0xc0f   : > { %v2127_v60 = vpop.xlane.xlu0 %2126 }
 0xc10   : > { %v2128_v35 = vsub.f32 %v2124_v23, %v2127_v60 }
 0xc12   : > { %v2129_v39 = vmul.f32 1.442695, %v2128_v35 }
 0xc14   : > { %8647 = vpow2.f32 %v2129_v39 }
 0xc17   : > { %v2238_v40 = vpop.xlane.xlu1 %2237 }
 0xc18   : > { %v2239_v5 = vsub.f32 %v2235_v33, %v2238_v40 }
 0xc1a   : > { %v2240_v41 = vmul.f32 1.442695, %v2239_v5 }
 0xc1c   : > { %8649 = vpow2.f32 %v2240_v41 }
 0xc1e   : > { %v8648_v42 = vpop.eup %8647 }
 0xc1f   : > { %v2131_v43 = vsel %vm1448_vm3, %v8648_v42, 0.0 }
 0xc20   : > { %2132 = vadd.xlane.f32.xlu0 %v2131_v43 }
 0xc26   : > { %v8650_v44 = vpop.eup %8649 }
 0xc27   : > { %v2242_v45 = vsel %vm1448_vm3, %v8650_v44, 0.0 }
 0xc28   : > { %2243 = vadd.xlane.f32.xlu0 %v2242_v45 }
 0xc3e   : > { %2248 = vrot.lane.b32.xlu0 %v10074_v10, %s9245_s7 }
 0xc4a   : > { %v2063_v48 = vpop.f32.mrb[28].mxu1 }
 0xc4b   : > { %v10100_v50 = vadd.f32 %v2063_v48, %v10044_v57  ;;  %v7781_v51 = vpop.f32.mrb[29].mxu1 }
 0xc4c   : > { %v2066_v52 = vpop.f32.mrb[30].mxu1 }
 0xc4d   : > { %v7782_v53 = vpop.f32.mrb[31].mxu1 }
 0xcad   : > { %v2133_v61 = vpop.xlane.xlu0 %2132 }
 0xcae   : > { %8651 = vrcp.f32 %v2133_v61 }
 0xcb5   : > { %v2244_v55 = vpop.xlane.xlu0 %2243 }
 0xcb6   : > { %8653 = vrcp.f32 %v2244_v55 }
 0xcb8   : > { %v8652_v56 = vpop.eup %8651 }
 0xcb9   : > { %v2135_v58 = vmul.f32 %v8652_v56, %v8648_v42  ;;  %v2249_v59 = vpop.permute.xlu0 %2248 }
 0xcba   : > { %v2254_v49 = vsel %vm1464_vm2, %v2249_v59, 0 }
 0xcbb   : > { %v2136_v63 = vpack.c.bf16 %v2135_v58, %v2135_v58 }
 0xcbd   : > { %7792 = vmatmul.mubr.msk.bf16.vlgmr.msra.gmra.mrb[32].mxu1 %vm1448_vm3, %v2136_v63 }
 0xcbe   : > { %7802 = vmatpush3.bf16.msra.mxu1 %v2254_v49  ;;  %7803 = vmatprep.mubr.msk.bf16.mxu1 %vm9244_vm0, %v9243_v19 }
 0xcbf   : > { %7815 = vmatprep.subr.bf16.mxu1 %v9243_v19 }
 0xcc0   : > { %v8654_v57 = vpop.eup %8653 }
 0xcc1   : > { %v2246_v3 = vmul.f32 %v8654_v57, %v8650_v44  ;;  %v8763_v57 = vld [vmem:[%s9803_s30] sm:$0xff] }
 0xcc3   : > { %v2247_v62 = vpack.c.bf16 %v2246_v3, %v2246_v3 }
 0xcc5   : > { %7804 = vmatmul.mubr.msk.bf16.vlgmr.msra.gmra.mrb[36].mxu1 %vm1448_vm3, %v2247_v62 }
 0xcc6   : > { %7816 = vmatpush3.bf16.msra.mxu1 %v9966_v36  ;;  %7819 = vmatprep.mubr.msk.bf16.mxu1 %vm9244_vm0, %v9243_v19  ;;  %v2386_v36 = vpop.permute.xlu1 %2385 }
 0xcc7   : > { %7817 = vmatprep.subr.bf16.mxu1 %v9243_v19  ;;  %v2391_v15 = vsel %vm1394_vm1, %v2386_v36, 0 }
 0xcca   : > { %7818 = vmatpush3.bf16.msra.mxu1 %v9970_v38  ;;  %v2384_v29 = vpop.permute.xlu1 %2383 }
 0xccb   : > { %7829 = vmatprep.subr.bf16.mxu1 %v9243_v19 }
 0xd90   : > { %v2178_v4 = vpop.f32.mrb[32].mxu1 }
 0xd91   : > { %v2184_v6 = vpack.c.bf16 %v2178_v4, %v2178_v4  ;;  %v7793_v7 = vpop.f32.mrb[33].mxu1 }
 0xd92   : > { %v2181_v8 = vpop.f32.mrb[34].mxu1 }
 0xd93   : > { %v7794_v9 = vpop.f32.mrb[35].mxu1  ;;  %7820 = vmatmul.mubr.msk.bf16.vlgmr.msra.gmra.mrb[40].mxu1 %vm1394_vm1, %v2184_v6 }
 0xd94   : > { %7831 = vmatprep.mubr.msk.bf16.mxu1 %vm9244_vm0, %v9243_v19 }
 0xd98   : > { %v2290_v11 = vpop.f32.mrb[36].mxu1 }
 0xd99   : > { %v2296_v12 = vpack.c.bf16 %v2290_v11, %v2290_v11  ;;  %v7805_v13 = vpop.f32.mrb[37].mxu1 }
 0xd9a   : > { %v2293_v14 = vpop.f32.mrb[38].mxu1 }
 0xd9b   : > { %v7806_v38 = vpop.f32.mrb[39].mxu1  ;;  %7812 = vmatmul.mubr.msk.bf16.vlgmr.msra.gmra.mrb[32].mxu0 %vm1394_vm1, %v2296_v12 }
 0xd9c   : > { %7824 = vmatpush3.bf16.xpose.msra.mxu0 %v2391_v15  ;;  %7825 = vmatprep.mubr.msk.bf16.mxu0 %vm9244_vm0, %v9243_v19 }
 0xd9d   : > { %7835 = vmatprep.subr.bf16.mxu0 %v9243_v19 }
 0xda3   : > { %7826 = vmatmul.mubr.msk.bf16.vlgmr.msra.gmra.mrb[36].mxu0 %vm1394_vm1, %v2384_v29 }
 0xda4   : > { %7836 = vmatpush3.bf16.msra.mxu0 %v10004_v20  ;;  %7839 = vmatprep.mubr.msk.bf16.mxu0 %vm9244_vm0, %v9243_v19 }
 0xda5   : > { %7837 = vmatprep.subr.bf16.mxu0 %v9243_v19 }
 0xda8   : > { %7838 = vmatpush3.bf16.msra.mxu0 %v10016_v28 }
 0xda9   : > { %7849 = vmatprep.subr.bf16.mxu0 %v9243_v19 }
 0xe66   : > { %v2377_v54 = vpop.f32.mrb[40].mxu1 }
 0xe67   : > { %v7821_v16 = vpop.f32.mrb[41].mxu1 }
 0xe68   : > { %v2380_v17 = vpop.f32.mrb[42].mxu1 }
 0xe69   : > { %v7822_v21 = vpop.f32.mrb[43].mxu1 }
 0xe6e   : > { %v2334_v22 = vpop.f32.mrb[32].mxu0 }
 0xe6f   : > { %v10129_v23 = vadd.f32 %v2377_v54, %v2334_v22  ;;  %v7813_v24 = vpop.f32.mrb[33].mxu0  ;;  %v8451_v22 = vld [vmem:[%s11192_s15] ss:$8 sps:$4 sm:$0xff]  }
 0xe70   : > { %v2337_v25 = vpop.f32.mrb[34].mxu0  ;;  %v8456_v24 = vld [vmem:[%s11192_s15 + $0x14] ss:$8 sps:$4 sm:$0xff]  }
 0xe71   : > { %v7814_v26 = vpop.f32.mrb[35].mxu0  ;;  %v8454_v25 = vld [vmem:[%s11192_s15 + $0x10] ss:$8 sps:$4 sm:$0xff]  }
 0xe72   : > { %v8459_v26 = vld [vmem:[%s11192_s15 + $0x24] ss:$8 sps:$4 sm:$0xff]  }
 0xe76   : > { %v2427_v20 = vpop.f32.mrb[36].mxu0 }
 0xe77   : > { %v2428_v27 = vadd.f32 %v2427_v20, %v9990_v2  ;;  %v7827_v31 = vpop.f32.mrb[37].mxu0  ;;  %v8457_v20 = vld [vmem:[%s11192_s15 + $0x20] ss:$8 sps:$4 sm:$0xff]  }
 0xe78   : > { %v2430_v32 = vpop.f32.mrb[38].mxu0 }
 0xe79   : > { %v7828_v33 = vpop.f32.mrb[39].mxu0  ;;  %v2433_v28 = vadd.f32 %v10083_v30, %v2428_v27 }
 0xe7b   : > { %v2434_v34 = vsel %vm1448_vm3, %v2433_v28, -inf }
 0xe7c   : > { %2435 = vmax.xlane.f32.xlu0 %v2434_v34 }
 0xe92   : > { %2446 = vrot.lane.b32.xlu0 %v10074_v10, %s11135_s11  ;;  %s11197_s11 = smov 32  }
 0xe96   : > { %2539 = vrot.lane.b32.xlu0 %v10031_v46, %s11133_s1 }
 0xf09   : > { %v2436_v60 = vpop.xlane.xlu0 %2435 }
 0xf0a   : > { %v2437_v35 = vsub.f32 %v2433_v28, %v2436_v60  ;;  %v8764_v28 = vld [vmem:[%s9803_s30 + $0x8] sm:$0xff] }
 0xf0c   : > { %v2438_v39 = vmul.f32 1.442695, %v2437_v35  ;;  %v10202_v35 = vld [vmem:[%s10196_s8] sm:$0xff] }
 0xf0d   : > { %v2447_v40 = vpop.permute.xlu0 %2446 }
 0xf0e   : > { %8655 = vpow2.f32 %v2438_v39  ;;  %v2452_v2 = vsel %vm1464_vm2, %v2447_v40, 0  ;;  %v3064_v40 = vmul.f32 %v10202_v35, %v10202_v35 }
 0xf0f   : > { %7830 = vmatpush3.bf16.msra.mxu1 %v2452_v2  ;;  %v10209_v2 = vld [vmem:[%s10196_s8 + $0x8] sm:$0xff] }
 0xf10   : > { %7843 = vmatprep.subr.bf16.mxu1 %v9243_v19 }
 0xf11   : > { %v2540_v51 = vpop.permute.xlu0 %2539 }
 0xf18   : > { %v8656_v5 = vpop.eup %8655 }
 0xf19   : > { %v2440_v41 = vsel %vm1448_vm3, %v8656_v5, 0.0 }
 0xf1a   : > { %2441 = vadd.xlane.f32.xlu1 %v2440_v41  ;;  %v8462_v41 = vld [vmem:[%s11192_s15 + $0x34] ss:$8 sps:$4 sm:$0xff]  }
 0xf2b   : > { %2541 = vrot.lane.b32.xlu1 %v10039_v47, %s11133_s1 }
 0xfa7   : > { %v2442_v42 = vpop.xlane.xlu1 %2441 }
 0xfa8   : > { %8657 = vrcp.f32 %v2442_v42  ;;  %v8460_v42 = vld [vmem:[%s11192_s15 + $0x30] ss:$8 sps:$4 sm:$0xff]  }
 0xfab   : > { %v2542_v44 = vpop.permute.xlu1 %2541 }
 0xfac   : > { %v2547_v48 = vsel %vm1394_vm1, %v2542_v44, 0  ;;  %v8468_v44 = vld [vmem:[%s11192_s15 + $0x54] ss:$8 sps:$4 sm:$0xff]  }
 0xfb2   : > { %v8658_v46 = vpop.eup %8657 }
 0xfb3   : > { %v2444_v43 = vmul.f32 %v8658_v46, %v8656_v5  ;;  %v3065_v5 = vmul.f32 %v10209_v2, %v10209_v2  ;;  %v8465_v46 = vld [vmem:[%s11192_s15 + $0x44] ss:$8 sps:$4 sm:$0xff]  }
 0xfb5   : > { %v2445_v45 = vpack.c.bf16 %v2444_v43, %v2444_v43  ;;  %v8463_v43 = vld [vmem:[%s11192_s15 + $0x40] ss:$8 sps:$4 sm:$0xff]  }
 0xfb7   : > { %7832 = vmatmul.mubr.msk.bf16.vlgmr.msra.gmra.mrb[44].mxu1 %vm1448_vm3, %v2445_v45  ;;  %v8466_v45 = vld [vmem:[%s11192_s15 + $0x50] ss:$8 sps:$4 sm:$0xff]  }
 0xfb8   : > { %7844 = vmatpush3.bf16.xpose.msra.mxu1 %v2547_v48  ;;  %7845 = vmatprep.mubr.msk.bf16.mxu1 %vm9244_vm0, %v9243_v19  ;;  %v8471_v48 = vld [vmem:[%s11192_s15 + $0x64] ss:$8 sps:$4 sm:$0xff]  }
 0xfb9   : > { %7855 = vmatprep.subr.bf16.mxu1 %v9243_v19 }
 0xfbf   : > { %7846 = vmatmul.mubr.msk.bf16.vlgmr.msra.gmra.mrb[48].mxu1 %vm1394_vm1, %v2540_v51  ;;  %v8469_v51 = vld [vmem:[%s11192_s15 + $0x60] ss:$8 sps:$4 sm:$0xff]  }
 0xfc0   : > { %7856 = vmatpush3.bf16.msra.mxu1 %v10046_v0  ;;  %7859 = vmatprep.mubr.msk.bf16.mxu1 %vm9244_vm0, %v9243_v19 }
 0xfc1   : > { %7857 = vmatprep.subr.bf16.mxu1 %v9243_v19 }
 0xfc4   : > { %7858 = vmatpush3.bf16.msra.mxu1 %v10049_v1  ;;  %v10161_v1 = vadd.f32 %v8763_v57, %v10100_v50  ;;  %v8507_v57 = vld [vmem:[%s11194_s3 + $0x60] sm:$0xff]  }
 0xfc6   : > { %v2698_v62 = vmul.f32 %v10161_v1, %v10161_v1 }
0x108a   : > { %v2488_v47 = vpop.f32.mrb[44].mxu1 }
0x108b   : > { %v2494_v52 = vpack.c.bf16 %v2488_v47, %v2488_v47  ;;  %v7833_v53 = vpop.f32.mrb[45].mxu1  ;;  %v8474_v47 = vld [vmem:[%s11192_s15 + $0x74] ss:$8 sps:$4 sm:$0xff]  }
0x108c   : > { %v2491_v61 = vpop.f32.mrb[46].mxu1  ;;  %v8477_v53 = vld [vmem:[%s11092_s14 + $0x4] ss:$12 sps:$4 sm:$0xff]  }
0x108d   : > { %v7834_v55 = vpop.f32.mrb[47].mxu1  ;;  %7840 = vmatmul.mubr.msk.bf16.vlgmr.msra.gmra.mrb[40].mxu0 %vm1394_vm1, %v2494_v52  ;;  %v8472_v52 = vld [vmem:[%s11192_s15 + $0x70] ss:$8 sps:$4 sm:$0xff]   ;;  %v8499_v61 = vld [vmem:[%s11194_s3 + $0x40] sm:$0xff]  }
0x108e   : > { %7851 = vmatprep.mubr.msk.bf16.mxu0 %vm9244_vm0, %v9243_v19  ;;  %v8500_v55 = vld [vmem:[%s11194_s3] sm:$0xff]   ;;  %7491 = vmatprep.subr.bf16.mxu1 %v8499_v61 }
0x1092   : > { %v2583_v56 = vpop.f32.mrb[48].mxu1 }
0x1093   : > { %v2584_v0 = vadd.f32 %v2583_v56, %v10023_v37  ;;  %v7847_v58 = vpop.f32.mrb[49].mxu1  ;;  %v8501_v56 = vld [vmem:[%s11194_s3 + $0x48] sm:$0xff]  }
0x1094   : > { %v2586_v59 = vpop.f32.mrb[50].mxu1  ;;  %v8503_v58 = vld [vmem:[%s11194_s3 + $0x50] sm:$0xff]  }
0x1095   : > { %v7848_v63 = vpop.f32.mrb[51].mxu1  ;;  %v2589_v49 = vadd.f32 %v10083_v30, %v2584_v0  ;;  %v8502_v0 = vld [vmem:[%s11194_s3 + $0x8] sm:$0xff]   ;;  %v8504_v59 = vld [vmem:[%s11194_s3 + $0x10] sm:$0xff]  }
0x1096   : > { %v8505_v63 = vld [vmem:[%s11194_s3 + $0x58] sm:$0xff]  }
0x1097   : > { %v2590_v3 = vsel %vm1448_vm3, %v2589_v49, -inf }
0x1098   : > { %2591 = vmax.xlane.f32.xlu1 %v2590_v3  ;;  %v8508_v3 = vld [vmem:[%s11194_s3 + $0x20] sm:$0xff]  }
0x109c   : > { %2700 = vadd.xlane.f32.xlu1 %v2698_v62  ;;  %v8509_v62 = vld [vmem:[%s11194_s3 + $0x68] sm:$0xff]  }
0x1125   : > { %v2592_v4 = vpop.xlane.xlu1 %2591 }
0x1126   : > { %v2593_v6 = vsub.f32 %v2589_v49, %v2592_v4  ;;  %v8506_v49 = vld [vmem:[%s11194_s3 + $0x18] sm:$0xff]   ;;  %v8510_v4 = vld [vmem:[%s11194_s3 + $0x28] sm:$0xff]  }
0x1128   : > { %v2594_v7 = vmul.f32 1.442695, %v2593_v6 }
0x1129   : > { %v2701_v6 = vpop.xlane.xlu1 %2700 }
0x112a   : > { %8659 = vpow2.f32 %v2594_v7  ;;  %v2704_v7 = vmul.f32 0.0078125, %v2701_v6  ;;  %v8518_v6 = vld [vmem:[%s11092_s14 + $0x50] ss:$12 sps:$4 sm:$0xff]  }
0x1134   : > { %v8660_v37 = vpop.eup %8659 }
0x1135   : > { %v2596_v8 = vsel %vm1448_vm3, %v8660_v37, 0.0 }
0x1136   : > { %2597 = vadd.xlane.f32.xlu0 %v2596_v8 }
0x114c   : > { %2602 = vrot.lane.b32.xlu0 %v10074_v10, %s11133_s1 }
0x1160   : > { %v2532_v30 = vpop.f32.mrb[40].mxu0 }
0x1161   : > { %v2538_v50 = vadd.f32 %v2532_v30, %v10129_v23  ;;  %v7841_v9 = vpop.f32.mrb[41].mxu0  ;;  %v8453_v23 = vld [vmem:[%s11192_s15 + $0x4] ss:$8 sps:$4 sm:$0xff]  }
0x1162   : > { %v2535_v36 = vpop.f32.mrb[42].mxu0 }
0x1163   : > { %v7842_v11 = vpop.f32.mrb[43].mxu0 }
0x11c3   : > { %v2598_v12 = vpop.xlane.xlu0 %2597 }
0x11c4   : > { %8661 = vrcp.f32 %v2598_v12 }
0x11c7   : > { %v2603_v13 = vpop.permute.xlu0 %2602 }
0x11c8   : > { %v2608_v14 = vsel %vm1464_vm2, %v2603_v13, 0  ;;  %v7220_v13 = vld [vmem:[%s11195_s2] ss:$0 sm:$0xff]  ;;  %s11201_s2 = sld [smem:[#allocation43_spill]] }
0x11c9   : > { %7850 = vmatpush3.bf16.msra.mxu0 %v2608_v14 }
0x11ca   : > { %2817 = vmatprep.subr.bf16.mxu0 %v8453_v23  ;;  %v8483_v23 = vld [vmem:[%s11092_s14 + $0x34] ss:$12 sps:$4 sm:$0xff]  }
0x11ce   : > { %v8662_v15 = vpop.eup %8661  ;;  %s1084_s26 = scalar_lea.vmem %s11201_s2, %s9797_s5 }
0x11cf   : > { %v2600_v38 = vmul.f32 %v8662_v15, %v8660_v37  ;;  %v2706_v37 = vadd.f32 1e-06, %v2704_v7  ;;  %v8519_v7 = vld [vmem:[%s11092_s14 + $0x68] ss:$12 sps:$4 sm:$0xff]  }
0x11d1   : > { %v2601_v29 = vpack.c.bf16 %v2600_v38, %v2600_v38  ;;  %8663 = vrsqrt.f32 %v2706_v37  ;;  %v8520_v37 = vld [vmem:[%s11092_s14 + $0x80] ss:$12 sps:$4 sm:$0xff]  }
0x11d3   : > { %7852 = vmatmul.mubr.msk.bf16.vlgmr.msra.gmra.mrb[44].mxu0 %vm1448_vm3, %v2601_v29  ;;  %v8475_v29 = vld [vmem:[%s11092_s14] ss:$12 sps:$4 sm:$0xff]  }
0x11d4   : > { %2849 = vmatprep.mubr.bf16.mxu0 %v9242_v18  ;;  %2818 = vmatpush1.bf16.msra.mxu0 %v8451_v22 }
0x11d5   : > { %2819 = vmatprep.subr.bf16.mxu0 %v8456_v24 }
0x11d8   : > { %2820 = vmatpush1.bf16.msra.mxu0 %v8454_v25 }
0x11d9   : > { %2821 = vmatprep.subr.bf16.mxu0 %v8459_v26  ;;  %v8481_v26 = vld [vmem:[%s11092_s14 + $0x30] ss:$12 sps:$4 sm:$0xff]  }
0x11db   : > { %v8664_v9 = vpop.eup %8663 }
0x11dc   : > { %2822 = vmatpush1.bf16.msra.mxu0 %v8457_v20  ;;  %v2710_v36 = vmul.f32 %v8664_v9, %v10161_v1  ;;  %v8486_v20 = vld [vmem:[%s11092_s14 + $0x4c] ss:$12 sps:$4 sm:$0xff]  }
0x11dd   : > { %2823 = vmatprep.subr.bf16.mxu0 %v8462_v41  ;;  %v8498_v41 = vld [vmem:[%s11092_s14 + $0xac] ss:$12 sps:$4 sm:$0xff]  }
0x11de   : > { %v2718_v15 = vmul.f32 %v7220_v13, %v2710_v36  ;;  %v8522_v36 = vld [vmem:[%s11092_s14 + $0xb0] ss:$12 sps:$4 sm:$0xff]  }
0x11e0   : > { %2824 = vmatpush1.bf16.msra.mxu0 %v8460_v42 }
0x11e1   : > { %2825 = vmatprep.subr.bf16.mxu0 %v8465_v46 }
0x11e4   : > { %2826 = vmatpush1.bf16.msra.mxu0 %v8463_v43  ;;  %v7254_v43 = vld [vmem:[#allocation17] ss:$0 sm:$0xff] }
0x11e5   : > { %2827 = vmatprep.subr.bf16.mxu0 %v8468_v44  ;;  %v8496_v44 = vld [vmem:[%s11092_s14 + $0xa8] ss:$12 sps:$4 sm:$0xff]  }
0x11e8   : > { %2828 = vmatpush1.bf16.msra.mxu0 %v8466_v45 }
0x11e9   : > { %2829 = vmatprep.subr.bf16.mxu0 %v8471_v48 }
0x11ec   : > { %2830 = vmatpush1.bf16.msra.mxu0 %v8469_v51 }
0x11ed   : > { %2831 = vmatprep.subr.bf16.mxu0 %v8474_v47  ;;  %v8513_v47 = vld [vmem:[%s11194_s3 + $0x78] sm:$0xff]  }
0x11f0   : > { %2832 = vmatpush1.bf16.msra.mxu0 %v8472_v52  ;;  %v8514_v52 = vld [vmem:[%s11194_s3 + $0x38] sm:$0xff]  }
0x11f1   : > { %3247 = vmatprep.subr.bf16.mxu0 %v8477_v53 }
0x12a6   : > { %v2644_v10 = vpop.f32.mrb[44].mxu0 }
0x12a7   : > { %v2650_v54 = vpack.c.bf16 %v2644_v10, %v2644_v10  ;;  %v7853_v16 = vpop.f32.mrb[45].mxu0 }
0x12a8   : > { %v2647_v17 = vpop.f32.mrb[46].mxu0 }
0x12a9   : > { %v7854_v21 = vpop.f32.mrb[47].mxu0  ;;  %7860 = vmatmul.mubr.msk.bf16.vlgmr.msra.gmra.mrb[52].mxu1 %vm1394_vm1, %v2650_v54  ;;  %v8480_v54 = vld [vmem:[%s11092_s14 + $0x1c] ss:$12 sps:$4 sm:$0xff]  }
0x12aa   : > { %7492 = vmatpush3.bf16.msra.mxu1 %v8500_v55  ;;  %v8478_v21 = vld [vmem:[%s11092_s14 + $0x18] ss:$12 sps:$4 sm:$0xff]  }
0x12ab   : > { %7493 = vmatprep.subr.bf16.mxu1 %v8501_v56 }
0x12ae   : > { %7494 = vmatpush3.bf16.msra.mxu1 %v8502_v0 }
0x12af   : > { %7495 = vmatprep.subr.bf16.mxu1 %v8503_v58 }
0x12b2   : > { %7496 = vmatpush3.bf16.msra.mxu1 %v8504_v59 }
0x12b3   : > { %7497 = vmatprep.subr.bf16.mxu1 %v8505_v63 }
0x12b6   : > { %7498 = vmatpush3.bf16.msra.mxu1 %v8506_v49 }
0x12b7   : > { %7499 = vmatprep.subr.bf16.mxu1 %v8507_v57 }
0x12ba   : > { %7500 = vmatpush3.bf16.msra.mxu1 %v8508_v3  ;;  %v8515_v3 = vld [vmem:[%s11092_s14 + $0x8] ss:$12 sps:$4 sm:$0xff]  }
0x12bb   : > { %7501 = vmatprep.subr.bf16.mxu1 %v8509_v62  ;;  %v8516_v62 = vld [vmem:[%s11092_s14 + $0x20] ss:$12 sps:$4 sm:$0xff]  }
0x12be   : > { %7502 = vmatpush3.bf16.msra.mxu1 %v8510_v4  ;;  %v8517_v4 = vld [vmem:[%s11092_s14 + $0x38] ss:$12 sps:$4 sm:$0xff]  }
0x137c   : > { %v2688_v27 = vpop.f32.mrb[52].mxu1 }
0x137d   : > { %v2694_v31 = vadd.f32 %v2688_v27, %v2538_v50  ;;  %v7861_v32 = vpop.f32.mrb[53].mxu1  ;;  %v8484_v27 = vld [vmem:[%s11092_s14 + $0x48] ss:$12 sps:$4 sm:$0xff]  }
0x137e   : > { %v2691_v33 = vpop.f32.mrb[54].mxu1  ;;  %v8487_v32 = vld [vmem:[%s11092_s14 + $0x60] ss:$12 sps:$4 sm:$0xff]  }
0x137f   : > { %v10199_v34 = vadd.f32 %v8764_v28, %v2694_v31  ;;  %v7862_v60 = vpop.f32.mrb[55].mxu1  ;;  %v8489_v31 = vld [vmem:[%s11092_s14 + $0x64] ss:$12 sps:$4 sm:$0xff]   ;;  %v8492_v33 = vld [vmem:[%s11092_s14 + $0x7c] ss:$12 sps:$4 sm:$0xff]  }
0x1380   : > { %v8490_v28 = vld [vmem:[%s11092_s14 + $0x78] ss:$12 sps:$4 sm:$0xff]  }
0x1381   : > { %v2699_v39 = vmul.f32 %v10199_v34, %v10199_v34 }
0x1383   : > { %2702 = vadd.xlane.f32.xlu1 %v2699_v39  ;;  %v8495_v39 = vld [vmem:[%s11092_s14 + $0x94] ss:$12 sps:$4 sm:$0xff]  }
0x1387   : > { %3066 = vadd.xlane.f32.xlu1 %v3064_v40 }
0x138b   : > { %3068 = vadd.xlane.f32.xlu1 %v3065_v5  ;;  %v8493_v5 = vld [vmem:[%s11092_s14 + $0x90] ss:$12 sps:$4 sm:$0xff]  }
0x1410   : > { %v2703_v8 = vpop.xlane.xlu1 %2702 }
0x1411   : > { %v2705_v30 = vmul.f32 0.0078125, %v2703_v8  ;;  %v8521_v8 = vld [vmem:[%s11092_s14 + $0x98] ss:$12 sps:$4 sm:$0xff]  }
0x1413   : > { %v2707_v50 = vadd.f32 1e-06, %v2705_v30 }
0x1414   : > { %v3067_v11 = vpop.xlane.xlu1 %3066 }
0x1415   : > { %8665 = vrsqrt.f32 %v2707_v50  ;;  %v3070_v17 = vmul.f32 0.0078125, %v3067_v11 }
0x1417   : > { %v3072_v24 = vadd.f32 1e-06, %v3070_v17 }
0x1418   : > { %v3069_v16 = vpop.xlane.xlu1 %3068 }
0x1419   : > { %v3071_v22 = vmul.f32 0.0078125, %v3069_v16  ;;  %8667 = vrsqrt.f32 %v3072_v24 }
0x141b   : > { %v3073_v25 = vadd.f32 1e-06, %v3071_v22 }
0x141d   : > { %8669 = vrsqrt.f32 %v3073_v25 }
0x141f   : > { %v8666_v12 = vpop.eup %8665 }
0x1420   : > { %v2711_v14 = vmul.f32 %v8666_v12, %v10199_v34 }
0x1422   : > { %v2719_v38 = vmul.f32 %v7220_v13, %v2711_v14 }
0x1423   : > { %v8668_v60 = vpop.eup %8667 }
0x1424   : > { %v2720_v10 = vpack.c.bf16 %v2719_v38, %v2718_v15  ;;  %v3076_v42 = vmul.f32 %v8668_v60, %v10202_v35  ;;  %v8511_v35 = vld [vmem:[%s11194_s3 + $0x70] sm:$0xff]  }
0x1425   : > { %7503 = vmatprep.subr.bf16.mxu1 %v8511_v35 }
0x1426   : > { %2850 = vmatmul.mubr.bf16.vlgmr.msra.gmra.mrb[48].mxu0 %v2720_v10  ;;  %v3084_v45 = vmul.f32 %v7254_v43, %v3076_v42 }
0x1427   : > { %3248 = vmatpush1.bf16.msra.mxu0 %v8475_v29  ;;  %3279 = vmatprep.mubr.bf16.mxu0 %v9242_v18  ;;  %v8670_v40 = vpop.eup %8669 }
0x1428   : > { %3249 = vmatprep.subr.bf16.mxu0 %v8480_v54  ;;  %v3077_v46 = vmul.f32 %v8670_v40, %v10209_v2  ;;  %v8512_v2 = vld [vmem:[%s11194_s3 + $0x30] sm:$0xff]  }
0x1429   : > { %7504 = vmatpush3.bf16.msra.mxu1 %v8512_v2 }
0x142a   : > { %v3085_v48 = vmul.f32 %v7254_v43, %v3077_v46  ;;  %7505 = vmatprep.subr.bf16.mxu1 %v8513_v47 }
0x142b   : > { %3250 = vmatpush1.bf16.msra.mxu0 %v8478_v21 }
0x142c   : > { %3251 = vmatprep.subr.bf16.mxu0 %v8483_v23  ;;  %v3086_v51 = vpack.c.bf16 %v3085_v48, %v3084_v45 }
0x142d   : > { %7506 = vmatpush3.bf16.msra.mxu1 %v8514_v52 }
0x142e   : > { %7863 = vmatprep.subr.bf16.mxu1 %v9243_v19 }
0x142f   : > { %3252 = vmatpush1.bf16.msra.mxu0 %v8481_v26 }
0x1430   : > { %3253 = vmatprep.subr.bf16.mxu0 %v8486_v20 }
0x1433   : > { %3254 = vmatpush1.bf16.msra.mxu0 %v8484_v27  ;;  %v10413_v27 = vld [vmem:[#allocation7] sm:$0xff] }
0x1434   : > { %3255 = vmatprep.subr.bf16.mxu0 %v8489_v31 }
0x1437   : > { %3256 = vmatpush1.bf16.msra.mxu0 %v8487_v32 }
0x1438   : > { %3257 = vmatprep.subr.bf16.mxu0 %v8492_v33 }
0x143b   : > { %3258 = vmatpush1.bf16.msra.mxu0 %v8490_v28 }
0x143c   : > { %3259 = vmatprep.subr.bf16.mxu0 %v8495_v39 }
0x143f   : > { %3260 = vmatpush1.bf16.msra.mxu0 %v8493_v5  ;;  %v10420_v5 = vld [vmem:[#allocation7 + $0x8] sm:$0xff] }
0x1440   : > { %3261 = vmatprep.subr.bf16.mxu0 %v8498_v41 }
0x1443   : > { %3262 = vmatpush1.bf16.msra.mxu0 %v8496_v44 }
0x1444   : > { %7883 = vmatprep.subr.bf16.mxu0 %v9243_v19 }
0x1446   : > { %3280 = vmatmul.mubr.bf16.vlgmr.msra.gmra.mrb[52].mxu0 %v3086_v51 }
0x1447   : > { %7885 = vmatprep.mubr.msk.bf16.mxu0 %vm9244_vm0, %v9243_v19 }
0x14f9   : > { %v2851_v53 = vpop.f32.mrb[48].mxu0 }
0x14fa   : > { %v2853_v61 = vpop.f32.mrb[49].mxu0  ;;  %v2860_v56 = vmax.f32 %v2851_v53, 0.0 }
0x14fb   : > { %v2855_v55 = vpop.f32.mrb[50].mxu0  ;;  %v2861_v59 = vmax.f32 %v2853_v61, 0.0 }
0x14fc   : > { %v2862_v0 = vmax.f32 %v2855_v55, 0.0  ;;  %v2857_v58 = vpop.f32.mrb[51].mxu0 }
0x14fd   : > { %v2863_v63 = vmax.f32 %v2857_v58, 0.0 }
0x14fe   : > { %v2864_v49 = vpack.c.bf16 %v2862_v0, %v2860_v56 }
0x14ff   : > { %v2865_v57 = vpack.c.bf16 %v2863_v63, %v2861_v59 }
0x1501   : > { %3026 = vmatprep.mubr.bf16.mxu1 %v2865_v57  ;;  %v10438_v57 = vld [vmem:[#allocation8 + $0x18] sm:$0xff]  }
0x1502   : > { %3027 = vmatmul.mubr.bf16.vlgmr.msra.gmra.mrb[56].mxu1 %v2864_v49  ;;  %v10435_v49 = vld [vmem:[#allocation8 + $0x10] sm:$0xff]  }
0x1503   : > { %7864 = vmatpush3.bf16.msra.mxu1 %v8515_v3  ;;  %7879 = vmatprep.mubr.msk.bf16.mxu1 %vm9244_vm0, %v9243_v19 }
0x1504   : > { %7865 = vmatprep.subr.bf16.mxu1 %v9243_v19 }
0x1507   : > { %7866 = vmatpush3.bf16.msra.mxu1 %v8516_v62 }
0x1508   : > { %7867 = vmatprep.subr.bf16.mxu1 %v9243_v19 }
0x150b   : > { %7868 = vmatpush3.bf16.msra.mxu1 %v8517_v4 }
0x150c   : > { %7869 = vmatprep.subr.bf16.mxu1 %v9243_v19 }
0x150f   : > { %7870 = vmatpush3.bf16.msra.mxu1 %v8518_v6 }
0x1510   : > { %7871 = vmatprep.subr.bf16.mxu1 %v9243_v19 }
0x1513   : > { %7872 = vmatpush3.bf16.msra.mxu1 %v8519_v7 }
0x1514   : > { %7873 = vmatprep.subr.bf16.mxu1 %v9243_v19 }
0x1517   : > { %7874 = vmatpush3.bf16.msra.mxu1 %v8520_v37  ;;  %v10445_v37 = vld [vmem:[#allocation8] sm:$0xff]  }
0x1518   : > { %7875 = vmatprep.subr.bf16.mxu1 %v9243_v19 }
0x1519   : > { %v3281_v30 = vpop.f32.mrb[52].mxu0 }
0x151a   : > { %v3283_v50 = vpop.f32.mrb[53].mxu0 }
0x151b   : > { %v3285_v9 = vpop.f32.mrb[54].mxu0  ;;  %7876 = vmatpush3.bf16.msra.mxu1 %v8521_v8 }
0x151c   : > { %v10383_v11 = vpack.c.bf16 %v3285_v9, %v3281_v30  ;;  %v3287_v12 = vpop.f32.mrb[55].mxu0  ;;  %7877 = vmatprep.subr.bf16.mxu1 %v9243_v19  ;;  %v10449_v30 = vld [vmem:[#allocation8 + $0x8] sm:$0xff]  }
0x151d   : > { %v10386_v13 = vpack.c.bf16 %v3287_v12, %v3283_v50 }
0x151e   : > { %3460 = vrot.lane.b32.xlu0 %v10383_v11, %s9245_s7 }
0x151f   : > { %3463 = vrot.lane.b32.xlu1 %v10386_v13, %s9245_s7  ;;  %7878 = vmatpush3.bf16.msra.mxu1 %v8522_v36  ;;  %v3358_v14 = vsel %vm1394_vm1, %v10386_v13, 0 }
0x1520   : > { %7884 = vmatpush3.bf16.xpose.msra.mxu0 %v3358_v14  ;;  %7889 = vmatprep.subr.bf16.mxu1 %v9243_v19 }
0x1521   : > { %7895 = vmatprep.subr.bf16.mxu0 %v9243_v19 }
0x1522   : > { %7880 = vmatmul.mubr.bf16.vlgmr.msra.gmra.mrb[60].mxu1 %v3086_v51 }
0x1523   : > { %7891 = vmatprep.mubr.msk.bf16.mxu1 %vm9244_vm0, %v9243_v19 }
0x1527   : > { %7886 = vmatmul.mubr.msk.bf16.vlgmr.msra.gmra.mrb[56].mxu0 %vm1394_vm1, %v10383_v11 }
0x1528   : > { %7897 = vmatprep.mubr.msk.bf16.mxu0 %vm9244_vm0, %v9243_v19 }
0x1590   : > { %v3461_v29 = vpop.permute.xlu0 %3460 }
0x1591   : > { %v3464_v15 = vpop.permute.xlu1 %3463 }
0x1592   : > { %v3469_v38 = vsel %vm1394_vm1, %v3464_v15, 0 }
0x1593   : > { %7896 = vmatpush3.bf16.xpose.msra.mxu0 %v3469_v38 }
0x1594   : > { %7907 = vmatprep.subr.bf16.mxu0 %v9243_v19 }
0x159a   : > { %7898 = vmatmul.mubr.msk.bf16.vlgmr.msra.gmra.mrb[60].mxu0 %vm1394_vm1, %v3461_v29 }
0x159b   : > { %7911 = vmatprep.mubr.msk.bf16.mxu0 %vm9244_vm0, %v9243_v19  ;;  %7908 = vmatpush3.bf16.msra.mxu0 %v10435_v49 }
0x159c   : > { %7909 = vmatprep.subr.bf16.mxu0 %v9243_v19 }
0x159f   : > { %7910 = vmatpush3.bf16.msra.mxu0 %v10438_v57 }
0x15a0   : > { %7923 = vmatprep.subr.bf16.mxu0 %v9243_v19 }
0x15d5   : > { %v7507_v10 = vpop.f32.mrb[56].mxu1 }
0x15d6   : > { %v7508_v54 = vpop.f32.mrb[57].mxu1 }
0x15d7   : > { %v10407_v16 = vadd.f32 %v7508_v54, %v7507_v10  ;;  %v7510_v17 = vpop.f32.mrb[58].mxu1 }
0x15d8   : > { %v7511_v21 = vpop.f32.mrb[59].mxu1 }
0x15d9   : > { %v10409_v22 = vadd.f32 %v7511_v21, %v7510_v17 }
0x15f5   : > { %v3324_v23 = vpop.f32.mrb[60].mxu1 }
0x15f6   : > { %v7881_v24 = vpop.f32.mrb[61].mxu1 }
0x15f7   : > { %v3327_v25 = vpop.f32.mrb[62].mxu1 }
0x15f8   : > { %v10411_v26 = vpack.c.bf16 %v3327_v25, %v3324_v23  ;;  %v7882_v20 = vpop.f32.mrb[63].mxu1 }
0x15fa   : > { %v3394_v31 = vpop.f32.mrb[56].mxu0  ;;  %v3416_v32 = vsel %vm1464_vm2, %v10411_v26, 0 }
0x15fb   : > { %v3395_v33 = vadd.f32 %v3394_v31, %v10413_v27  ;;  %v7887_v28 = vpop.f32.mrb[57].mxu0  ;;  %7890 = vmatpush3.bf16.msra.mxu1 %v3416_v32 }
0x15fc   : > { %v3397_v60 = vpop.f32.mrb[58].mxu0  ;;  %7901 = vmatprep.subr.bf16.mxu1 %v9243_v19 }
0x15fd   : > { %v7888_v39 = vpop.f32.mrb[59].mxu0  ;;  %v3400_v40 = vsel %vm1448_vm3, %v3395_v33, -inf }
0x15fe   : > { %3401 = vmax.xlane.f32.xlu0 %v3400_v40  ;;  %v10469_v40 = vld [vmem:[#allocation7 + $0x10] sm:$0xff] }
0x166d   : > { %v3505_v41 = vpop.f32.mrb[60].mxu0 }
0x166e   : > { %v3506_v42 = vadd.f32 %v3505_v41, %v10420_v5  ;;  %v7899_v46 = vpop.f32.mrb[61].mxu0 }
0x166f   : > { %v3508_v43 = vpop.f32.mrb[62].mxu0 }
0x1670   : > { %v7900_v44 = vpop.f32.mrb[63].mxu0  ;;  %v3511_v45 = vsel %vm1448_vm3, %v3506_v42, -inf }
0x1671   : > { %3512 = vmax.xlane.f32.xlu1 %v3511_v45 }
0x1682   : > { %3685 = vrot.lane.b32.xlu1 %v10386_v13, %s11196_s6 }
0x168b   : > { %v3402_v48 = vpop.xlane.xlu0 %3401 }
0x168c   : > { %v3403_v51 = vsub.f32 %v3395_v33, %v3402_v48 }
0x168e   : > { %v3404_v35 = vmul.f32 1.442695, %v3403_v51 }
0x1690   : > { %8671 = vpow2.f32 %v3404_v35 }
0x169a   : > { %v8672_v2 = vpop.eup %8671 }
0x169b   : > { %v3406_v47 = vsel %vm1448_vm3, %v8672_v2, 0.0 }
0x169c   : > { %3407 = vadd.xlane.f32.xlu0 %v3406_v47 }
0x16fe   : > { %v3513_v52 = vpop.xlane.xlu1 %3512 }
0x16ff   : > { %v3514_v53 = vsub.f32 %v3506_v42, %v3513_v52  ;;  %v10480_v52 = vld [vmem:[#allocation8 + $0x20] sm:$0xff]  }
0x1701   : > { %v3515_v61 = vmul.f32 1.442695, %v3514_v53 }
0x1702   : > { %v3686_v15 = vpop.permute.xlu1 %3685 }
0x1703   : > { %8673 = vpow2.f32 %v3515_v61  ;;  %v3691_v17 = vsel %vm1394_vm1, %v3686_v15, 0 }
0x170d   : > { %v8674_v55 = vpop.eup %8673 }
0x170e   : > { %v3517_v56 = vsel %vm1448_vm3, %v8674_v55, 0.0 }
0x170f   : > { %3518 = vadd.xlane.f32.xlu0 %v3517_v56 }
0x1725   : > { %3524 = vrot.lane.b32.xlu0 %v10411_v26, %s9245_s7 }
0x1729   : > { %v3408_v0 = vpop.xlane.xlu0 %3407  ;;  %3683 = vrot.lane.b32.xlu0 %v10383_v11, %s11196_s6 }
0x172a   : > { %8675 = vrcp.f32 %v3408_v0 }
0x1734   : > { %v8676_v58 = vpop.eup %8675 }
0x1735   : > { %v3410_v59 = vmul.f32 %v8676_v58, %v8672_v2 }
0x1737   : > { %v3411_v63 = vpack.c.bf16 %v3410_v59, %v3410_v59 }
0x1739   : > { %7892 = vmatmul.mubr.msk.bf16.vlgmr.msra.gmra.mrb[64].mxu1 %vm1448_vm3, %v3411_v63 }
0x173a   : > { %7903 = vmatprep.mubr.msk.bf16.mxu1 %vm9244_vm0, %v9243_v19 }
0x179c   : > { %v3519_v3 = vpop.xlane.xlu0 %3518 }
0x179d   : > { %8677 = vrcp.f32 %v3519_v3 }
0x17a0   : > { %v3525_v62 = vpop.permute.xlu0 %3524 }
0x17a1   : > { %v3530_v4 = vsel %vm1464_vm2, %v3525_v62, 0  ;;  %v10494_v62 = vld [vmem:[#allocation8 + $0x28] sm:$0xff]  }
0x17a2   : > { %7902 = vmatpush3.bf16.msra.mxu1 %v3530_v4 }
0x17a3   : > { %7915 = vmatprep.subr.bf16.mxu1 %v9243_v19 }
0x17a4   : > { %v3684_v23 = vpop.permute.xlu0 %3683 }
0x17a7   : > { %v8678_v6 = vpop.eup %8677 }
0x17a8   : > { %v3521_v7 = vmul.f32 %v8678_v6, %v8674_v55 }
0x17aa   : > { %v3522_v8 = vpack.c.bf16 %v3521_v7, %v3521_v7 }
0x17ac   : > { %7904 = vmatmul.mubr.msk.bf16.vlgmr.msra.gmra.mrb[68].mxu1 %vm1448_vm3, %v3522_v8 }
0x17ad   : > { %7916 = vmatpush3.bf16.msra.mxu1 %v10445_v37  ;;  %7919 = vmatprep.mubr.msk.bf16.mxu1 %vm9244_vm0, %v9243_v19 }
0x17ae   : > { %7917 = vmatprep.subr.bf16.mxu1 %v9243_v19 }
0x17b1   : > { %7918 = vmatpush3.bf16.msra.mxu1 %v10449_v30 }
0x17b2   : > { %7929 = vmatprep.subr.bf16.mxu1 %v9243_v19 }
0x180c   : > { %v3452_v50 = vpop.f32.mrb[64].mxu1 }
0x180d   : > { %v3458_v9 = vpack.c.bf16 %v3452_v50, %v3452_v50  ;;  %v7893_v36 = vpop.f32.mrb[65].mxu1 }
0x180e   : > { %v3455_v12 = vpop.f32.mrb[66].mxu1 }
0x180f   : > { %v7894_v14 = vpop.f32.mrb[67].mxu1  ;;  %7920 = vmatmul.mubr.msk.bf16.vlgmr.msra.gmra.mrb[72].mxu1 %vm1394_vm1, %v3458_v9  ;;  %v10501_v9 = vld [vmem:[#allocation7 + $0x18] sm:$0xff] }
0x1810   : > { %7931 = vmatprep.mubr.msk.bf16.mxu1 %vm9244_vm0, %v9243_v19 }
0x187f   : > { %v3566_v38 = vpop.f32.mrb[68].mxu1 }
0x1880   : > { %v3572_v29 = vpack.c.bf16 %v3566_v38, %v3566_v38  ;;  %v7905_v10 = vpop.f32.mrb[69].mxu1 }
0x1881   : > { %v3569_v54 = vpop.f32.mrb[70].mxu1  ;;  %v10508_v10 = vrot.slane %v10383_v11, 4 }
0x1882   : > { %v7906_v21 = vpop.f32.mrb[71].mxu1  ;;  %7912 = vmatmul.mubr.msk.bf16.vlgmr.msra.gmra.mrb[64].mxu0 %vm1394_vm1, %v3572_v29 }
0x1883   : > { %7924 = vmatpush3.bf16.xpose.msra.mxu0 %v3691_v17  ;;  %7925 = vmatprep.mubr.msk.bf16.mxu0 %vm9244_vm0, %v9243_v19 }
0x1884   : > { %7935 = vmatprep.subr.bf16.mxu0 %v9243_v19 }
0x188a   : > { %7926 = vmatmul.mubr.msk.bf16.vlgmr.msra.gmra.mrb[68].mxu0 %vm1394_vm1, %v3684_v23 }
0x188b   : > { %7939 = vmatprep.mubr.msk.bf16.mxu0 %vm9244_vm0, %v9243_v19  ;;  %7936 = vmatpush3.bf16.msra.mxu0 %v10480_v52 }
0x188c   : > { %7937 = vmatprep.subr.bf16.mxu0 %v9243_v19 }
0x188f   : > { %7938 = vmatpush3.bf16.msra.mxu0 %v10494_v62 }
0x1890   : > { %7949 = vmatprep.subr.bf16.mxu0 %v9243_v19 }
0x18e2   : > { %v3677_v24 = vpop.f32.mrb[72].mxu1 }
0x18e3   : > { %v7921_v25 = vpop.f32.mrb[73].mxu1 }
0x18e4   : > { %v3680_v20 = vpop.f32.mrb[74].mxu1 }
0x18e5   : > { %v7922_v31 = vpop.f32.mrb[75].mxu1 }
0x1955   : > { %v3622_v32 = vpop.f32.mrb[64].mxu0 }
0x1956   : > { %v10467_v33 = vadd.f32 %v3677_v24, %v3622_v32  ;;  %v7913_v28 = vpop.f32.mrb[65].mxu0 }
0x1957   : > { %v3625_v60 = vpop.f32.mrb[66].mxu0 }
0x1958   : > { %v7914_v39 = vpop.f32.mrb[67].mxu0  ;;  %v10523_v60 = vld [vmem:[#allocation8 + $0x30] sm:$0xff]  }
0x195d   : > { %v3727_v41 = vpop.f32.mrb[68].mxu0 }
0x195e   : > { %v3728_v42 = vadd.f32 %v3727_v41, %v10469_v40  ;;  %v7927_v46 = vpop.f32.mrb[69].mxu0 }
0x195f   : > { %v3730_v43 = vpop.f32.mrb[70].mxu0 }
0x1960   : > { %v7928_v44 = vpop.f32.mrb[71].mxu0  ;;  %v3733_v45 = vsel %vm1448_vm3, %v3728_v42, -inf }
0x1961   : > { %3734 = vmax.xlane.f32.xlu1 %v3733_v45 }
0x1972   : > { %3852 = vrot.lane.b32.xlu1 %v10386_v13, %s11197_s11 }
0x1976   : > { %3850 = vrot.lane.b32.xlu1 %v10383_v11, %s11197_s11  ;;  %v10516_v11 = vrot.slane %v10386_v13, 4 }
0x1978   : > { %v4023_v44 = vsel %vm1394_vm1, %v10516_v11, 0 }
0x19ee   : > { %v3735_v48 = vpop.xlane.xlu1 %3734 }
0x19ef   : > { %v3736_v51 = vsub.f32 %v3728_v42, %v3735_v48  ;;  %v10526_v42 = vld [vmem:[#allocation8 + $0x38] sm:$0xff]  }
0x19f1   : > { %v3737_v35 = vmul.f32 1.442695, %v3736_v51 }
0x19f2   : > { %v3853_v58 = vpop.permute.xlu1 %3852 }
0x19f3   : > { %8679 = vpow2.f32 %v3737_v35  ;;  %v3858_v63 = vsel %vm1394_vm1, %v3853_v58, 0  ;;  %v10551_v35 = vrot.slane %v10411_v26, 4 }
0x19f6   : > { %v3851_v3 = vpop.permute.xlu1 %3850 }
0x19fd   : > { %v8680_v2 = vpop.eup %8679 }
0x19fe   : > { %v3739_v47 = vsel %vm1448_vm3, %v8680_v2, 0.0 }
0x19ff   : > { %3740 = vadd.xlane.f32.xlu0 %v3739_v47 }
0x1a15   : > { %3745 = vrot.lane.b32.xlu0 %v10411_v26, %s11196_s6 }
0x1a8c   : > { %v3741_v53 = vpop.xlane.xlu0 %3740 }
0x1a8d   : > { %8681 = vrcp.f32 %v3741_v53 }
0x1a90   : > { %v3746_v61 = vpop.permute.xlu0 %3745 }
0x1a91   : > { %v3751_v55 = vsel %vm1464_vm2, %v3746_v61, 0 }
0x1a92   : > { %7930 = vmatpush3.bf16.msra.mxu1 %v3751_v55 }
0x1a93   : > { %7943 = vmatprep.subr.bf16.mxu1 %v9243_v19 }
0x1a97   : > { %v8682_v56 = vpop.eup %8681 }
0x1a98   : > { %v3743_v0 = vmul.f32 %v8682_v56, %v8680_v2 }
0x1a9a   : > { %v3744_v59 = vpack.c.bf16 %v3743_v0, %v3743_v0 }
0x1a9c   : > { %7932 = vmatmul.mubr.msk.bf16.vlgmr.msra.gmra.mrb[76].mxu1 %vm1448_vm3, %v3744_v59 }
0x1a9d   : > { %7944 = vmatpush3.bf16.xpose.msra.mxu1 %v3858_v63  ;;  %7945 = vmatprep.mubr.msk.bf16.mxu1 %vm9244_vm0, %v9243_v19 }
0x1a9e   : > { %7955 = vmatprep.subr.bf16.mxu1 %v9243_v19 }
0x1aa4   : > { %7946 = vmatmul.mubr.msk.bf16.vlgmr.msra.gmra.mrb[80].mxu1 %vm1394_vm1, %v3851_v3 }
0x1aa5   : > { %7959 = vmatprep.mubr.msk.bf16.mxu1 %vm9244_vm0, %v9243_v19  ;;  %7956 = vmatpush3.bf16.msra.mxu1 %v10523_v60 }
0x1aa6   : > { %7957 = vmatprep.subr.bf16.mxu1 %v9243_v19 }
0x1aa9   : > { %7958 = vmatpush3.bf16.msra.mxu1 %v10526_v42 }
0x1aaa   : > { %7969 = vmatprep.subr.bf16.mxu1 %v9243_v19 }
0x1b6f   : > { %v3787_v4 = vpop.f32.mrb[76].mxu1 }
0x1b70   : > { %v3793_v6 = vpack.c.bf16 %v3787_v4, %v3787_v4  ;;  %v7933_v7 = vpop.f32.mrb[77].mxu1 }
0x1b71   : > { %v3790_v8 = vpop.f32.mrb[78].mxu1 }
0x1b72   : > { %v7934_v50 = vpop.f32.mrb[79].mxu1  ;;  %7940 = vmatmul.mubr.msk.bf16.vlgmr.msra.gmra.mrb[72].mxu0 %vm1394_vm1, %v3793_v6 }
0x1b73   : > { %7951 = vmatprep.mubr.msk.bf16.mxu0 %vm9244_vm0, %v9243_v19 }
0x1b77   : > { %v3894_v36 = vpop.f32.mrb[80].mxu1 }
0x1b78   : > { %v3895_v12 = vadd.f32 %v3894_v36, %v10501_v9  ;;  %v7947_v14 = vpop.f32.mrb[81].mxu1 }
0x1b79   : > { %v3897_v15 = vpop.f32.mrb[82].mxu1 }
0x1b7a   : > { %v7948_v38 = vpop.f32.mrb[83].mxu1  ;;  %v3900_v29 = vsel %vm1448_vm3, %v3895_v12, -inf }
0x1b7b   : > { %3901 = vmax.xlane.f32.xlu0 %v3900_v29 }
0x1b91   : > { %3912 = vrot.lane.b32.xlu0 %v10411_v26, %s11197_s11 }
0x1b95   : > { %4125 = vrot.lane.b32.xlu0 %v10508_v10, %s9245_s7 }
0x1c08   : > { %v3902_v54 = vpop.xlane.xlu0 %3901 }
0x1c09   : > { %v3903_v17 = vsub.f32 %v3895_v12, %v3902_v54 }
0x1c0b   : > { %v3904_v21 = vmul.f32 1.442695, %v3903_v17 }
0x1c0c   : > { %v3913_v23 = vpop.permute.xlu0 %3912 }
0x1c0d   : > { %8683 = vpow2.f32 %v3904_v21  ;;  %v3918_v24 = vsel %vm1464_vm2, %v3913_v23, 0 }
0x1c0e   : > { %7950 = vmatpush3.bf16.msra.mxu0 %v3918_v24 }
0x1c0f   : > { %7963 = vmatprep.subr.bf16.mxu0 %v9243_v19 }
0x1c10   : > { %v4126_v51 = vpop.permute.xlu0 %4125 }
0x1c17   : > { %v8684_v25 = vpop.eup %8683 }
0x1c18   : > { %v3906_v20 = vsel %vm1448_vm3, %v8684_v25, 0.0 }
0x1c19   : > { %3907 = vadd.xlane.f32.xlu1 %v3906_v20 }
0x1c2a   : > { %4127 = vrot.lane.b32.xlu1 %v10516_v11, %s9245_s7 }
0x1c45   : > { %v3843_v31 = vpop.f32.mrb[72].mxu0 }
0x1c46   : > { %v10521_v32 = vadd.f32 %v3843_v31, %v10467_v33  ;;  %v7941_v28 = vpop.f32.mrb[73].mxu0 }
0x1c47   : > { %v3846_v39 = vpop.f32.mrb[74].mxu0 }
0x1c48   : > { %v7942_v41 = vpop.f32.mrb[75].mxu0 }
0x1ca6   : > { %v3908_v13 = vpop.xlane.xlu1 %3907 }
0x1ca7   : > { %8685 = vrcp.f32 %v3908_v13 }
0x1caa   : > { %v4128_v45 = vpop.permute.xlu1 %4127 }
0x1cab   : > { %v4133_v48 = vsel %vm1394_vm1, %v4128_v45, 0 }
0x1cb1   : > { %v8686_v46 = vpop.eup %8685 }
0x1cb2   : > { %v3910_v33 = vmul.f32 %v8686_v46, %v8684_v25 }
0x1cb4   : > { %v3911_v43 = vpack.c.bf16 %v3910_v33, %v3910_v33 }
0x1cb6   : > { %7952 = vmatmul.mubr.msk.bf16.vlgmr.msra.gmra.mrb[76].mxu0 %vm1448_vm3, %v3911_v43 }
0x1cb7   : > { %7964 = vmatpush3.bf16.xpose.msra.mxu0 %v4023_v44  ;;  %7965 = vmatprep.mubr.msk.bf16.mxu0 %vm9244_vm0, %v9243_v19 }
0x1cb8   : > { %7975 = vmatprep.subr.bf16.mxu0 %v9243_v19 }
0x1cbe   : > { %7966 = vmatmul.mubr.msk.bf16.vlgmr.msra.gmra.mrb[80].mxu0 %vm1394_vm1, %v10508_v10 }
0x1cbf   : > { %7976 = vmatpush3.bf16.xpose.msra.mxu0 %v4133_v48  ;;  %7977 = vmatprep.mubr.msk.bf16.mxu0 %vm9244_vm0, %v9243_v19 }
0x1cc0   : > { %7987 = vmatprep.subr.bf16.mxu0 %v9243_v19 }
0x1cc6   : > { %7978 = vmatmul.mubr.msk.bf16.vlgmr.msra.gmra.mrb[84].mxu0 %vm1394_vm1, %v4126_v51 }
0x1cc7   : > { %7988 = vmatpush3.bf16.msra.mxu0 %v10435_v49  ;;  %7991 = vmatprep.mubr.msk.bf16.mxu0 %vm9244_vm0, %v9243_v19  ;;  %v4082_v49 = vsel %vm1464_vm2, %v10551_v35, 0 }
0x1cc8   : > { %7989 = vmatprep.subr.bf16.mxu0 %v9243_v19 }
0x1ccb   : > { %7990 = vmatpush3.bf16.msra.mxu0 %v10438_v57 }
0x1ccc   : > { %8003 = vmatprep.subr.bf16.mxu0 %v9243_v19 }
0x1d89   : > { %v3954_v2 = vpop.f32.mrb[76].mxu0 }
0x1d8a   : > { %v3960_v47 = vpack.c.bf16 %v3954_v2, %v3954_v2  ;;  %v7953_v53 = vpop.f32.mrb[77].mxu0 }
0x1d8b   : > { %v3957_v61 = vpop.f32.mrb[78].mxu0 }
0x1d8c   : > { %v7954_v55 = vpop.f32.mrb[79].mxu0  ;;  %7960 = vmatmul.mubr.msk.bf16.vlgmr.msra.gmra.mrb[84].mxu1 %vm1394_vm1, %v3960_v47 }
0x1d8d   : > { %7970 = vmatpush3.bf16.msra.mxu1 %v4082_v49  ;;  %7971 = vmatprep.mubr.msk.bf16.mxu1 %vm9244_vm0, %v9243_v19 }
0x1d8e   : > { %7981 = vmatprep.subr.bf16.mxu1 %v9243_v19 }
0x1d91   : > { %v4059_v57 = vpop.f32.mrb[80].mxu0 }
0x1d92   : > { %v4060_v26 = vadd.f32 %v4059_v57, %v10413_v27  ;;  %v7967_v56 = vpop.f32.mrb[81].mxu0 }
0x1d93   : > { %v4062_v0 = vpop.f32.mrb[82].mxu0 }
0x1d94   : > { %v7968_v58 = vpop.f32.mrb[83].mxu0  ;;  %v4065_v59 = vsel %vm1448_vm3, %v4060_v26, -inf }
0x1d95   : > { %4066 = vmax.xlane.f32.xlu1 %v4065_v59 }
0x1d99   : > { %v4169_v63 = vpop.f32.mrb[84].mxu0 }
0x1d9a   : > { %v4170_v3 = vadd.f32 %v4169_v63, %v10420_v5  ;;  %v7979_v4 = vpop.f32.mrb[85].mxu0 }
0x1d9b   : > { %v4172_v6 = vpop.f32.mrb[86].mxu0 }
0x1d9c   : > { %v7980_v7 = vpop.f32.mrb[87].mxu0  ;;  %v4175_v8 = vsel %vm1448_vm3, %v4170_v3, -inf }
0x1d9d   : > { %4176 = vmax.xlane.f32.xlu0 %v4175_v8 }
0x1da6   : > { %4187 = vrot.lane.b32.xlu1 %v10551_v35, %s9245_s7 }
0x1daa   : > { %4322 = vrot.lane.b32.xlu1 %v10508_v10, %s11196_s6 }
0x1e22   : > { %v4067_v27 = vpop.xlane.xlu1 %4066 }
0x1e23   : > { %v4068_v50 = vsub.f32 %v4060_v26, %v4067_v27 }
0x1e25   : > { %v4069_v36 = vmul.f32 1.442695, %v4068_v50 }
0x1e26   : > { %v4188_v41 = vpop.permute.xlu1 %4187 }
0x1e27   : > { %8687 = vpow2.f32 %v4069_v36  ;;  %v4193_v46 = vsel %vm1464_vm2, %v4188_v41, 0 }
0x1e2a   : > { %v4177_v12 = vpop.xlane.xlu0 %4176  ;;  %v4323_v57 = vpop.permute.xlu1 %4322 }
0x1e2b   : > { %v4178_v14 = vsub.f32 %v4170_v3, %v4177_v12 }
0x1e2d   : > { %v4179_v15 = vmul.f32 1.442695, %v4178_v14 }
0x1e2f   : > { %8689 = vpow2.f32 %v4179_v15 }
0x1e31   : > { %v8688_v5 = vpop.eup %8687 }
0x1e32   : > { %v4071_v38 = vsel %vm1448_vm3, %v8688_v5, 0.0 }
0x1e33   : > { %4072 = vadd.xlane.f32.xlu0 %v4071_v38 }
0x1e39   : > { %v8690_v29 = vpop.eup %8689 }
0x1e3a   : > { %v4181_v54 = vsel %vm1448_vm3, %v8690_v29, 0.0 }
0x1e3b   : > { %4182 = vadd.xlane.f32.xlu0 %v4181_v54 }
0x1e51   : > { %4324 = vrot.lane.b32.xlu0 %v10516_v11, %s11196_s6 }
0x1e5f   : > { %v4010_v17 = vpop.f32.mrb[84].mxu1 }
0x1e60   : > { %v10572_v21 = vadd.f32 %v4010_v17, %v10521_v32  ;;  %v7961_v23 = vpop.f32.mrb[85].mxu1 }
0x1e61   : > { %v4013_v24 = vpop.f32.mrb[86].mxu1 }
0x1e62   : > { %v7962_v25 = vpop.f32.mrb[87].mxu1 }
0x1ec0   : > { %v4073_v20 = vpop.xlane.xlu0 %4072 }
0x1ec1   : > { %8691 = vrcp.f32 %v4073_v20 }
0x1ec8   : > { %v4183_v31 = vpop.xlane.xlu0 %4182 }
0x1ec9   : > { %8693 = vrcp.f32 %v4183_v31 }
0x1ecb   : > { %v8692_v28 = vpop.eup %8691 }
0x1ecc   : > { %v4075_v39 = vmul.f32 %v8692_v28, %v8688_v5 }
0x1ece   : > { %v4076_v13 = vpack.c.bf16 %v4075_v39, %v4075_v39 }
0x1ed0   : > { %7972 = vmatmul.mubr.msk.bf16.vlgmr.msra.gmra.mrb[88].mxu1 %vm1448_vm3, %v4076_v13 }
0x1ed1   : > { %7982 = vmatpush3.bf16.msra.mxu1 %v4193_v46  ;;  %7983 = vmatprep.mubr.msk.bf16.mxu1 %vm9244_vm0, %v9243_v19  ;;  %v10631_v46 = vadd.f32 %v10407_v16, %v10161_v1 }
0x1ed2   : > { %7995 = vmatprep.subr.bf16.mxu1 %v9243_v19 }
0x1ed3   : > { %v8694_v32 = vpop.eup %8693 }
0x1ed4   : > { %v4185_v33 = vmul.f32 %v8694_v32, %v8690_v29 }
0x1ed6   : > { %v4186_v43 = vpack.c.bf16 %v4185_v33, %v4185_v33 }
0x1ed8   : > { %7984 = vmatmul.mubr.msk.bf16.vlgmr.msra.gmra.mrb[92].mxu1 %vm1448_vm3, %v4186_v43  ;;  %v10636_v43 = vadd.f32 %v10409_v22, %v10199_v34 }
0x1ed9   : > { %7996 = vmatpush3.bf16.msra.mxu1 %v10445_v37  ;;  %7999 = vmatprep.mubr.msk.bf16.mxu1 %vm9244_vm0, %v9243_v19  ;;  %v4325_v37 = vpop.permute.xlu0 %4324 }
0x1eda   : > { %7997 = vmatprep.subr.bf16.mxu1 %v9243_v19  ;;  %v4330_v49 = vsel %vm1394_vm1, %v4325_v37, 0  ;;  %v3039_v1 = vmul.f32 %v10636_v43, %v10636_v43 }
0x1edd   : > { %7998 = vmatpush3.bf16.msra.mxu1 %v10449_v30 }
0x1ede   : > { %8009 = vmatprep.subr.bf16.mxu1 %v9243_v19 }
0x1fa3   : > { %v4118_v44 = vpop.f32.mrb[88].mxu1 }
0x1fa4   : > { %v4124_v45 = vpack.c.bf16 %v4118_v44, %v4118_v44  ;;  %v7973_v48 = vpop.f32.mrb[89].mxu1  ;;  %v3038_v44 = vmul.f32 %v10631_v46, %v10631_v46 }
0x1fa5   : > { %v4121_v51 = vpop.f32.mrb[90].mxu1 }
0x1fa6   : > { %v7974_v2 = vpop.f32.mrb[91].mxu1  ;;  %8000 = vmatmul.mubr.msk.bf16.vlgmr.msra.gmra.mrb[96].mxu1 %vm1394_vm1, %v4124_v45  ;;  %v8765_v45 = vld [vmem:[%s10196_s8] sm:$0xff] }
0x1fa7   : > { %8011 = vmatprep.mubr.msk.bf16.mxu1 %vm9244_vm0, %v9243_v19 }
0x1fab   : > { %v4229_v47 = vpop.f32.mrb[92].mxu1 }
0x1fac   : > { %v4235_v53 = vpack.c.bf16 %v4229_v47, %v4229_v47  ;;  %v7985_v61 = vpop.f32.mrb[93].mxu1 }
0x1fad   : > { %v4232_v55 = vpop.f32.mrb[94].mxu1 }
0x1fae   : > { %v7986_v30 = vpop.f32.mrb[95].mxu1  ;;  %7992 = vmatmul.mubr.msk.bf16.vlgmr.msra.gmra.mrb[88].mxu0 %vm1394_vm1, %v4235_v53 }
0x1faf   : > { %8004 = vmatpush3.bf16.xpose.msra.mxu0 %v4330_v49  ;;  %8005 = vmatprep.mubr.msk.bf16.mxu0 %vm9244_vm0, %v9243_v19 }
0x1fb0   : > { %8015 = vmatprep.subr.bf16.mxu0 %v9243_v19 }
0x1fb6   : > { %8006 = vmatmul.mubr.msk.bf16.vlgmr.msra.gmra.mrb[92].mxu0 %vm1394_vm1, %v4323_v57 }
0x1fb7   : > { %8016 = vmatpush3.bf16.msra.mxu0 %v10480_v52  ;;  %8019 = vmatprep.mubr.msk.bf16.mxu0 %vm9244_vm0, %v9243_v19 }
0x1fb8   : > { %8017 = vmatprep.subr.bf16.mxu0 %v9243_v19 }
0x1fbb   : > { %8018 = vmatpush3.bf16.msra.mxu0 %v10494_v62 }
0x1fbc   : > { %8029 = vmatprep.subr.bf16.mxu0 %v9243_v19 }
0x2079   : > { %v4316_v26 = vpop.f32.mrb[96].mxu1 }
0x207a   : > { %v8001_v56 = vpop.f32.mrb[97].mxu1 }
0x207b   : > { %v4319_v0 = vpop.f32.mrb[98].mxu1 }
0x207c   : > { %v8002_v58 = vpop.f32.mrb[99].mxu1 }
0x2081   : > { %v4273_v59 = vpop.f32.mrb[88].mxu0 }
0x2082   : > { %v10601_v63 = vadd.f32 %v4316_v26, %v4273_v59  ;;  %v7993_v3 = vpop.f32.mrb[89].mxu0  ;;  %v8531_v59 = vld [vmem:[#allocation11] ss:$8 sps:$4 sm:$0xff]  }
0x2083   : > { %v4276_v4 = vpop.f32.mrb[90].mxu0 }
0x2084   : > { %v7994_v6 = vpop.f32.mrb[91].mxu0 }
0x2085   : > { %v8536_v6 = vld [vmem:[#allocation11 + $0x14] ss:$8 sps:$4 sm:$0xff]  }
0x2089   : > { %v4366_v52 = vpop.f32.mrb[92].mxu0 }
0x208a   : > { %v4367_v7 = vadd.f32 %v4366_v52, %v10469_v40  ;;  %v8007_v8 = vpop.f32.mrb[93].mxu0 }
0x208b   : > { %v4369_v27 = vpop.f32.mrb[94].mxu0 }
0x208c   : > { %v8008_v50 = vpop.f32.mrb[95].mxu0  ;;  %v4372_v62 = vsel %vm1448_vm3, %v4367_v7, -inf  ;;  %v8534_v27 = vld [vmem:[#allocation11 + $0x10] ss:$8 sps:$4 sm:$0xff]  }
0x208d   : > { %4373 = vmax.xlane.f32.xlu1 %v4372_v62  ;;  %v8539_v50 = vld [vmem:[#allocation11 + $0x24] ss:$8 sps:$4 sm:$0xff]  }
0x209e   : > { %4479 = vrot.lane.b32.xlu1 %v10516_v11, %s11197_s11 }
0x20a2   : > { %4477 = vrot.lane.b32.xlu1 %v10508_v10, %s11197_s11 }
0x211a   : > { %v4374_v36 = vpop.xlane.xlu1 %4373 }
0x211b   : > { %v4375_v12 = vsub.f32 %v4367_v7, %v4374_v36 }
0x211d   : > { %v4376_v14 = vmul.f32 1.442695, %v4375_v12  ;;  %v8537_v12 = vld [vmem:[#allocation11 + $0x20] ss:$8 sps:$4 sm:$0xff]  }
0x211e   : > { %v4480_v54 = vpop.permute.xlu1 %4479 }
0x211f   : > { %8695 = vpow2.f32 %v4376_v14  ;;  %v4485_v23 = vsel %vm1394_vm1, %v4480_v54, 0  ;;  %v8542_v14 = vld [vmem:[#allocation11 + $0x34] ss:$8 sps:$4 sm:$0xff]  }
0x2122   : > { %v4478_v24 = vpop.permute.xlu1 %4477 }
0x2129   : > { %v8696_v15 = vpop.eup %8695 }
0x212a   : > { %v4378_v5 = vsel %vm1448_vm3, %v8696_v15, 0.0 }
0x212b   : > { %4379 = vadd.xlane.f32.xlu0 %v4378_v5  ;;  %v8540_v5 = vld [vmem:[#allocation11 + $0x30] ss:$8 sps:$4 sm:$0xff]  }
0x2141   : > { %4384 = vrot.lane.b32.xlu0 %v10551_v35, %s11196_s6 }
0x21b8   : > { %v4380_v40 = vpop.xlane.xlu0 %4379 }
0x21b9   : > { %8697 = vrcp.f32 %v4380_v40  ;;  %v8545_v40 = vld [vmem:[#allocation11 + $0x44] ss:$8 sps:$4 sm:$0xff]  }
0x21bc   : > { %v4385_v38 = vpop.permute.xlu0 %4384 }
0x21bd   : > { %v4390_v29 = vsel %vm1464_vm2, %v4385_v38, 0  ;;  %v8543_v38 = vld [vmem:[#allocation11 + $0x40] ss:$8 sps:$4 sm:$0xff]  }
0x21be   : > { %8010 = vmatpush3.bf16.msra.mxu1 %v4390_v29  ;;  %v8548_v29 = vld [vmem:[#allocation11 + $0x54] ss:$8 sps:$4 sm:$0xff]  }
0x21bf   : > { %8023 = vmatprep.subr.bf16.mxu1 %v9243_v19 }
0x21c3   : > { %v8698_v10 = vpop.eup %8697 }
0x21c4   : > { %v4382_v11 = vmul.f32 %v8698_v10, %v8696_v15  ;;  %v8546_v10 = vld [vmem:[#allocation11 + $0x50] ss:$8 sps:$4 sm:$0xff]  }
0x21c6   : > { %v4383_v17 = vpack.c.bf16 %v4382_v11, %v4382_v11  ;;  %v8551_v11 = vld [vmem:[#allocation11 + $0x64] ss:$8 sps:$4 sm:$0xff]  }
0x21c8   : > { %8012 = vmatmul.mubr.msk.bf16.vlgmr.msra.gmra.mrb[100].mxu1 %vm1448_vm3, %v4383_v17 }
0x21c9   : > { %8024 = vmatpush3.bf16.xpose.msra.mxu1 %v4485_v23  ;;  %8025 = vmatprep.mubr.msk.bf16.mxu1 %vm9244_vm0, %v9243_v19  ;;  %v8549_v23 = vld [vmem:[#allocation11 + $0x60] ss:$8 sps:$4 sm:$0xff]  }
0x21ca   : > { %8035 = vmatprep.subr.bf16.mxu1 %v9243_v19 }
0x21d0   : > { %8026 = vmatmul.mubr.msk.bf16.vlgmr.msra.gmra.mrb[104].mxu1 %vm1394_vm1, %v4478_v24  ;;  %v8554_v24 = vld [vmem:[#allocation11 + $0x74] ss:$8 sps:$4 sm:$0xff]  }
0x21d1   : > { %8036 = vmatpush3.bf16.msra.mxu1 %v10523_v60  ;;  %8039 = vmatprep.mubr.msk.bf16.mxu1 %vm9244_vm0, %v9243_v19 }
0x21d2   : > { %8037 = vmatprep.subr.bf16.mxu1 %v9243_v19 }
0x21d5   : > { %8038 = vmatpush3.bf16.msra.mxu1 %v10526_v42 }
0x229b   : > { %v4426_v25 = vpop.f32.mrb[100].mxu1 }
0x229c   : > { %v4432_v20 = vpack.c.bf16 %v4426_v25, %v4426_v25  ;;  %v8013_v31 = vpop.f32.mrb[101].mxu1 }
0x229d   : > { %v4429_v28 = vpop.f32.mrb[102].mxu1  ;;  %v8552_v31 = vld [vmem:[#allocation11 + $0x70] ss:$8 sps:$4 sm:$0xff]  }
0x229e   : > { %v8014_v39 = vpop.f32.mrb[103].mxu1  ;;  %8020 = vmatmul.mubr.msk.bf16.vlgmr.msra.gmra.mrb[96].mxu0 %vm1394_vm1, %v4432_v20  ;;  %v7253_v28 = vld [vmem:[%s11090_s12] ss:$0 sm:$0xff] }
0x229f   : > { %8031 = vmatprep.mubr.msk.bf16.mxu0 %vm9244_vm0, %v9243_v19 }
0x22a3   : > { %v4521_v41 = vpop.f32.mrb[104].mxu1 }
0x22a4   : > { %v4522_v60 = vadd.f32 %v4521_v41, %v10501_v9  ;;  %v8027_v13 = vpop.f32.mrb[105].mxu1  ;;  %v10642_v9 = vadd.f32 %v8765_v45, %v10572_v21 }
0x22a5   : > { %v4524_v42 = vpop.f32.mrb[106].mxu1  ;;  %v8555_v13 = vld [vmem:[#allocation10] sm:$0xff]  }
0x22a6   : > { %v8028_v32 = vpop.f32.mrb[107].mxu1  ;;  %v4527_v33 = vsel %vm1448_vm3, %v4522_v60, -inf  ;;  %v4635_v16 = vmul.f32 %v10642_v9, %v10642_v9  ;;  %v8557_v42 = vld [vmem:[#allocation10 + $0x10] sm:$0xff]  }
0x22a7   : > { %4528 = vmax.xlane.f32.xlu1 %v4527_v33  ;;  %v8558_v32 = vld [vmem:[#allocation10 + $0x18] sm:$0xff]  }
0x22ab   : > { %3040 = vadd.xlane.f32.xlu1 %v3038_v44 }
0x22af   : > { %3042 = vadd.xlane.f32.xlu1 %v3039_v1  ;;  %v8766_v1 = vld [vmem:[%s10196_s8 + $0x8] sm:$0xff]  ;;  %s11198_s8 = sld [smem:[#allocation53_spill]] }
0x22b3   : > { %4637 = vadd.xlane.f32.xlu1 %v4635_v16 }
0x22b5   : > { %s11199_s1 = smov %s11198_s8 }
0x2334   : > { %v4529_v48 = vpop.xlane.xlu1 %4528 }
0x2335   : > { %v4530_v51 = vsub.f32 %v4522_v60, %v4529_v48 }
0x2337   : > { %v4531_v34 = vmul.f32 1.442695, %v4530_v51 }
0x2338   : > { %v3041_v0 = vpop.xlane.xlu1 %3040 }
0x2339   : > { %8699 = vpow2.f32 %v4531_v34  ;;  %v3044_v62 = vmul.f32 0.0078125, %v3041_v0  ;;  %v8559_v34 = vld [vmem:[#allocation10 + $0x20] sm:$0xff]  }
0x233b   : > { %v3046_v15 = vadd.f32 1e-06, %v3044_v62 }
0x2343   : > { %v8700_v22 = vpop.eup %8699 }
0x2344   : > { %v4533_v2 = vsel %vm1448_vm3, %v8700_v22, 0.0 }
0x2345   : > { %4534 = vadd.xlane.f32.xlu0 %v4533_v2  ;;  %v8561_v2 = vld [vmem:[#allocation10 + $0x30] sm:$0xff]  }
0x235b   : > { %4539 = vrot.lane.b32.xlu0 %v10551_v35, %s11197_s11  ;;  %v8533_v35 = vld [vmem:[#allocation11 + $0x4] ss:$8 sps:$4 sm:$0xff]  }
0x235c   : > { %4860 = vmatprep.subr.bf16.mxu1 %v8533_v35 }
0x2371   : > { %v4470_v21 = vpop.f32.mrb[96].mxu0 }
0x2372   : > { %v10652_v37 = vadd.f32 %v4470_v21, %v10601_v63  ;;  %v8021_v47 = vpop.f32.mrb[97].mxu0  ;;  %v3043_v63 = vpop.xlane.xlu1 %3042  ;;  %v8562_v21 = vld [vmem:[#allocation10 + $0x38] sm:$0xff]  }
0x2373   : > { %v4473_v53 = vpop.f32.mrb[98].mxu0  ;;  %v3045_v8 = vmul.f32 0.0078125, %v3043_v63 }
0x2374   : > { %v8022_v61 = vpop.f32.mrb[99].mxu0 }
0x2375   : > { %v3047_v36 = vadd.f32 1e-06, %v3045_v8 }
0x23d2   : > { %v4535_v55 = vpop.xlane.xlu0 %4534 }
0x23d3   : > { %8701 = vrcp.f32 %v4535_v55 }
0x23d4   : > { %8703 = vrsqrt.f32 %v3047_v36 }
0x23d5   : > { %8705 = vrsqrt.f32 %v3046_v15 }
0x23d6   : > { %v4540_v49 = vpop.permute.xlu0 %4539 }
0x23d7   : > { %v4545_v30 = vsel %vm1464_vm2, %v4540_v49, 0 }
0x23d8   : > { %8030 = vmatpush3.bf16.msra.mxu0 %v4545_v30 }
0x23d9   : > { %8043 = vmatprep.subr.bf16.mxu0 %v9243_v19 }
0x23dd   : > { %v8702_v57 = vpop.eup %8701 }
0x23de   : > { %v4537_v26 = vmul.f32 %v8702_v57, %v8700_v22  ;;  %v8704_v54 = vpop.eup %8703  ;;  %v8560_v22 = vld [vmem:[#allocation10 + $0x28] sm:$0xff]   ;;  %v4638_v57 = vpop.xlane.xlu1 %4637 }
0x23df   : > { %v8706_v17 = vpop.eup %8705  ;;  %v3051_v25 = vmul.f32 %v8704_v54, %v10636_v43 }
0x23e0   : > { %v4538_v56 = vpack.c.bf16 %v4537_v26, %v4537_v26  ;;  %v3050_v20 = vmul.f32 %v8706_v17, %v10631_v46  ;;  %v8556_v46 = vld [vmem:[#allocation10 + $0x8] sm:$0xff]   ;;  %v4641_v26 = vmul.f32 0.0078125, %v4638_v57 }
0x23e1   : > { %v3059_v39 = vmul.f32 %v7253_v28, %v3051_v25 }
0x23e2   : > { %8032 = vmatmul.mubr.msk.bf16.vlgmr.msra.gmra.mrb[100].mxu0 %vm1448_vm3, %v4538_v56  ;;  %v3058_v41 = vmul.f32 %v7253_v28, %v3050_v20  ;;  %v4643_v56 = vadd.f32 1e-06, %v4641_v26  ;;  %v10744_v26 = vld [vmem:[#allocation13 + $0x8] sm:$0xff]  }
0x23e3   : > { %8059 = vmatprep.mubr.msk.bf16.mxu0 %vm9244_vm0, %v9243_v19  ;;  %8044 = vmatpush3.bf16.msra.mxu0 %v8555_v13 }
0x23e4   : > { %v3060_v60 = vpack.c.bf16 %v3059_v39, %v3058_v41  ;;  %8045 = vmatprep.subr.bf16.mxu0 %v9243_v19  ;;  %8707 = vrsqrt.f32 %v4643_v56 }
0x23e7   : > { %8046 = vmatpush3.bf16.msra.mxu0 %v8556_v46 }
0x23e8   : > { %8047 = vmatprep.subr.bf16.mxu0 %v9243_v19 }
0x23eb   : > { %8048 = vmatpush3.bf16.msra.mxu0 %v8557_v42 }
0x23ec   : > { %8049 = vmatprep.subr.bf16.mxu0 %v9243_v19 }
0x23ef   : > { %8050 = vmatpush3.bf16.msra.mxu0 %v8558_v32 }
0x23f0   : > { %8051 = vmatprep.subr.bf16.mxu0 %v9243_v19 }
0x23f3   : > { %8052 = vmatpush3.bf16.msra.mxu0 %v8559_v34 }
0x23f4   : > { %8053 = vmatprep.subr.bf16.mxu0 %v9243_v19 }
0x23f7   : > { %8054 = vmatpush3.bf16.msra.mxu0 %v8560_v22  ;;  %v10730_v22 = vld [vmem:[#allocation13 + $0x10] sm:$0xff]  }
0x23f8   : > { %8055 = vmatprep.subr.bf16.mxu0 %v9243_v19 }
0x23fb   : > { %8056 = vmatpush3.bf16.msra.mxu0 %v8561_v2  ;;  %v10733_v2 = vld [vmem:[#allocation13 + $0x18] sm:$0xff]  }
0x23fc   : > { %8057 = vmatprep.subr.bf16.mxu0 %v9243_v19 }
0x23ff   : > { %8058 = vmatpush3.bf16.msra.mxu0 %v8562_v21 }
0x2400   : > { %8063 = vmatprep.subr.bf16.mxu0 %v9243_v19 }
0x24b5   : > { %v4581_v58 = vpop.f32.mrb[100].mxu0 }
0x24b6   : > { %v4587_v3 = vpack.c.bf16 %v4581_v58, %v4581_v58  ;;  %v8033_v4 = vpop.f32.mrb[101].mxu0 }
0x24b7   : > { %v4584_v52 = vpop.f32.mrb[102].mxu0  ;;  %v7311_v4 = vld [vmem:[#allocation19] ss:$0 sm:$0xff] }
0x24b8   : > { %v8034_v7 = vpop.f32.mrb[103].mxu0  ;;  %8040 = vmatmul.mubr.msk.bf16.vlgmr.msra.gmra.mrb[108].mxu1 %vm1394_vm1, %v4587_v3 }
0x24b9   : > { %4861 = vmatpush1.bf16.msra.mxu1 %v8531_v59  ;;  %4892 = vmatprep.mubr.bf16.mxu1 %v9242_v18  ;;  %v8708_v59 = vpop.eup %8707 }
0x24ba   : > { %4862 = vmatprep.subr.bf16.mxu1 %v8536_v6  ;;  %v4647_v63 = vmul.f32 %v8708_v59, %v10642_v9 }
0x24bc   : > { %v4655_v52 = vmul.f32 %v7311_v4, %v4647_v63 }
0x24bd   : > { %4863 = vmatpush1.bf16.msra.mxu1 %v8534_v27 }
0x24be   : > { %4864 = vmatprep.subr.bf16.mxu1 %v8539_v50 }
0x24c1   : > { %4865 = vmatpush1.bf16.msra.mxu1 %v8537_v12 }
0x24c2   : > { %4866 = vmatprep.subr.bf16.mxu1 %v8542_v14 }
0x24c5   : > { %4867 = vmatpush1.bf16.msra.mxu1 %v8540_v5 }
0x24c6   : > { %4868 = vmatprep.subr.bf16.mxu1 %v8545_v40 }
0x24c9   : > { %4869 = vmatpush1.bf16.msra.mxu1 %v8543_v38 }
0x24ca   : > { %4870 = vmatprep.subr.bf16.mxu1 %v8548_v29  ;;  %v10713_v29 = vld [vmem:[%s9930_s29] ss:$0 sm:$0xff] }
0x24cd   : > { %4871 = vmatpush1.bf16.msra.mxu1 %v8546_v10 }
0x24ce   : > { %4872 = vmatprep.subr.bf16.mxu1 %v8551_v11 }
0x24d1   : > { %4873 = vmatpush1.bf16.msra.mxu1 %v8549_v23 }
0x24d2   : > { %4874 = vmatprep.subr.bf16.mxu1 %v8554_v24 }
0x24d5   : > { %4875 = vmatpush1.bf16.msra.mxu1 %v8552_v31 }
0x24d6   : > { %8069 = vmatprep.subr.bf16.mxu1 %v9243_v19 }
0x24d8   : > { %4893 = vmatmul.mubr.bf16.vlgmr.msra.gmra.mrb[112].mxu1 %v3060_v60 }
0x24d9   : > { %8071 = vmatprep.mubr.msk.bf16.mxu1 %vm9244_vm0, %v9243_v19 }
0x258b   : > { %v4625_v33 = vpop.f32.mrb[108].mxu1 }
0x258c   : > { %v4631_v43 = vadd.f32 %v4625_v33, %v10652_v37  ;;  %v8041_v44 = vpop.f32.mrb[109].mxu1 }
0x258d   : > { %v4628_v45 = vpop.f32.mrb[110].mxu1 }
0x258e   : > { %v10675_v16 = vadd.f32 %v8766_v1, %v4631_v43  ;;  %v8042_v48 = vpop.f32.mrb[111].mxu1 }
0x2590   : > { %v4636_v51 = vmul.f32 %v10675_v16, %v10675_v16 }
0x2592   : > { %4639 = vadd.xlane.f32.xlu1 %v4636_v51 }
0x25ab   : > { %v4894_v37 = vpop.f32.mrb[112].mxu1 }
0x25ac   : > { %v4896_v47 = vpop.f32.mrb[113].mxu1 }
0x25ad   : > { %v4898_v53 = vpop.f32.mrb[114].mxu1 }
0x25ae   : > { %v10682_v61 = vpack.c.bf16 %v4898_v53, %v4894_v37  ;;  %v4900_v55 = vpop.f32.mrb[115].mxu1 }
0x25af   : > { %v10685_v49 = vpack.c.bf16 %v4900_v55, %v4896_v47 }
0x25b0   : > { %5030 = vrot.lane.b32.xlu1 %v10682_v61, %s9245_s7  ;;  %v4925_v27 = vsel %vm1394_vm1, %v10682_v61, 0 }
0x25b1   : > { %v4983_v30 = vsel %vm1464_vm2, %v10685_v49, 0 }
0x25b2   : > { %8070 = vmatpush3.bf16.msra.mxu1 %v4983_v30  ;;  %v10740_v30 = vld [vmem:[#allocation13] sm:$0xff]  }
0x25b3   : > { %8081 = vmatprep.subr.bf16.mxu1 %v9243_v19 }
0x261f   : > { %v4640_v35 = vpop.xlane.xlu1 %4639 }
0x2620   : > { %v4642_v0 = vmul.f32 0.0078125, %v4640_v35 }
0x2622   : > { %v4644_v58 = vadd.f32 1e-06, %v4642_v0 }
0x2623   : > { %v5031_v36 = vpop.permute.xlu1 %5030 }
0x2624   : > { %8709 = vrsqrt.f32 %v4644_v58  ;;  %v5036_v5 = vsel %vm1394_vm1, %v5031_v36, 0 }
0x262e   : > { %v8710_v3 = vpop.eup %8709 }
0x262f   : > { %v4648_v6 = vmul.f32 %v8710_v3, %v10675_v16 }
0x2631   : > { %v4656_v7 = vmul.f32 %v7311_v4, %v4648_v6 }
0x2633   : > { %v4657_v8 = vpack.c.bf16 %v4656_v7, %v4655_v52 }
0x2635   : > { %8060 = vmatmul.mubr.bf16.vlgmr.msra.gmra.mrb[104].mxu0 %v4657_v8 }
0x2636   : > { %8064 = vmatpush3.bf16.xpose.msra.mxu0 %v4925_v27  ;;  %8065 = vmatprep.mubr.msk.bf16.mxu0 %vm9244_vm0, %v9243_v19 }
0x2637   : > { %8075 = vmatprep.subr.bf16.mxu0 %v9243_v19 }
0x2708   : > { %v4756_v50 = vpop.f32.mrb[104].mxu0 }
0x2709   : > { %v8061_v62 = vpop.f32.mrb[105].mxu0 }
0x270a   : > { %v4759_v12 = vpop.f32.mrb[106].mxu0 }
0x270b   : > { %v10699_v14 = vpack.c.bf16 %v4759_v12, %v4756_v50  ;;  %v8062_v15 = vpop.f32.mrb[107].mxu0 }
0x270d   : > { %5027 = vrot.lane.b32.xlu0 %v10699_v14, %s9245_s7  ;;  %8066 = vmatmul.mubr.msk.bf16.vlgmr.msra.gmra.mrb[108].mxu0 %vm1394_vm1, %v10699_v14 }
0x270e   : > { %8076 = vmatpush3.bf16.xpose.msra.mxu0 %v5036_v5  ;;  %8077 = vmatprep.mubr.msk.bf16.mxu0 %vm9244_vm0, %v9243_v19 }
0x270f   : > { %8087 = vmatprep.subr.bf16.mxu0 %v9243_v19 }
0x277f   : > { %v5028_v40 = vpop.permute.xlu0 %5027 }
0x2780   : > { %8078 = vmatmul.mubr.msk.bf16.vlgmr.msra.gmra.mrb[112].mxu0 %vm1394_vm1, %v5028_v40 }
0x2781   : > { %8091 = vmatprep.mubr.msk.bf16.mxu0 %vm9244_vm0, %v9243_v19  ;;  %8088 = vmatpush3.bf16.msra.mxu0 %v10730_v22 }
0x2782   : > { %8089 = vmatprep.subr.bf16.mxu0 %v9243_v19 }
0x2785   : > { %8090 = vmatpush3.bf16.msra.mxu0 %v10733_v2 }
0x2786   : > { %8103 = vmatprep.subr.bf16.mxu0 %v9243_v19 }
0x27e0   : > { %v4961_v38 = vpop.f32.mrb[108].mxu0 }
0x27e1   : > { %v4962_v10 = vadd.f32 %v10713_v29, %v4961_v38  ;;  %v8067_v11 = vpop.f32.mrb[109].mxu0 }
0x27e2   : > { %v4964_v54 = vpop.f32.mrb[110].mxu0 }
0x27e3   : > { %v8068_v17 = vpop.f32.mrb[111].mxu0  ;;  %v4967_v23 = vsel %vm1448_vm3, %v4962_v10, -inf }
0x27e4   : > { %4968 = vmax.xlane.f32.xlu0 %v4967_v23 }
0x2853   : > { %v5072_v24 = vpop.f32.mrb[112].mxu0 }
0x2854   : > { %v5073_v25 = vadd.f32 %v10713_v29, %v5072_v24  ;;  %v8079_v20 = vpop.f32.mrb[113].mxu0 }
0x2855   : > { %v5075_v31 = vpop.f32.mrb[114].mxu0 }
0x2856   : > { %v8080_v28 = vpop.f32.mrb[115].mxu0  ;;  %v5078_v39 = vsel %vm1448_vm3, %v5073_v25, -inf }
0x2857   : > { %5079 = vmax.xlane.f32.xlu1 %v5078_v39 }
0x2868   : > { %5252 = vrot.lane.b32.xlu1 %v10682_v61, %s11196_s6 }
0x2871   : > { %v4969_v41 = vpop.xlane.xlu0 %4968 }
0x2872   : > { %v4970_v60 = vsub.f32 %v4962_v10, %v4969_v41 }
0x2874   : > { %v4971_v13 = vmul.f32 1.442695, %v4970_v60  ;;  %v10773_v60 = vld [vmem:[#allocation13 + $0x20] sm:$0xff]  }
0x2876   : > { %8711 = vpow2.f32 %v4971_v13 }
0x2880   : > { %v8712_v46 = vpop.eup %8711 }
0x2881   : > { %v4973_v42 = vsel %vm1448_vm3, %v8712_v46, 0.0 }
0x2882   : > { %4974 = vadd.xlane.f32.xlu0 %v4973_v42 }
0x28e4   : > { %v5080_v32 = vpop.xlane.xlu1 %5079 }
0x28e5   : > { %v5081_v33 = vsub.f32 %v5073_v25, %v5080_v32 }
0x28e7   : > { %v5082_v43 = vmul.f32 1.442695, %v5081_v33 }
0x28e8   : > { %v5253_v63 = vpop.permute.xlu1 %5252 }
0x28e9   : > { %8713 = vpow2.f32 %v5082_v43  ;;  %v5258_v7 = vsel %vm1394_vm1, %v5253_v63, 0 }
0x28f3   : > { %v8714_v44 = vpop.eup %8713 }
0x28f4   : > { %v5084_v45 = vsel %vm1448_vm3, %v8714_v44, 0.0 }
0x28f5   : > { %5085 = vadd.xlane.f32.xlu0 %v5084_v45 }
0x290b   : > { %5091 = vrot.lane.b32.xlu0 %v10685_v49, %s9245_s7 }
0x290f   : > { %v4975_v1 = vpop.xlane.xlu0 %4974  ;;  %5250 = vrot.lane.b32.xlu0 %v10699_v14, %s11196_s6 }
0x2910   : > { %8715 = vrcp.f32 %v4975_v1 }
0x291a   : > { %v8716_v48 = vpop.eup %8715 }
0x291b   : > { %v4977_v51 = vmul.f32 %v8716_v48, %v8712_v46  ;;  %v10787_v48 = vld [vmem:[#allocation13 + $0x28] sm:$0xff]  }
0x291d   : > { %v4978_v34 = vpack.c.bf16 %v4977_v51, %v4977_v51 }
0x291f   : > { %8072 = vmatmul.mubr.msk.bf16.vlgmr.msra.gmra.mrb[116].mxu1 %vm1448_vm3, %v4978_v34 }
0x2920   : > { %8083 = vmatprep.mubr.msk.bf16.mxu1 %vm9244_vm0, %v9243_v19 }
0x2982   : > { %v5086_v21 = vpop.xlane.xlu0 %5085 }
0x2983   : > { %8717 = vrcp.f32 %v5086_v21 }
0x2986   : > { %v5092_v37 = vpop.permute.xlu0 %5091 }
0x2987   : > { %v5097_v47 = vsel %vm1464_vm2, %v5092_v37, 0 }
0x2988   : > { %8082 = vmatpush3.bf16.msra.mxu1 %v5097_v47 }
0x2989   : > { %8095 = vmatprep.subr.bf16.mxu1 %v9243_v19 }
0x298a   : > { %v5251_v27 = vpop.permute.xlu0 %5250 }
0x298d   : > { %v8718_v53 = vpop.eup %8717 }
0x298e   : > { %v5088_v55 = vmul.f32 %v8718_v53, %v8714_v44 }
0x2990   : > { %v5089_v57 = vpack.c.bf16 %v5088_v55, %v5088_v55 }
0x2992   : > { %8084 = vmatmul.mubr.msk.bf16.vlgmr.msra.gmra.mrb[120].mxu1 %vm1448_vm3, %v5089_v57 }
0x2993   : > { %8096 = vmatpush3.bf16.msra.mxu1 %v10740_v30  ;;  %8099 = vmatprep.mubr.msk.bf16.mxu1 %vm9244_vm0, %v9243_v19 }
0x2994   : > { %8097 = vmatprep.subr.bf16.mxu1 %v9243_v19 }
0x2997   : > { %8098 = vmatpush3.bf16.msra.mxu1 %v10744_v26 }
0x2998   : > { %8109 = vmatprep.subr.bf16.mxu1 %v9243_v19 }
0x29f2   : > { %v5019_v56 = vpop.f32.mrb[116].mxu1 }
0x29f3   : > { %v5025_v35 = vpack.c.bf16 %v5019_v56, %v5019_v56  ;;  %v8073_v0 = vpop.f32.mrb[117].mxu1 }
0x29f4   : > { %v5022_v58 = vpop.f32.mrb[118].mxu1 }
0x29f5   : > { %v8074_v59 = vpop.f32.mrb[119].mxu1  ;;  %8100 = vmatmul.mubr.msk.bf16.vlgmr.msra.gmra.mrb[124].mxu1 %vm1394_vm1, %v5025_v35  ;;  %v10799_v58 = vrot.slane %v10699_v14, 4 }
0x29f6   : > { %8111 = vmatprep.mubr.msk.bf16.mxu1 %vm9244_vm0, %v9243_v19 }
0x2a65   : > { %v5133_v3 = vpop.f32.mrb[120].mxu1 }
0x2a66   : > { %v5139_v4 = vpack.c.bf16 %v5133_v3, %v5133_v3  ;;  %v8085_v6 = vpop.f32.mrb[121].mxu1 }
0x2a67   : > { %v5136_v52 = vpop.f32.mrb[122].mxu1 }
0x2a68   : > { %v8086_v8 = vpop.f32.mrb[123].mxu1  ;;  %8092 = vmatmul.mubr.msk.bf16.vlgmr.msra.gmra.mrb[116].mxu0 %vm1394_vm1, %v5139_v4 }
0x2a69   : > { %8104 = vmatpush3.bf16.xpose.msra.mxu0 %v5258_v7  ;;  %8105 = vmatprep.mubr.msk.bf16.mxu0 %vm9244_vm0, %v9243_v19 }
0x2a6a   : > { %8115 = vmatprep.subr.bf16.mxu0 %v9243_v19 }
0x2a70   : > { %8106 = vmatmul.mubr.msk.bf16.vlgmr.msra.gmra.mrb[120].mxu0 %vm1394_vm1, %v5251_v27 }
0x2a71   : > { %8119 = vmatprep.mubr.msk.bf16.mxu0 %vm9244_vm0, %v9243_v19  ;;  %8116 = vmatpush3.bf16.msra.mxu0 %v10773_v60 }
0x2a72   : > { %8117 = vmatprep.subr.bf16.mxu0 %v9243_v19 }
0x2a75   : > { %8118 = vmatpush3.bf16.msra.mxu0 %v10787_v48 }
0x2a76   : > { %8129 = vmatprep.subr.bf16.mxu0 %v9243_v19 }
0x2ac8   : > { %v5244_v50 = vpop.f32.mrb[124].mxu1 }
0x2ac9   : > { %v8101_v62 = vpop.f32.mrb[125].mxu1 }
0x2aca   : > { %v5247_v36 = vpop.f32.mrb[126].mxu1 }
0x2acb   : > { %v8102_v12 = vpop.f32.mrb[127].mxu1 }
0x2acc   : > { %v10817_v12 = vld [vmem:[#allocation13 + $0x38] sm:$0xff]  }
0x2b3b   : > { %v5189_v15 = vpop.f32.mrb[116].mxu0 }
0x2b3c   : > { %v10762_v5 = vadd.f32 %v5244_v50, %v5189_v15  ;;  %v8093_v40 = vpop.f32.mrb[117].mxu0  ;;  %v10814_v50 = vld [vmem:[#allocation13 + $0x30] sm:$0xff]  }
0x2b3d   : > { %v5192_v38 = vpop.f32.mrb[118].mxu0 }
0x2b3e   : > { %v8094_v10 = vpop.f32.mrb[119].mxu0 }
0x2b43   : > { %v5294_v11 = vpop.f32.mrb[120].mxu0 }
0x2b44   : > { %v5295_v54 = vadd.f32 %v10713_v29, %v5294_v11  ;;  %v8107_v17 = vpop.f32.mrb[121].mxu0 }
0x2b45   : > { %v5297_v23 = vpop.f32.mrb[122].mxu0  ;;  %v10842_v17 = vrot.slane %v10685_v49, 4 }
0x2b46   : > { %v8108_v24 = vpop.f32.mrb[123].mxu0  ;;  %v5300_v25 = vsel %vm1448_vm3, %v5295_v54, -inf }
0x2b47   : > { %5301 = vmax.xlane.f32.xlu1 %v5300_v25 }
0x2b58   : > { %5419 = vrot.lane.b32.xlu1 %v10682_v61, %s11197_s11 }
0x2b5c   : > { %5417 = vrot.lane.b32.xlu1 %v10699_v14, %s11197_s11  ;;  %v10807_v14 = vrot.slane %v10682_v61, 4 }
0x2b5e   : > { %v5590_v38 = vsel %vm1394_vm1, %v10807_v14, 0 }
0x2bd4   : > { %v5302_v20 = vpop.xlane.xlu1 %5301 }
0x2bd5   : > { %v5303_v31 = vsub.f32 %v5295_v54, %v5302_v20 }
0x2bd7   : > { %v5304_v28 = vmul.f32 1.442695, %v5303_v31 }
0x2bd8   : > { %v5420_v43 = vpop.permute.xlu1 %5419 }
0x2bd9   : > { %8719 = vpow2.f32 %v5304_v28  ;;  %v5425_v45 = vsel %vm1394_vm1, %v5420_v43, 0  ;;  %v10851_v28 = vld [vmem:[%s9930_s29 + $0x1] ss:$0 sm:$0xff]  ;;  %s7425_s29 = sshll.u32 %s9412_s9, 9 }
0x2bdc   : > { %v5418_v1 = vpop.permute.xlu1 %5417 }
0x2be3   : > { %v8720_v39 = vpop.eup %8719 }
0x2be4   : > { %v5306_v41 = vsel %vm1448_vm3, %v8720_v39, 0.0 }
0x2be5   : > { %5307 = vadd.xlane.f32.xlu0 %v5306_v41 }
0x2bfb   : > { %5312 = vrot.lane.b32.xlu0 %v10685_v49, %s11196_s6 }
0x2c72   : > { %v5308_v13 = vpop.xlane.xlu0 %5307 }
0x2c73   : > { %8721 = vrcp.f32 %v5308_v13 }
0x2c76   : > { %v5313_v46 = vpop.permute.xlu0 %5312 }
0x2c77   : > { %v5318_v42 = vsel %vm1464_vm2, %v5313_v46, 0 }
0x2c78   : > { %8110 = vmatpush3.bf16.msra.mxu1 %v5318_v42 }
0x2c79   : > { %8123 = vmatprep.subr.bf16.mxu1 %v9243_v19 }
0x2c7d   : > { %v8722_v32 = vpop.eup %8721 }
0x2c7e   : > { %v5310_v33 = vmul.f32 %v8722_v32, %v8720_v39 }
0x2c80   : > { %v5311_v44 = vpack.c.bf16 %v5310_v33, %v5310_v33 }
0x2c82   : > { %8112 = vmatmul.mubr.msk.bf16.vlgmr.msra.gmra.mrb[128].mxu1 %vm1448_vm3, %v5311_v44 }
0x2c83   : > { %8124 = vmatpush3.bf16.xpose.msra.mxu1 %v5425_v45  ;;  %8125 = vmatprep.mubr.msk.bf16.mxu1 %vm9244_vm0, %v9243_v19 }
0x2c84   : > { %8135 = vmatprep.subr.bf16.mxu1 %v9243_v19 }
0x2c8a   : > { %8126 = vmatmul.mubr.msk.bf16.vlgmr.msra.gmra.mrb[132].mxu1 %vm1394_vm1, %v5418_v1 }
0x2c8b   : > { %8139 = vmatprep.mubr.msk.bf16.mxu1 %vm9244_vm0, %v9243_v19  ;;  %8136 = vmatpush3.bf16.msra.mxu1 %v10814_v50 }
0x2c8c   : > { %8137 = vmatprep.subr.bf16.mxu1 %v9243_v19 }
0x2c8f   : > { %8138 = vmatpush3.bf16.msra.mxu1 %v10817_v12 }
0x2c90   : > { %8149 = vmatprep.subr.bf16.mxu1 %v9243_v19 }
0x2d55   : > { %v5354_v51 = vpop.f32.mrb[128].mxu1 }
0x2d56   : > { %v5360_v34 = vpack.c.bf16 %v5354_v51, %v5354_v51  ;;  %v8113_v21 = vpop.f32.mrb[129].mxu1 }
0x2d57   : > { %v5357_v37 = vpop.f32.mrb[130].mxu1 }
0x2d58   : > { %v8114_v47 = vpop.f32.mrb[131].mxu1  ;;  %8120 = vmatmul.mubr.msk.bf16.vlgmr.msra.gmra.mrb[124].mxu0 %vm1394_vm1, %v5360_v34 }
0x2d59   : > { %8131 = vmatprep.mubr.msk.bf16.mxu0 %vm9244_vm0, %v9243_v19 }
0x2d5d   : > { %v5461_v53 = vpop.f32.mrb[132].mxu1 }
0x2d5e   : > { %v5462_v55 = vadd.f32 %v10713_v29, %v5461_v53  ;;  %v8127_v57 = vpop.f32.mrb[133].mxu1 }
0x2d5f   : > { %v5464_v56 = vpop.f32.mrb[134].mxu1 }
0x2d60   : > { %v8128_v35 = vpop.f32.mrb[135].mxu1  ;;  %v5467_v0 = vsel %vm1448_vm3, %v5462_v55, -inf }
0x2d61   : > { %5468 = vmax.xlane.f32.xlu0 %v5467_v0 }
0x2d77   : > { %5479 = vrot.lane.b32.xlu0 %v10685_v49, %s11197_s11 }
0x2d7b   : > { %5692 = vrot.lane.b32.xlu0 %v10799_v58, %s9245_s7 }
0x2dee   : > { %v5469_v59 = vpop.xlane.xlu0 %5468 }
0x2def   : > { %v5470_v63 = vsub.f32 %v5462_v55, %v5469_v59 }
0x2df1   : > { %v5471_v3 = vmul.f32 1.442695, %v5470_v63 }
0x2df2   : > { %v5480_v4 = vpop.permute.xlu0 %5479 }
0x2df3   : > { %8723 = vpow2.f32 %v5471_v3  ;;  %v5485_v29 = vsel %vm1464_vm2, %v5480_v4, 0 }
0x2df4   : > { %8130 = vmatpush3.bf16.msra.mxu0 %v5485_v29 }
0x2df5   : > { %8143 = vmatprep.subr.bf16.mxu0 %v9243_v19 }
0x2df6   : > { %v5693_v54 = vpop.permute.xlu0 %5692 }
0x2dfd   : > { %v8724_v6 = vpop.eup %8723 }
0x2dfe   : > { %v5473_v52 = vsel %vm1448_vm3, %v8724_v6, 0.0 }
0x2dff   : > { %5474 = vadd.xlane.f32.xlu1 %v5473_v52 }
0x2e10   : > { %5694 = vrot.lane.b32.xlu1 %v10807_v14, %s9245_s7 }
0x2e2b   : > { %v5410_v7 = vpop.f32.mrb[124].mxu0 }
0x2e2c   : > { %v10812_v8 = vadd.f32 %v5410_v7, %v10762_v5  ;;  %v8121_v27 = vpop.f32.mrb[125].mxu0 }
0x2e2d   : > { %v5413_v62 = vpop.f32.mrb[126].mxu0 }
0x2e2e   : > { %v8122_v36 = vpop.f32.mrb[127].mxu0 }
0x2e8c   : > { %v5475_v61 = vpop.xlane.xlu1 %5474 }
0x2e8d   : > { %8725 = vrcp.f32 %v5475_v61 }
0x2e90   : > { %v5695_v10 = vpop.permute.xlu1 %5694 }
0x2e91   : > { %v5700_v11 = vsel %vm1394_vm1, %v5695_v10, 0 }
0x2e97   : > { %v8726_v15 = vpop.eup %8725 }
0x2e98   : > { %v5477_v5 = vmul.f32 %v8726_v15, %v8724_v6 }
0x2e9a   : > { %v5478_v40 = vpack.c.bf16 %v5477_v5, %v5477_v5 }
0x2e9c   : > { %8132 = vmatmul.mubr.msk.bf16.vlgmr.msra.gmra.mrb[128].mxu0 %vm1448_vm3, %v5478_v40 }
0x2e9d   : > { %8144 = vmatpush3.bf16.xpose.msra.mxu0 %v5590_v38  ;;  %8145 = vmatprep.mubr.msk.bf16.mxu0 %vm9244_vm0, %v9243_v19 }
0x2e9e   : > { %8155 = vmatprep.subr.bf16.mxu0 %v9243_v19 }
0x2ea4   : > { %8146 = vmatmul.mubr.msk.bf16.vlgmr.msra.gmra.mrb[132].mxu0 %vm1394_vm1, %v10799_v58 }
0x2ea5   : > { %8156 = vmatpush3.bf16.xpose.msra.mxu0 %v5700_v11  ;;  %8157 = vmatprep.mubr.msk.bf16.mxu0 %vm9244_vm0, %v9243_v19 }
0x2ea6   : > { %8167 = vmatprep.subr.bf16.mxu0 %v9243_v19 }
0x2eac   : > { %8158 = vmatmul.mubr.msk.bf16.vlgmr.msra.gmra.mrb[136].mxu0 %vm1394_vm1, %v5693_v54 }
0x2ead   : > { %8168 = vmatpush3.bf16.msra.mxu0 %v10730_v22  ;;  %8171 = vmatprep.mubr.msk.bf16.mxu0 %vm9244_vm0, %v9243_v19  ;;  %v5649_v22 = vsel %vm1464_vm2, %v10842_v17, 0 }
0x2eae   : > { %8169 = vmatprep.subr.bf16.mxu0 %v9243_v19 }
0x2eb1   : > { %8170 = vmatpush3.bf16.msra.mxu0 %v10733_v2 }
0x2eb2   : > { %8183 = vmatprep.subr.bf16.mxu0 %v9243_v19 }
0x2f6f   : > { %v5521_v23 = vpop.f32.mrb[128].mxu0 }
0x2f70   : > { %v5527_v24 = vpack.c.bf16 %v5521_v23, %v5521_v23  ;;  %v8133_v25 = vpop.f32.mrb[129].mxu0 }
0x2f71   : > { %v5524_v20 = vpop.f32.mrb[130].mxu0 }
0x2f72   : > { %v8134_v31 = vpop.f32.mrb[131].mxu0  ;;  %8140 = vmatmul.mubr.msk.bf16.vlgmr.msra.gmra.mrb[136].mxu1 %vm1394_vm1, %v5527_v24 }
0x2f73   : > { %8150 = vmatpush3.bf16.msra.mxu1 %v5649_v22  ;;  %8151 = vmatprep.mubr.msk.bf16.mxu1 %vm9244_vm0, %v9243_v19 }
0x2f74   : > { %8161 = vmatprep.subr.bf16.mxu1 %v9243_v19 }
0x2f77   : > { %v5626_v2 = vpop.f32.mrb[132].mxu0 }
0x2f78   : > { %v5627_v49 = vadd.f32 %v10851_v28, %v5626_v2  ;;  %v8147_v39 = vpop.f32.mrb[133].mxu0 }
0x2f79   : > { %v5629_v41 = vpop.f32.mrb[134].mxu0 }
0x2f7a   : > { %v8148_v13 = vpop.f32.mrb[135].mxu0  ;;  %v5632_v46 = vsel %vm1448_vm3, %v5627_v49, -inf }
0x2f7b   : > { %5633 = vmax.xlane.f32.xlu1 %v5632_v46 }
0x2f7f   : > { %v5736_v42 = vpop.f32.mrb[136].mxu0 }
0x2f80   : > { %v5737_v32 = vadd.f32 %v10851_v28, %v5736_v42  ;;  %v8159_v33 = vpop.f32.mrb[137].mxu0 }
0x2f81   : > { %v5739_v43 = vpop.f32.mrb[138].mxu0 }
0x2f82   : > { %v8160_v44 = vpop.f32.mrb[139].mxu0  ;;  %v5742_v45 = vsel %vm1448_vm3, %v5737_v32, -inf }
0x2f83   : > { %5743 = vmax.xlane.f32.xlu0 %v5742_v45 }
0x2f8c   : > { %5754 = vrot.lane.b32.xlu1 %v10842_v17, %s9245_s7 }
0x2f90   : > { %5889 = vrot.lane.b32.xlu1 %v10799_v58, %s11196_s6 }
0x3008   : > { %v5634_v1 = vpop.xlane.xlu1 %5633 }
0x3009   : > { %v5635_v51 = vsub.f32 %v5627_v49, %v5634_v1 }
0x300b   : > { %v5636_v34 = vmul.f32 1.442695, %v5635_v51 }
0x300c   : > { %v5755_v7 = vpop.permute.xlu1 %5754 }
0x300d   : > { %8727 = vpow2.f32 %v5636_v34  ;;  %v5760_v62 = vsel %vm1464_vm2, %v5755_v7, 0 }
0x3010   : > { %v5744_v21 = vpop.xlane.xlu0 %5743  ;;  %v5890_v20 = vpop.permute.xlu1 %5889 }
0x3011   : > { %v5745_v37 = vsub.f32 %v5737_v32, %v5744_v21 }
0x3013   : > { %v5746_v47 = vmul.f32 1.442695, %v5745_v37 }
0x3015   : > { %8729 = vpow2.f32 %v5746_v47 }
0x3017   : > { %v8728_v53 = vpop.eup %8727 }
0x3018   : > { %v5638_v55 = vsel %vm1448_vm3, %v8728_v53, 0.0 }
0x3019   : > { %5639 = vadd.xlane.f32.xlu0 %v5638_v55 }
0x301f   : > { %v8730_v57 = vpop.eup %8729 }
0x3020   : > { %v5748_v56 = vsel %vm1448_vm3, %v8730_v57, 0.0 }
0x3021   : > { %5749 = vadd.xlane.f32.xlu0 %v5748_v56 }
0x3037   : > { %5891 = vrot.lane.b32.xlu0 %v10807_v14, %s11196_s6 }
0x3045   : > { %v5577_v35 = vpop.f32.mrb[136].mxu1 }
0x3046   : > { %v10866_v0 = vadd.f32 %v5577_v35, %v10812_v8  ;;  %v8141_v59 = vpop.f32.mrb[137].mxu1 }
0x3047   : > { %v5580_v63 = vpop.f32.mrb[138].mxu1 }
0x3048   : > { %v8142_v3 = vpop.f32.mrb[139].mxu1  ;;  %v10925_v7 = vadd.f32 %v10866_v0, %v10642_v9 }
0x30a6   : > { %v5640_v4 = vpop.xlane.xlu0 %5639 }
0x30a7   : > { %8731 = vrcp.f32 %v5640_v4 }
0x30ae   : > { %v5750_v29 = vpop.xlane.xlu0 %5749 }
0x30af   : > { %8733 = vrcp.f32 %v5750_v29 }
0x30b1   : > { %v8732_v6 = vpop.eup %8731 }
0x30b2   : > { %v5642_v52 = vmul.f32 %v8732_v6, %v8728_v53 }
0x30b4   : > { %v5643_v27 = vpack.c.bf16 %v5642_v52, %v5642_v52 }
0x30b6   : > { %8152 = vmatmul.mubr.msk.bf16.vlgmr.msra.gmra.mrb[140].mxu1 %vm1448_vm3, %v5643_v27 }
0x30b7   : > { %8162 = vmatpush3.bf16.msra.mxu1 %v5760_v62  ;;  %8163 = vmatprep.mubr.msk.bf16.mxu1 %vm9244_vm0, %v9243_v19 }
0x30b8   : > { %8175 = vmatprep.subr.bf16.mxu1 %v9243_v19 }
0x30b9   : > { %v8734_v8 = vpop.eup %8733 }
0x30ba   : > { %v5752_v36 = vmul.f32 %v8734_v8, %v8730_v57  ;;  %v6202_v8 = vmul.f32 %v10925_v7, %v10925_v7 }
0x30bc   : > { %v5753_v61 = vpack.c.bf16 %v5752_v36, %v5752_v36 }
0x30be   : > { %8164 = vmatmul.mubr.msk.bf16.vlgmr.msra.gmra.mrb[144].mxu1 %vm1448_vm3, %v5753_v61 }
0x30bf   : > { %8176 = vmatpush3.bf16.msra.mxu1 %v10740_v30  ;;  %8179 = vmatprep.mubr.msk.bf16.mxu1 %vm9244_vm0, %v9243_v19  ;;  %v5892_v30 = vpop.permute.xlu0 %5891 }
0x30c0   : > { %8177 = vmatprep.subr.bf16.mxu1 %v9243_v19  ;;  %v5897_v25 = vsel %vm1394_vm1, %v5892_v30, 0 }
0x30c3   : > { %8178 = vmatpush3.bf16.msra.mxu1 %v10744_v26 }
0x30c4   : > { %8189 = vmatprep.subr.bf16.mxu1 %v9243_v19 }
0x3189   : > { %v5685_v15 = vpop.f32.mrb[140].mxu1 }
0x318a   : > { %v5691_v5 = vpack.c.bf16 %v5685_v15, %v5685_v15  ;;  %v8153_v40 = vpop.f32.mrb[141].mxu1 }
0x318b   : > { %v5688_v38 = vpop.f32.mrb[142].mxu1 }
0x318c   : > { %v8154_v10 = vpop.f32.mrb[143].mxu1  ;;  %8180 = vmatmul.mubr.msk.bf16.vlgmr.msra.gmra.mrb[148].mxu1 %vm1394_vm1, %v5691_v5 }
0x318d   : > { %8191 = vmatprep.mubr.msk.bf16.mxu1 %vm9244_vm0, %v9243_v19 }
0x3191   : > { %v5796_v11 = vpop.f32.mrb[144].mxu1 }
0x3192   : > { %v5802_v54 = vpack.c.bf16 %v5796_v11, %v5796_v11  ;;  %v8165_v23 = vpop.f32.mrb[145].mxu1 }
0x3193   : > { %v5799_v24 = vpop.f32.mrb[146].mxu1 }
0x3194   : > { %v8166_v26 = vpop.f32.mrb[147].mxu1  ;;  %8172 = vmatmul.mubr.msk.bf16.vlgmr.msra.gmra.mrb[140].mxu0 %vm1394_vm1, %v5802_v54 }
0x3195   : > { %8184 = vmatpush3.bf16.xpose.msra.mxu0 %v5897_v25  ;;  %8185 = vmatprep.mubr.msk.bf16.mxu0 %vm9244_vm0, %v9243_v19 }
0x3196   : > { %8195 = vmatprep.subr.bf16.mxu0 %v9243_v19 }
0x319c   : > { %8186 = vmatmul.mubr.msk.bf16.vlgmr.msra.gmra.mrb[144].mxu0 %vm1394_vm1, %v5890_v20 }
0x319d   : > { %8196 = vmatpush3.bf16.msra.mxu0 %v10773_v60  ;;  %8199 = vmatprep.mubr.msk.bf16.mxu0 %vm9244_vm0, %v9243_v19 }
0x319e   : > { %8197 = vmatprep.subr.bf16.mxu0 %v9243_v19 }
0x31a1   : > { %8198 = vmatpush3.bf16.msra.mxu0 %v10787_v48 }
0x31a2   : > { %8209 = vmatprep.subr.bf16.mxu0 %v9243_v19 }
0x325f   : > { %v5883_v31 = vpop.f32.mrb[148].mxu1 }
0x3260   : > { %v8181_v22 = vpop.f32.mrb[149].mxu1 }
0x3261   : > { %v5886_v2 = vpop.f32.mrb[150].mxu1  ;;  %v8571_v22 = vld [vmem:[#allocation14] ss:$8 sps:$4 sm:$0xff]  }
0x3262   : > { %v8182_v49 = vpop.f32.mrb[151].mxu1  ;;  %v8573_v2 = vld [vmem:[#allocation14 + $0x4] ss:$8 sps:$4 sm:$0xff]  }
0x3263   : > { %v8576_v49 = vld [vmem:[#allocation14 + $0x14] ss:$8 sps:$4 sm:$0xff]  }
0x3267   : > { %v5840_v39 = vpop.f32.mrb[140].mxu0 }
0x3268   : > { %v10895_v41 = vadd.f32 %v5883_v31, %v5840_v39  ;;  %v8173_v13 = vpop.f32.mrb[141].mxu0  ;;  %v8574_v39 = vld [vmem:[#allocation14 + $0x10] ss:$8 sps:$4 sm:$0xff]  }
0x3269   : > { %v5843_v46 = vpop.f32.mrb[142].mxu0  ;;  %v8577_v13 = vld [vmem:[#allocation14 + $0x20] ss:$8 sps:$4 sm:$0xff]  }
0x326a   : > { %v8174_v42 = vpop.f32.mrb[143].mxu0 }
0x326f   : > { %v5933_v60 = vpop.f32.mrb[144].mxu0 }
0x3270   : > { %v5934_v32 = vadd.f32 %v10851_v28, %v5933_v60  ;;  %v8187_v33 = vpop.f32.mrb[145].mxu0 }
0x3271   : > { %v5936_v43 = vpop.f32.mrb[146].mxu0 }
0x3272   : > { %v8188_v44 = vpop.f32.mrb[147].mxu0  ;;  %v5939_v48 = vsel %vm1448_vm3, %v5934_v32, -inf }
0x3273   : > { %5940 = vmax.xlane.f32.xlu1 %v5939_v48  ;;  %v8582_v44 = vld [vmem:[#allocation14 + $0x34] ss:$8 sps:$4 sm:$0xff]   ;;  %v8580_v48 = vld [vmem:[#allocation14 + $0x30] ss:$8 sps:$4 sm:$0xff]  }
0x3284   : > { %6046 = vrot.lane.b32.xlu1 %v10807_v14, %s11197_s11 }
0x3288   : > { %6044 = vrot.lane.b32.xlu1 %v10799_v58, %s11197_s11 }
0x3300   : > { %v5941_v45 = vpop.xlane.xlu1 %5940 }
0x3301   : > { %v5942_v1 = vsub.f32 %v5934_v32, %v5941_v45  ;;  %v8583_v45 = vld [vmem:[#allocation14 + $0x40] ss:$8 sps:$4 sm:$0xff]  }
0x3303   : > { %v5943_v51 = vmul.f32 1.442695, %v5942_v1  ;;  %v8585_v1 = vld [vmem:[#allocation14 + $0x44] ss:$8 sps:$4 sm:$0xff]  }
0x3304   : > { %v6047_v55 = vpop.permute.xlu1 %6046 }
0x3305   : > { %8735 = vpow2.f32 %v5943_v51  ;;  %v6052_v56 = vsel %vm1394_vm1, %v6047_v55, 0  ;;  %v8588_v51 = vld [vmem:[#allocation14 + $0x54] ss:$8 sps:$4 sm:$0xff]   ;;  %v8598_v55 = vld [vmem:[#allocation16 + $0x8] sm:$0xff]  }
0x3308   : > { %v6045_v35 = vpop.permute.xlu1 %6044 }
0x330f   : > { %v8736_v34 = vpop.eup %8735 }
0x3310   : > { %v5945_v21 = vsel %vm1448_vm3, %v8736_v34, 0.0 }
0x3311   : > { %5946 = vadd.xlane.f32.xlu0 %v5945_v21  ;;  %v8591_v21 = vld [vmem:[#allocation14 + $0x64] ss:$8 sps:$4 sm:$0xff]  }
0x3327   : > { %5951 = vrot.lane.b32.xlu0 %v10842_v17, %s11196_s6  ;;  %s1090_s6 = scalar_lea.vmem %s11202_s4, %s9797_s5 }
0x339e   : > { %v5947_v37 = vpop.xlane.xlu0 %5946 }
0x339f   : > { %8737 = vrcp.f32 %v5947_v37  ;;  %v8594_v37 = vld [vmem:[#allocation14 + $0x74] ss:$8 sps:$4 sm:$0xff]  }
0x33a2   : > { %v5952_v47 = vpop.permute.xlu0 %5951 }
0x33a3   : > { %v5957_v53 = vsel %vm1464_vm2, %v5952_v47, 0  ;;  %v8592_v47 = vld [vmem:[#allocation14 + $0x70] ss:$8 sps:$4 sm:$0xff]  }
0x33a4   : > { %8190 = vmatpush3.bf16.msra.mxu1 %v5957_v53  ;;  %v8595_v53 = vld [vmem:[#allocation16 + $0x40] sm:$0xff]  }
0x33a5   : > { %8203 = vmatprep.subr.bf16.mxu1 %v9243_v19 }
0x33a9   : > { %v8738_v58 = vpop.eup %8737 }
0x33aa   : > { %v5949_v14 = vmul.f32 %v8738_v58, %v8736_v34  ;;  %v8586_v34 = vld [vmem:[#allocation14 + $0x50] ss:$8 sps:$4 sm:$0xff]   ;;  %v8596_v58 = vld [vmem:[#allocation16] sm:$0xff]  }
0x33ac   : > { %v5950_v57 = vpack.c.bf16 %v5949_v14, %v5949_v14  ;;  %v8597_v14 = vld [vmem:[#allocation16 + $0x48] sm:$0xff]  }
0x33ae   : > { %8192 = vmatmul.mubr.msk.bf16.vlgmr.msra.gmra.mrb[152].mxu1 %vm1448_vm3, %v5950_v57  ;;  %v8599_v57 = vld [vmem:[#allocation16 + $0x50] sm:$0xff]  }
0x33af   : > { %8204 = vmatpush3.bf16.xpose.msra.mxu1 %v6052_v56  ;;  %8205 = vmatprep.mubr.msk.bf16.mxu1 %vm9244_vm0, %v9243_v19  ;;  %v8600_v56 = vld [vmem:[#allocation16 + $0x10] sm:$0xff]  }
0x33b0   : > { %8215 = vmatprep.subr.bf16.mxu1 %v9243_v19 }
0x33b6   : > { %8206 = vmatmul.mubr.msk.bf16.vlgmr.msra.gmra.mrb[156].mxu1 %vm1394_vm1, %v6045_v35  ;;  %v8601_v35 = vld [vmem:[#allocation16 + $0x58] sm:$0xff]  }
0x33b7   : > { %8216 = vmatpush3.bf16.msra.mxu1 %v10814_v50  ;;  %8219 = vmatprep.mubr.msk.bf16.mxu1 %vm9244_vm0, %v9243_v19 }
0x33b8   : > { %8217 = vmatprep.subr.bf16.mxu1 %v9243_v19 }
0x33bb   : > { %8218 = vmatpush3.bf16.msra.mxu1 %v10817_v12 }
0x33bc   : > { %7643 = vmatprep.subr.bf16.mxu1 %v8595_v53  ;;  %v8625_v53 = vld [vmem:[%s11199_s1 + $0x78] sm:$0xff]  }
0x3481   : > { %v5993_v59 = vpop.f32.mrb[152].mxu1 }
0x3482   : > { %v5999_v63 = vpack.c.bf16 %v5993_v59, %v5993_v59  ;;  %v8193_v3 = vpop.f32.mrb[153].mxu1  ;;  %v8602_v59 = vld [vmem:[#allocation16 + $0x18] sm:$0xff]  }
0x3483   : > { %v5996_v4 = vpop.f32.mrb[154].mxu1  ;;  %v8604_v3 = vld [vmem:[#allocation16 + $0x20] sm:$0xff]  }
0x3484   : > { %v8194_v29 = vpop.f32.mrb[155].mxu1  ;;  %8200 = vmatmul.mubr.msk.bf16.vlgmr.msra.gmra.mrb[148].mxu0 %vm1394_vm1, %v5999_v63  ;;  %v8603_v63 = vld [vmem:[#allocation16 + $0x60] sm:$0xff]   ;;  %v8605_v4 = vld [vmem:[#allocation16 + $0x68] sm:$0xff]  }
0x3485   : > { %8211 = vmatprep.mubr.msk.bf16.mxu0 %vm9244_vm0, %v9243_v19  ;;  %v8606_v29 = vld [vmem:[#allocation16 + $0x28] sm:$0xff]  }
0x3489   : > { %v6088_v6 = vpop.f32.mrb[156].mxu1 }
0x348a   : > { %v6089_v50 = vadd.f32 %v10851_v28, %v6088_v6  ;;  %v8207_v52 = vpop.f32.mrb[157].mxu1 }
0x348b   : > { %v6091_v27 = vpop.f32.mrb[158].mxu1 }
0x348c   : > { %v8208_v12 = vpop.f32.mrb[159].mxu1  ;;  %v6094_v62 = vsel %vm1448_vm3, %v6089_v50, -inf }
0x348d   : > { %6095 = vmax.xlane.f32.xlu1 %v6094_v62 }
0x3491   : > { %6204 = vadd.xlane.f32.xlu1 %v6202_v8 }
0x351a   : > { %v6096_v36 = vpop.xlane.xlu1 %6095 }
0x351b   : > { %v6097_v61 = vsub.f32 %v6089_v50, %v6096_v36 }
0x351d   : > { %v6098_v19 = vmul.f32 1.442695, %v6097_v61 }
0x351e   : > { %v6205_v6 = vpop.xlane.xlu1 %6204 }
0x351f   : > { %8739 = vpow2.f32 %v6098_v19  ;;  %v6208_v50 = vmul.f32 0.0078125, %v6205_v6  ;;  %v7368_v19 = vld [vmem:[#allocation20] ss:$0 sm:$0xff] }
0x3521   : > { %v6210_v52 = vadd.f32 1e-06, %v6208_v50 }
0x3529   : > { %v8740_v15 = vpop.eup %8739 }
0x352a   : > { %v6100_v28 = vsel %vm1448_vm3, %v8740_v15, 0.0 }
0x352b   : > { %6101 = vadd.xlane.f32.xlu0 %v6100_v28 }
0x3541   : > { %6106 = vrot.lane.b32.xlu0 %v10842_v17, %s11197_s11  ;;  %s11200_s11 = sld [smem:[#allocation33_spill]] }
0x3547   : > { %s1054_s28 = sand.u32 1, %s11200_s11  }
0x3548   : > { %s7150_s0 = sshll.u32 %s1054_s28, 5  ;;  %s11029_s10 = scalar_lea.sflag [#allocation4], %s1054_s28 }
0x3549   : > { %s10998_s7 = scalar_lea.vmem [#allocation23], %s7150_s0  ;;  %s11203_s0 = sld [smem:[#allocation38_spill]] }
0x354a   : > { %s6860_s5 = sshll.u32 %s10998_s7, 4  ;;  %s11019_s5 = int_to_ptr.vmem [resolvable:$true] %s6860_s5 }
0x354b   : > { %s9133_s4 = scalar_lea.vmem %s11019_s5, 512 }
0x354c   : > { %p9134_p0 = scmp.ne.s32.totalorder %s11019_s5, %s9133_s4 }
0x354f   : > { %p11205_p9 = scmp.ne.s32.totalorder %s11203_s0, 0 }
0x3551   : > { %p9135_p10 = pnand %p9134_p0, %p11205_p9 }
0x3553   : > { %p9136_p13 = pneg %p9135_p10 }
0x3557   : > { %v6037_v9 = vpop.f32.mrb[148].mxu0 }
0x3558   : > { %v6043_v0 = vadd.f32 %v6037_v9, %v10895_v41  ;;  %v8201_v5 = vpop.f32.mrb[149].mxu0  ;;  %v8579_v41 = vld [vmem:[#allocation14 + $0x24] ss:$8 sps:$4 sm:$0xff]  }
0x3559   : > { %v6040_v40 = vpop.f32.mrb[150].mxu0  ;;  %v8607_v5 = vld [vmem:[#allocation16 + $0x70] sm:$0xff]  }
0x355a   : > { %v8202_v38 = vpop.f32.mrb[151].mxu0  ;;  %v8608_v40 = vld [vmem:[#allocation16 + $0x30] sm:$0xff]  }
0x355b   : > { %v8609_v38 = vld [vmem:[#allocation16 + $0x78] sm:$0xff]  }
0x35b8   : > { %v6102_v10 = vpop.xlane.xlu0 %6101 }
0x35b9   : > { %8741 = vrcp.f32 %v6102_v10  ;;  %v8610_v10 = vld [vmem:[#allocation16 + $0x38] sm:$0xff]  }
0x35ba   : > { %8743 = vrsqrt.f32 %v6210_v52 }
0x35bc   : > { %v6107_v30 = vpop.permute.xlu0 %6106 }
0x35bd   : > { %v6112_v11 = vsel %vm1464_vm2, %v6107_v30, 0 }
0x35be   : > { %8210 = vmatpush3.bf16.msra.mxu0 %v6112_v11 }
0x35bf   : > { %6321 = vmatprep.subr.bf16.mxu0 %v8573_v2  ;;  %v8612_v2 = vld [vmem:[%s11199_s1] sm:$0xff]  }
0x35c3   : > { %v8742_v54 = vpop.eup %8741 }
0x35c4   : > { %v6104_v23 = vmul.f32 %v8742_v54, %v8740_v15  ;;  %v8744_v8 = vpop.eup %8743 }
0x35c5   : > { %v6214_v36 = vmul.f32 %v8744_v8, %v10925_v7 }
0x35c6   : > { %v6105_v24 = vpack.c.bf16 %v6104_v23, %v6104_v23 }
0x35c7   : > { %v6222_v28 = vmul.f32 %v7368_v19, %v6214_v36 }
0x35c8   : > { %8212 = vmatmul.mubr.msk.bf16.vlgmr.msra.gmra.mrb[152].mxu0 %vm1448_vm3, %v6105_v24 }
0x35c9   : > { %6353 = vmatprep.mubr.bf16.mxu0 %v9242_v18  ;;  %6322 = vmatpush1.bf16.msra.mxu0 %v8571_v22  ;;  %v8611_v22 = vld [vmem:[%s11198_s8 + $0x40] sm:$0xff]  }
0x35ca   : > { %6323 = vmatprep.subr.bf16.mxu0 %v8576_v49  ;;  %v8613_v49 = vld [vmem:[%s11199_s1 + $0x48] sm:$0xff]  }
0x35cd   : > { %6324 = vmatpush1.bf16.msra.mxu0 %v8574_v39  ;;  %v8614_v39 = vld [vmem:[%s11199_s1 + $0x8] sm:$0xff]  }
0x35ce   : > { %6325 = vmatprep.subr.bf16.mxu0 %v8579_v41  ;;  %v8615_v41 = vld [vmem:[%s11199_s1 + $0x50] sm:$0xff]  }
0x35d1   : > { %6326 = vmatpush1.bf16.msra.mxu0 %v8577_v13  ;;  %v8616_v13 = vld [vmem:[%s11199_s1 + $0x10] sm:$0xff]  }
0x35d2   : > { %6327 = vmatprep.subr.bf16.mxu0 %v8582_v44 }
0x35d5   : > { %6328 = vmatpush1.bf16.msra.mxu0 %v8580_v48 }
0x35d6   : > { %6329 = vmatprep.subr.bf16.mxu0 %v8585_v1 }
0x35d9   : > { %6330 = vmatpush1.bf16.msra.mxu0 %v8583_v45 }
0x35da   : > { %6331 = vmatprep.subr.bf16.mxu0 %v8588_v51 }
0x35dd   : > { %6332 = vmatpush1.bf16.msra.mxu0 %v8586_v34 }
0x35de   : > { %6333 = vmatprep.subr.bf16.mxu0 %v8591_v21 }
0x369b   : > { %v6148_v17 = vpop.f32.mrb[152].mxu0 }
0x369c   : > { %v6154_v25 = vpack.c.bf16 %v6148_v17, %v6148_v17  ;;  %v8213_v26 = vpop.f32.mrb[153].mxu0 }
0x369d   : > { %v6151_v20 = vpop.f32.mrb[154].mxu0 }
0x369e   : > { %v8214_v31 = vpop.f32.mrb[155].mxu0  ;;  %8220 = vmatmul.mubr.msk.bf16.vlgmr.msra.gmra.mrb[160].mxu1 %vm1394_vm1, %v6154_v25 }
0x369f   : > { %7644 = vmatpush3.bf16.msra.mxu1 %v8596_v58  ;;  %v8626_v58 = vld [vmem:[%s11199_s1 + $0x38] sm:$0xff]  }
0x36a0   : > { %7645 = vmatprep.subr.bf16.mxu1 %v8597_v14 }
0x36a3   : > { %7646 = vmatpush3.bf16.msra.mxu1 %v8598_v55 }
0x36a4   : > { %7647 = vmatprep.subr.bf16.mxu1 %v8599_v57 }
0x36a7   : > { %7648 = vmatpush3.bf16.msra.mxu1 %v8600_v56 }
0x36a8   : > { %7649 = vmatprep.subr.bf16.mxu1 %v8601_v35 }
0x36ab   : > { %7650 = vmatpush3.bf16.msra.mxu1 %v8602_v59 }
0x36ac   : > { %7651 = vmatprep.subr.bf16.mxu1 %v8603_v63 }
0x36af   : > { %7652 = vmatpush3.bf16.msra.mxu1 %v8604_v3 }
0x36b0   : > { %7653 = vmatprep.subr.bf16.mxu1 %v8605_v4  ;;  %v7401_v4 = vld [vmem:[#allocation22] ss:$0 sm:$0xff] }
0x36b3   : > { %7654 = vmatpush3.bf16.msra.mxu1 %v8606_v29 }
0x36b4   : > { %7655 = vmatprep.subr.bf16.mxu1 %v8607_v5 }
0x36b7   : > { %7656 = vmatpush3.bf16.msra.mxu1 %v8608_v40 }
0x36b8   : > { %7657 = vmatprep.subr.bf16.mxu1 %v8609_v38 }
0x36bb   : > { %7658 = vmatpush3.bf16.msra.mxu1 %v8610_v10 }
0x3771   : > { %v6192_v18 = vpop.f32.mrb[160].mxu1 }
0x3772   : > { %v6198_v46 = vadd.f32 %v6192_v18, %v6043_v0  ;;  %v8221_v42 = vpop.f32.mrb[161].mxu1  ;;  %v8617_v18 = vld [vmem:[%s11199_s1 + $0x58] sm:$0xff]  }
0x3773   : > { %v6195_v60 = vpop.f32.mrb[162].mxu1  ;;  %v8619_v42 = vld [vmem:[%s11199_s1 + $0x60] sm:$0xff]  }
0x3774   : > { %v10939_v32 = vadd.f32 %v6198_v46, %v10675_v16  ;;  %v8222_v33 = vpop.f32.mrb[163].mxu1  ;;  %v8589_v16 = vld [vmem:[#allocation14 + $0x60] ss:$8 sps:$4 sm:$0xff]   ;;  %v8618_v46 = vld [vmem:[%s11199_s1 + $0x18] sm:$0xff]  }
0x3775   : > { %6334 = vmatpush1.bf16.msra.mxu0 %v8589_v16  ;;  %v8620_v60 = vld [vmem:[%s11199_s1 + $0x20] sm:$0xff]  }
0x3776   : > { %v6203_v43 = vmul.f32 %v10939_v32, %v10939_v32  ;;  %6335 = vmatprep.subr.bf16.mxu0 %v8594_v37  ;;  %v8621_v37 = vld [vmem:[%s11199_s1 + $0x68] sm:$0xff]  }
0x3778   : > { %6206 = vadd.xlane.f32.xlu1 %v6203_v43 }
0x3779   : > { %6336 = vmatpush1.bf16.msra.mxu0 %v8592_v47  ;;  %v8622_v47 = vld [vmem:[%s11199_s1 + $0x28] sm:$0xff]  }
0x377a   : > { %7665 = vmatprep.subr.bf16.mxu0 %v8611_v22 }
0x3805   : > { %v6207_v27 = vpop.xlane.xlu1 %6206 }
0x3806   : > { %v6209_v12 = vmul.f32 0.0078125, %v6207_v27 }
0x3808   : > { %v6211_v62 = vadd.f32 1e-06, %v6209_v12 }
0x380a   : > { %8745 = vrsqrt.f32 %v6211_v62 }
0x3814   : > { %v8746_v61 = vpop.eup %8745 }
0x3815   : > { %v6215_v15 = vmul.f32 %v8746_v61, %v10939_v32 }
0x3817   : > { %v6223_v9 = vmul.f32 %v7368_v19, %v6215_v15 }
0x3819   : > { %v6224_v0 = vpack.c.bf16 %v6223_v9, %v6222_v28  ;;  %v6773_v9 = vld [vmem:[%s1084_s26] sm:$0xff] }
0x381b   : > { %6354 = vmatmul.mubr.bf16.vlgmr.msra.gmra.mrb[156].mxu0 %v6224_v0 }
0x381c   : > { %7666 = vmatpush3.bf16.xpose.msra.mxu0 %v8612_v2  ;;  %v6774_v2 = vld [vmem:[%s1084_s26 + $0x8] sm:$0xff]  ;;  %s11204_s26 = sld [smem:[#allocation54_spill]] }
0x381d   : > { %7667 = vmatprep.subr.bf16.mxu0 %v8613_v49 }
0x3822   : > { %s11025_s30 = scalar_lea.hbm %s11204_s26, %s7425_s29 }
0x3824   : > { %7668 = vmatpush3.bf16.xpose.msra.mxu0 %v8614_v39 }
0x3825   : > { %7669 = vmatprep.subr.bf16.mxu0 %v8615_v41  ;;  %v6770_v41 = vlaneseq }
0x382c   : > { %7670 = vmatpush3.bf16.xpose.msra.mxu0 %v8616_v13 }
0x382d   : > { %7671 = vmatprep.subr.bf16.mxu0 %v8617_v18  ;;  %v11009_v18 = vand.u32 127, %v6770_v41 }
0x3834   : > { %7672 = vmatpush3.bf16.xpose.msra.mxu0 %v8618_v46 }
0x3835   : > { %7673 = vmatprep.subr.bf16.mxu0 %v8619_v42  ;;  %v6772_v42 = vadd.s32 128, %v11009_v18 }
0x383c   : > { %7674 = vmatpush3.bf16.xpose.msra.mxu0 %v8620_v60 }
0x383d   : > { %7675 = vmatprep.subr.bf16.mxu0 %v8621_v37 }
0x3844   : > { %7676 = vmatpush3.bf16.xpose.msra.mxu0 %v8622_v47 }
0x38ee   : > { %v6355_v30 = vpop.f32.mrb[156].mxu0 }
0x38ef   : > { %v6357_v11 = vpop.f32.mrb[157].mxu0  ;;  %v6364_v23 = vmax.f32 %v6355_v30, 0.0 }
0x38f0   : > { %v6359_v54 = vpop.f32.mrb[158].mxu0  ;;  %v6365_v25 = vmax.f32 %v6357_v11, 0.0 }
0x38f1   : > { %v6366_v24 = vmax.f32 %v6359_v54, 0.0  ;;  %v6361_v17 = vpop.f32.mrb[159].mxu0 }
0x38f2   : > { %v6367_v26 = vmax.f32 %v6361_v17, 0.0 }
0x38f3   : > { %v6368_v20 = vpack.c.bf16 %v6366_v24, %v6364_v23 }
0x38f4   : > { %v6369_v31 = vpack.c.bf16 %v6367_v26, %v6365_v25 }
0x38f6   : > { %6530 = vmatprep.mubr.bf16.mxu1 %v6369_v31 }
0x38f7   : > { %6531 = vmatmul.mubr.bf16.vlgmr.msra.gmra.mrb[164].mxu1 %v6368_v20 }
0x39ca   : > { %v7659_v33 = vpop.f32.mrb[164].mxu1 }
0x39cb   : > { %v7660_v43 = vpop.f32.mrb[165].mxu1 }
0x39cc   : > { %v7661_v44 = vadd.f32 %v7660_v43, %v7659_v33  ;;  %v7662_v48 = vpop.f32.mrb[166].mxu1 }
0x39cd   : > { %v7663_v45 = vpop.f32.mrb[167].mxu1 }
0x39ce   : > { %v6539_v1 = vadd.f32 %v7661_v44, %v10925_v7  ;;  %v7664_v51 = vadd.f32 %v7663_v45, %v7662_v48  ;;  %v8623_v7 = vld [vmem:[%s11199_s1 + $0x70] sm:$0xff]  }
0x39cf   : > { %7677 = vmatprep.subr.bf16.mxu0 %v8623_v7 }
0x39d0   : > { %v6540_v34 = vadd.f32 %v7664_v51, %v10939_v32  ;;  %v6542_v21 = vmul.f32 %v6539_v1, %v6539_v1  ;;  %v8624_v32 = vld [vmem:[%s11199_s1 + $0x30] sm:$0xff]  }
0x39d1   : > { %7678 = vmatpush3.bf16.xpose.msra.mxu0 %v8624_v32  ;;  %v6812_v32 = vld [vmem:[%s1090_s6] sm:$0xff] }
0x39d2   : > { %6544 = vadd.xlane.f32.xlu1 %v6542_v21  ;;  %v6543_v16 = vmul.f32 %v6540_v34, %v6540_v34  ;;  %7679 = vmatprep.subr.bf16.mxu0 %v8625_v53 }
0x39d6   : > { %6546 = vadd.xlane.f32.xlu1 %v6543_v16 }
0x39d9   : > { %7680 = vmatpush3.bf16.xpose.msra.mxu0 %v8626_v58  ;;  %v6813_v58 = vld [vmem:[%s1090_s6 + $0x8] sm:$0xff] }
0x3a5f   : > { %v6545_v14 = vpop.xlane.xlu1 %6544 }
0x3a60   : > { %v6548_v55 = vmul.f32 0.0078125, %v6545_v14 }
0x3a62   : > { %v6550_v57 = vadd.f32 1e-06, %v6548_v55 }
0x3a63   : > { %v6547_v56 = vpop.xlane.xlu1 %6546 }
0x3a64   : > { %8747 = vrsqrt.f32 %v6550_v57  ;;  %v6549_v35 = vmul.f32 0.0078125, %v6547_v56 }
0x3a66   : > { %v6551_v59 = vadd.f32 1e-06, %v6549_v35 }
0x3a68   : > { %8749 = vrsqrt.f32 %v6551_v59 }
0x3a6e   : > { %v8748_v63 = vpop.eup %8747 }
0x3a6f   : > { %v6554_v3 = vmul.f32 %v8748_v63, %v6539_v1 }
0x3a71   : > { %v6562_v50 = vmul.f32 %v7401_v4, %v6554_v3 }
0x3a72   : > { %v8750_v29 = vpop.eup %8749 }
0x3a73   : > { %v6555_v6 = vmul.f32 %v8750_v29, %v6540_v34  ;;  %v6564_v27 = vmul.f32 0.088388346, %v6562_v50 }
0x3a75   : > { %v6563_v52 = vmul.f32 %v7401_v4, %v6555_v6 }
0x3a77   : > { %v6565_v12 = vmul.f32 0.088388346, %v6563_v52 }
0x3a79   : > { %v6566_v62 = vpack.c.bf16 %v6565_v12, %v6564_v27 }
0x3a7b   : > { %7681 = vmatprep.mubr.bf16.mxu0 %v6566_v62 }
0x3a7c   : > { %7682 = vmatmul.mubr.bf16.vlgmr.msra.gmra.mrb[160].mxu0 %v6566_v62 }
0x3b4f   : > { %v6729_v8 = vpop.f32.mrb[160].mxu0 }
0x3b50   : > { %6738 = vst [vmem:[%s10998_s7] sm:$0xff] %v6729_v8  ;;  %v6731_v36 = vpop.f32.mrb[161].mxu0 }
0x3b51   : > { %6739 = vst [vmem:[%s10998_s7 + $0x8] sm:$0xff] %v6731_v36  ;;  %v6742_v61 = vmax.f32 %v6729_v8, %v6731_v36  ;;  %v6733_v19 = vpop.f32.mrb[162].mxu0 }
0x3b52   : > { %6740 = vst [vmem:[%s10998_s7 + $0x10] sm:$0xff] %v6733_v19  ;;  %v6735_v15 = vpop.f32.mrb[163].mxu0 }
0x3b53   : > { %6741 = vst [vmem:[%s10998_s7 + $0x18] sm:$0xff] %v6735_v15  ;;  %v6745_v28 = vmax.f32 %v6733_v19, %v6735_v15  ;;  %6743 = vmax.xlane.f32.xlu1 %v6742_v61  ;;  %s9248_s7 = smov [#allocation23]  }
0x3b54   : > { %s9137_s6 = sshll.u32 %s9248_s7, 4  ;;  %s9138_s6 = int_to_ptr.vmem [resolvable:$false] %s9137_s6 }
0x3b55   : > { %6746 = vmax.xlane.f32.xlu0 %v6745_v28  ;;  %s9139_s1 = scalar_lea.vmem %s9138_s6, 1024  ;;  %p9140_p12 = scmp.lt.s32.totalorder %s11019_s5, %s9138_s6 }
0x3b56   : > { %p9141_p1 = scmp.lt.s32.totalorder %s9139_s1, %s9133_s4 }
0x3b58   : > { %p9142_p2 = por %p9141_p1, %p9140_p12 }
0x3b5a   : > { %p9143_p3 = pnand %p9142_p2, %p9136_p13 }
0x3b64   : > { %6776 = vperm.xlu1 %8409, %v6773_v9  }
0x3be0   : > { %v6744_v0 = vpop.xlane.xlu1 %6743 }
0x3be1   : > { %v6748_v5 = vsub.f32 %v6729_v8, %v6744_v0  ;;  %v6749_v40 = vsub.f32 %v6731_v36, %v6744_v0 }
0x3be2   : > { %v6747_v38 = vpop.xlane.xlu0 %6746 }
0x3be3   : > { %v6752_v10 = vmul.f32 1.442695, %v6748_v5  ;;  %v6754_v30 = vmul.f32 1.442695, %v6749_v40  ;;  %v6750_v11 = vsub.f32 %v6733_v19, %v6747_v38  ;;  %v6751_v54 = vsub.f32 %v6735_v15, %v6747_v38 }
0x3be4   : > { %v6777_v49 = vpop.permute.xlu1 %6776 }
0x3be5   : > { %8751 = vpow2.f32 %v6752_v10  ;;  %v6756_v23 = vmul.f32 1.442695, %v6750_v11  ;;  %v6758_v24 = vmul.f32 1.442695, %v6751_v54  ;;  %vm6781_vm4 = vcmp.eq.s32.totalorder %v11009_v18, %v6777_v49 }
0x3be6   : > { %8753 = vpow2.f32 %v6754_v30  ;;  %vm6782_vm5 = vcmp.eq.s32.totalorder %v6772_v42, %v6777_v49 }
0x3be7   : > { %8755 = vpow2.f32 %v6756_v23 }
0x3be8   : > { %8757 = vpow2.f32 %v6758_v24 }
0x3bef   : > { %v8752_v17 = vpop.eup %8751 }
0x3bf0   : > { %v8754_v25 = vpop.eup %8753 }
0x3bf1   : > { %v8756_v26 = vpop.eup %8755  ;;  %v6760_v20 = vadd.f32 %v8754_v25, %v8752_v17 }
0x3bf2   : > { %v8758_v31 = vpop.eup %8757 }
0x3bf3   : > { %6761 = vadd.xlane.f32.xlu1 %v6760_v20  ;;  %v6763_v22 = vadd.f32 %v8758_v31, %v8756_v26 }
0x3bf7   : > { %6764 = vadd.xlane.f32.xlu1 %v6763_v22 }
0x3c08   : > { %6779 = vperm.xlu1 %8409, %v6774_v2  }
0x3c80   : > { %v6762_v39 = vpop.xlane.xlu1 %6761 }
0x3c81   : > { %8759 = vlog2.f32 %v6762_v39 }
0x3c84   : > { %v6765_v13 = vpop.xlane.xlu1 %6764 }
0x3c85   : > { %8761 = vlog2.f32 %v6765_v13 }
0x3c88   : > { %v6780_v45 = vpop.permute.xlu1 %6779 }
0x3c89   : > { %vm6783_vm6 = vcmp.eq.s32.totalorder %v11009_v18, %v6780_v45  ;;  %vm6784_vm7 = vcmp.eq.s32.totalorder %v6772_v42, %v6780_v45 }
0x3c8b   : > { %v8760_v46 = vpop.eup %8759 }
0x3c8c   : > { %v6767_v60 = vmul.f32 0.6931472, %v8760_v46 }
0x3c8e   : > { %v6785_v33 = vsub.f32 %v6748_v5, %v6767_v60  ;;  %v6786_v43 = vsub.f32 %v6749_v40, %v6767_v60 }
0x3c8f   : > { %v8762_v44 = vpop.eup %8761 }
0x3c90   : > { %v6769_v48 = vmul.f32 0.6931472, %v8762_v44  ;;  %v6789_v1 = vsel %vm6781_vm4, %v6785_v33, 0.0  ;;  %v6790_v51 = vsel %vm6782_vm5, %v6786_v43, 0.0 }
0x3c91   : > { %v6793_v34 = vadd.f32 %v6790_v51, %v6789_v1 }
0x3c92   : > { %v6787_v21 = vsub.f32 %v6750_v11, %v6769_v48  ;;  %v6788_v16 = vsub.f32 %v6751_v54, %v6769_v48 }
0x3c93   : > { %6794 = vadd.xlane.f32.xlu0 %v6793_v34 }
0x3c94   : > { %v6791_v37 = vsel %vm6783_vm6, %v6787_v21, 0.0  ;;  %v6792_v47 = vsel %vm6784_vm7, %v6788_v16, 0.0 }
0x3c95   : > { %v6796_v7 = vadd.f32 %v6792_v47, %v6791_v37 }
0x3c97   : > { %6797 = vadd.xlane.f32.xlu1 %v6796_v7 }
0x3d20   : > { %v6795_v53 = vpop.xlane.xlu0 %6794 }
0x3d21   : > { %v6800_v55 = vsel %vm6799_vm8, %v6795_v53, 0.0  ;;  %v6814_v57 = vmul.f32 %v6812_v32, %v6795_v53 }
0x3d23   : > { %v6816_v3 = vsel %vm6799_vm8, %v6814_v57, 0.0 }
0x3d24   : > { %v6798_v14 = vpop.xlane.xlu1 %6797 }
0x3d25   : > { %v6801_v56 = vsel %vm6799_vm8, %v6798_v14, 0.0  ;;  %v6815_v35 = vmul.f32 %v6813_v58, %v6798_v14 }
0x3d26   : > { %v6802_v59 = vadd.f32 %v6801_v56, %v6800_v55 }
0x3d27   : > { %v6817_v63 = vsel %vm6799_vm8, %v6815_v35, 0.0 }
0x3d28   : > { %6803 = vadd.xlane.f32.xlu0 %v6802_v59  ;;  %v6818_v4 = vadd.f32 %v6817_v63, %v6816_v3 }
0x3d2c   : > { %6819 = vadd.xlane.f32.xlu0 %v6818_v4 }
0x3d2d   : > { %9146 = shalt.err (!%p9143_p3)
}
0x3d2e   : > { %s9147_s11 = scalar_lea.hbm %s11025_s30, 512  ;;  %s9151_s8 = scalar_lea.hbm %s11204_s26, 1024 }
0x3d2f   : > { %p9148_p4 = scmp.ne.s32.totalorder %s11025_s30, %s9147_s11  ;;  %p9152_p11 = scmp.lt.u32.totalorder %s11025_s30, %s11204_s26 }
0x3d30   : > { %p9153_p5 = scmp.lt.u32.totalorder %s9151_s8, %s9147_s11  ;;  %p9155_p0 = scmp.lt.u32.totalorder %s9147_s11, %s11025_s30 }
0x3d31   : > { %p9149_p7 = pnand %p9148_p4, %p11205_p9 }
0x3d32   : > { %p9154_p6 = por %p9153_p5, %p9152_p11 }
0x3d33   : > { %p9150_p8 = pneg %p9149_p7 }
0x3d34   : > { %p9156_p10 = por %p9155_p0, %p9154_p6 }
0x3d36   : > { %p9157_p13 = pnand %p9156_p10, %p9150_p8 }
0x3d38   : > { %9160 = shalt.err (!%p9157_p13)
}
0x3d39   : > { %s9249_s1 = smov 256   ;;  %s9250_s4 = smov 16   ;;  %v6829_v0 = vshrl.u32 %v6770_v41, 7  ;;  %vm6831_vm10 = vcmp.eq.s32.totalorder %v11009_v18, 0  ;;  %vm6835_vm11 = vcmp.eq.s32.totalorder %v11009_v18, 1 }
0x3d3a   : > { %8279 = dma.vmem_to_hbm [thread:$0]  (%p11205_p9), %s11019_s5, 512, %s11025_s30, %s11029_s10, %s9249_s1, %s9249_s1, %s9250_s4  }
0x3d3b   : > { %p1093_p9 = scmp.lt.s32.totalorder %s9412_s9, 1  ;;  %vm6830_vm9 = vcmp.eq.s32.totalorder %v6829_v0, 0  ;;  %s11206_s11 = sld [smem:[#allocation55_spill]] }
0x3d3c   : > { %vm6832_vm12 = vmand %vm6830_vm9, %vm6831_vm10 }
0x3d3d   : > { %s11218_s9 = smov (!%p1093_p9, %s9412_s9), 1  ;;  %vm6836_vm13 = vmand %vm6830_vm9, %vm6835_vm11 }
0x3d3e   : > { %s7160_s5 = sshll.u32 %s11218_s9, 3 }
0x3d41   : > { %s1096_s28 = scalar_lea.vmem %s11206_s11, %s7160_s5 }
0x3db5   : > { %v6804_v29 = vpop.xlane.xlu0 %6803 }
0x3db6   : > { %v6805_v6 = vrot.slane %v6804_v29, 4 }
0x3db8   : > { %v6806_v50 = vadd.f32 %v6805_v6, %v6804_v29 }
0x3db9   : > { %v6820_v52 = vpop.xlane.xlu0 %6819 }
0x3dba   : > { %v6807_v27 = vrot.slane %v6806_v50, 2  ;;  %v6821_v12 = vrot.slane %v6820_v52, 4 }
0x3dbc   : > { %v6822_v62 = vadd.f32 %v6821_v12, %v6820_v52  ;;  %v6808_v8 = vadd.f32 %v6807_v27, %v6806_v50 }
0x3dbe   : > { %v6823_v36 = vrot.slane %v6822_v62, 2  ;;  %v6809_v61 = vrot.slane %v6808_v8, 1 }
0x3dc0   : > { %v6824_v19 = vadd.f32 %v6823_v36, %v6822_v62  ;;  %v6810_v15 = vadd.f32 %v6809_v61, %v6808_v8 }
0x3dc2   : > { %8223 = vpush %v6810_v15  ;;  %v6825_v28 = vrot.slane %v6824_v19, 1 }
0x3dc4   : > { %v6826_v9 = vadd.f32 %v6825_v28, %v6824_v19 }
0x3dc6   : > { %8225 = vpush %v6826_v9 }
0x3df3   : > { %s8224_s0 = spop %8223 }
0x3df4   : > { %v6833_v5 = vstv %s8224_s0 }
0x3df5   : > { %v6834_v38 = vsel %vm6832_vm12, %v6833_v5, 0.0 }
0x3df7   : > { %s8226_s30 = spop %8225 }
0x3df8   : > { %v6837_v40 = vstv %s8226_s30 }
0x3df9   : > { %v6838_v10 = vsel %vm6836_vm13, %v6837_v40, 0.0 }
0x3dfa   : > { %v6839_v30 = vadd.f32 %v6838_v10, %v6834_v38 }
0x3dfc   : > { %6840 = vst [vmem:[%s1096_s28] sm:$0xff] %v6839_v30 }
0x3dfd PF: > { %s11207_s29 = sld [smem:[#allocation35_spill]]  ;;  %s11208_s8 = sld [smem:[#allocation32_spill]] }
0x3dfe   : > { %s11209_s2 = sld [smem:[#allocation39_spill]] }
0x3e03   : > { %p8351_p12 = scmp.ge.s32.totalorder %s11207_s29, 2  ;;  %s6878_s7 = sand.u32 1, %s11208_s8  }
0x3e04   : > { %p11210_p1 = scmp.ne.s32.totalorder %s11209_s2, 0  ;;  %s6879_s9 = scalar_lea.sflag [#allocation4], %s6878_s7 }
0x3e06   : > { %p8322_p2 = pnand %p8351_p12, %p11210_p1 }
0x3e08   : > { %9206 = dma.done.wait (!%p8322_p2), %s6879_s9, 512  }
0x3e09   : > { %9208 = vsyncadd (!%p8322_p2), %s6879_s9, 4294966784  ;;  %s11211_s30 = sld [smem:[#allocation36_spill]]  ;;  %s11212_s7 = sld [smem:[#allocation33_spill]] }
0x3e0a   : > { %s11213_s4 = sld [smem:[#allocation34_spill]]  ;;  %s11214_s8 = sld [smem:[#allocation37_spill]] }
0x3e0f   : > { %p45_p3 = scmp.ge.s32.totalorder %s11211_s30, 4  }
0x3e11   :  { %47 = sbr.rel (!%p45_p3) target bundleno = 27 (0x1b), region = 236 }
0x3e18   :  { %6891 = vsyncpa [#allocation3], 1 }
0x3e19   :  { %6893 = vsyncpa [#allocation3 + $0x1], 1 }
0x3e1a   :  { %6894 = vsyncpa [#allocation6], 1 }
0x3e1b   :  { %6895 = vsyncpa [#allocation9], 1 }
0x3e1c   :  { %6896 = vsyncpa [#allocation12], 1 }
0x3e1d   :  { %6897 = vsyncpa [#allocation15], 1 }
0x3e1e   :  { %6898 = vsyncpa [#allocation18], 1 }
0x3e1f   :  { %6899 = vsyncpa [#allocation21], 1 }
0x3e20   :  { %6900 = vsyncpa [#allocation4], 1 }
0x3e21   :  { %6902 = vsyncpa [#allocation4 + $0x1], 1 }

</bundles_post_ra>
